<compile_context>
chip_gen: v7x
topology: tpu7x:2x2x1
jax: 0.10.0
libtpu: 0.0.40
codegen_flags: <defaults>
</compile_context>

<pallas_src>
import functools

import jax
import jax.numpy as jnp
import numpy as np
from jax import lax
from jax.experimental import pallas as pl
from jax.experimental.pallas import tpu as pltpu


# ---------------------------------------------------------------------------
# Fused kernel
# ---------------------------------------------------------------------------

def _make_kernel(H, W, Cin, P, Cout, stride, has_sc, mm_dtype):
    Ho = (H - 1) // stride + 1
    Wo = (W - 1) // stride + 1

    def kernel(*refs):
        if has_sc:
            (x_ref, w1_ref, w2_ref, w3_ref, wsc_ref,
             s1_ref, b1_ref, b2_ref, b3_ref, o_ref) = refs
        else:
            (x_ref, w1_ref, w2_ref, w3_ref,
             s1_ref, b1_ref, b2_ref, b3_ref, o_ref) = refs
            wsc_ref = None

        # ---- bn1 + relu (folded affine); stays in VMEM -----------------------
        x = x_ref[...]                                          # (H*W, Cin) f32
        pre = jnp.maximum(x * s1_ref[...] + b1_ref[...], 0.0)   # relu(bn1(x))
        pre_mm = pre.astype(mm_dtype)

        # ---- conv1 (1x1) as matmul; bn2 scale pre-folded into w1 -------------
        y1 = jnp.dot(pre_mm, w1_ref[...], preferred_element_type=jnp.float32)
        y1 = jnp.maximum(y1 + b2_ref[...], 0.0)                 # (H*W, P) f32

        # ---- conv2 (3x3, stride, pad=1); bn3 scale pre-folded into w2 --------
        # zero-pad spatially in VMEM (no HBM jnp.pad round trip)
        y1_3d = y1.reshape(H, W, P)
        zr = jnp.zeros((1, W, P), jnp.float32)
        zc = jnp.zeros((H + 2, 1, P), jnp.float32)
        padv = jnp.concatenate([zr, y1_3d, zr], axis=0)         # (H+2, W,   P)
        padv = jnp.concatenate([zc, padv, zc], axis=1)          # (H+2, W+2, P)

        # Polyphase split: with stride s, tap (kh, kw) only touches padded
        # positions of parity (kh % s, kw % s).  Splitting once turns every
        # strided tap into a *contiguous* window, so only the Ho*Wo outputs
        # that are actually needed are ever computed.
        if stride == 1:
            phases = {(0, 0): padv}
        else:
            hp, wp = (H + 2) // stride, (W + 2) // stride
            by_row = padv.reshape(hp, stride, W + 2, P)
            phases = {}
            for a in range(stride):
                row_a = by_row[:, a, :, :]                      # (hp, W+2, P)
                by_col = row_a.reshape(hp, wp, stride, P)
                for b in range(stride):
                    phases[(a, b)] = by_col[:, :, b, :]         # (hp, wp, P)

        acc = jnp.zeros((Ho * Wo, P), jnp.float32)
        for kh in range(3):
            for kw in range(3):
                src = phases[(kh % stride, kw % stride)]
                tap = src[kh // stride:kh // stride + Ho,
                          kw // stride:kw // stride + Wo, :]
                acc = acc + jnp.dot(tap.reshape(Ho * Wo, P).astype(mm_dtype),
                                    w2_ref[kh * 3 + kw],
                                    preferred_element_type=jnp.float32)
        y2 = jnp.maximum(acc + b3_ref[...], 0.0)                # (Ho*Wo, P) f32

        # ---- conv3 (1x1) + shortcut + residual add ---------------------------
        out = jnp.dot(y2.astype(mm_dtype), w3_ref[...],
                      preferred_element_type=jnp.float32)       # (Ho*Wo, Cout)
        if has_sc:
            if stride == 1:
                sc_in = pre_mm                                  # (H*W, Cin)
            else:
                p3 = pre_mm.reshape(H, W, Cin)
                p3 = p3.reshape(Ho, stride, W, Cin)[:, 0, :, :]
                p3 = p3.reshape(Ho, Wo, stride, Cin)[:, :, 0, :]
                sc_in = p3.reshape(Ho * Wo, Cin)
            out = out + jnp.dot(sc_in, wsc_ref[...],
                                preferred_element_type=jnp.float32)
        else:
            # identity shortcut uses the *original* x (stride==1, Cin==Cout)
            out = out + x
        o_ref[...] = out.astype(o_ref.dtype)

    return kernel


# ---------------------------------------------------------------------------
# Wrappers
# ---------------------------------------------------------------------------

def preact_bottleneck_nhwc(x_nhwc, params, stride, mm_dtype=jnp.float32):
    """Fused PreActBottleneck forward (NHWC in, NHWC out)."""
    N, H, W, Cin = x_nhwc.shape
    P = params["w1"].shape[1]
    Cout = params["w3"].shape[1]
    if stride != 1:
        assert stride == 2 and H % 2 == 0 and W % 2 == 0, (
            "polyphase conv2 path assumes even spatial dims for stride 2")
    Ho = (H - 1) // stride + 1
    Wo = (W - 1) // stride + 1
    has_sc = params["wsc"] is not None

    # Glue-time weight prep (outside the kernel hot loop): fold bn2/bn3 scales
    # into conv1/conv2 weights; cast matmul operands to mm_dtype (bf16 keeps the
    # v5e/v6e MXU fed; accumulation stays f32 via preferred_element_type).
    w1 = (params["w1"] * params["s2"][None, :]).astype(mm_dtype)          # (Cin, P)
    w2 = (params["w2"] * params["s3"][None, None, :]).astype(mm_dtype)    # (9, P, P)
    w3 = params["w3"].astype(mm_dtype)                                    # (P, Cout)
    s1 = params["s1"].reshape(1, Cin).astype(jnp.float32)
    b1 = params["b1"].reshape(1, Cin).astype(jnp.float32)
    b2 = params["b2"].reshape(1, P).astype(jnp.float32)
    b3 = params["b3"].reshape(1, P).astype(jnp.float32)

    x2d = x_nhwc.reshape(N, H * W, Cin).astype(jnp.float32)

    inputs = [x2d, w1, w2, w3]
    in_specs = [
        pl.BlockSpec((None, H * W, Cin), lambda n: (n, 0, 0)),
        pl.BlockSpec((Cin, P), lambda n: (0, 0)),
        pl.BlockSpec((9, P, P), lambda n: (0, 0, 0)),
        pl.BlockSpec((P, Cout), lambda n: (0, 0)),
    ]
    if has_sc:
        inputs.append(params["wsc"].astype(mm_dtype))
        in_specs.append(pl.BlockSpec((Cin, Cout), lambda n: (0, 0)))
    inputs += [s1, b1, b2, b3]
    in_specs += [pl.BlockSpec((1, Cin), lambda n: (0, 0)),
                 pl.BlockSpec((1, Cin), lambda n: (0, 0)),
                 pl.BlockSpec((1, P), lambda n: (0, 0)),
                 pl.BlockSpec((1, P), lambda n: (0, 0))]

    kernel = _make_kernel(H, W, Cin, P, Cout, stride, has_sc, mm_dtype)
    out = pl.pallas_call(
        kernel,
        out_shape=jax.ShapeDtypeStruct((N, Ho * Wo, Cout), jnp.float32),
        grid=(N,),
        in_specs=in_specs,
        out_specs=pl.BlockSpec((None, Ho * Wo, Cout), lambda n: (n, 0, 0)),
        compiler_params=pltpu.CompilerParams(
            dimension_semantics=("parallel",),        # megacore / 2 TCs on v7x
            vmem_limit_bytes=32 * 1024 * 1024,
        ),
    )(*inputs)
    return out.reshape(N, Ho, Wo, Cout)


def preact_bottleneck_nchw(x_nchw, params, stride, mm_dtype=jnp.float32):
    # Layout conversion happens ONCE at the module boundary; a full network
    # would keep NHWC end-to-end and skip these transposes entirely.
    x = jnp.transpose(x_nchw, (0, 2, 3, 1))
    y = preact_bottleneck_nhwc(x, params, stride, mm_dtype)
    return jnp.transpose(y, (0, 3, 1, 2))


# ---------------------------------------------------------------------------
# Deterministic parameter construction (shapes follow the PyTorch __init__)
# ---------------------------------------------------------------------------

def make_params(key, in_planes, planes, stride, expansion=4):
    """Eval-mode BN folded to per-channel (scale, bias); fan-in scaled weights."""
    eps = 1e-5
    out_planes = expansion * planes

    def bn_fold(c, shift):
        r = jnp.arange(c, dtype=jnp.float32) / max(c - 1, 1)
        gamma = 1.0 + 0.5 * r
        beta = 0.2 * (r - 0.5) - 0.05 * shift
        mean = 0.1 * r + 0.02 * shift
        var = 1.0 + 0.3 * r
        scale = gamma / jnp.sqrt(var + eps)
        bias = beta - mean * scale
        return scale, bias

    k1, k2, k3, k4 = jax.random.split(key, 4)
    s1, b1 = bn_fold(in_planes, 1)
    s2, b2 = bn_fold(planes, 2)
    s3, b3 = bn_fold(planes, 3)

    w1 = jax.random.normal(k1, (in_planes, planes), jnp.float32) / np.sqrt(in_planes)
    w2_hwio = (jax.random.normal(k2, (3, 3, planes, planes), jnp.float32)
               / np.sqrt(9 * planes))
    w3 = jax.random.normal(k3, (planes, out_planes), jnp.float32) / np.sqrt(planes)
    wsc = (jax.random.normal(k4, (in_planes, out_planes), jnp.float32)
           / np.sqrt(in_planes)
           if (stride != 1 or in_planes != out_planes) else None)

    return dict(s1=s1, b1=b1, s2=s2, b2=b2, s3=s3, b3=b3,
                w1=w1, w2=w2_hwio.reshape(9, planes, planes), w2_hwio=w2_hwio,
                w3=w3, wsc=wsc)


# ---------------------------------------------------------------------------
# Pure-JAX reference (same eval-mode BN semantics)
# ---------------------------------------------------------------------------

def ref_forward_nhwc(x, p, stride):
    def conv1x1(y, w, s):
        return lax.conv_general_dilated(
            y, w[None, None], (s, s), "VALID",
            dimension_numbers=("NHWC", "HWIO", "NHWC"))

    pre = jnp.maximum(x * p["s1"] + p["b1"], 0.0)
    shortcut = conv1x1(pre, p["wsc"], stride) if p["wsc"] is not None else x
    out = conv1x1(pre, p["w1"], 1)
    out = jnp.maximum(out * p["s2"] + p["b2"], 0.0)
    out = lax.conv_general_dilated(out, p["w2_hwio"], (stride, stride),
                                   ((1, 1), (1, 1)),
                                   dimension_numbers=("NHWC", "HWIO", "NHWC"))
    out = jnp.maximum(out * p["s3"] + p["b3"], 0.0)
    out = conv1x1(out, p["w3"], 1) + shortcut
    return out


if __name__ == "__main__":
    root = jax.random.PRNGKey(0)

    # (batch, in_planes, planes, stride, H=W, matmul dtype, rtol, atol)
    configs = [
        # spec-sized toy: conv shortcut, stride 2, f32 operands, tight check
        (2, 4, 4, 2, 16, jnp.float32, 1e-4, 1e-4),
        # identity shortcut, stride 1, lane-dense channels (Cout = 128),
        # bf16 MXU operands with f32 accumulation (looser check: operand quant.)
        (2, 128, 32, 1, 16, jnp.bfloat16, 5e-2, 1e-1),
    ]

    for i, (n, cin, planes, stride, hw, mmdt, rtol, atol) in enumerate(configs):
        kx, kp = jax.random.split(jax.random.fold_in(root, i))
        x = jax.random.normal(kx, (n, cin, hw, hw), jnp.float32)
        params = make_params(kp, cin, planes, stride)

        fwd = jax.jit(functools.partial(
            preact_bottleneck_nchw, stride=stride, mm_dtype=mmdt))
        out = jax.block_until_ready(fwd(x, params))

        ho = (hw - 1) // stride + 1
        assert out.shape == (n, 4 * planes, ho, ho), out.shape

        ref = jnp.transpose(
            ref_forward_nhwc(jnp.transpose(x, (0, 2, 3, 1)), params, stride),
            (0, 3, 1, 2))
        np.testing.assert_allclose(np.asarray(out), np.asarray(ref),
                                   rtol=rtol, atol=atol)

    print("KERNEL_OK")
</pallas_src>

<mosaic_0001>
module attributes {stable_mosaic.version = 11 : i64} {
  func.func @kernel(%arg0: i32, %arg1: memref<1x256x4xf32, #tpu.memory_space<vmem>>, %arg2: memref<4x4xf32, #tpu.memory_space<vmem>>, %arg3: memref<9x4x4xf32, #tpu.memory_space<vmem>>, %arg4: memref<4x16xf32, #tpu.memory_space<vmem>>, %arg5: memref<4x16xf32, #tpu.memory_space<vmem>>, %arg6: memref<1x4xf32, #tpu.memory_space<vmem>>, %arg7: memref<1x4xf32, #tpu.memory_space<vmem>>, %arg8: memref<1x4xf32, #tpu.memory_space<vmem>>, %arg9: memref<1x4xf32, #tpu.memory_space<vmem>>, %arg10: memref<1x64x16xf32, #tpu.memory_space<vmem>>) attributes {dimension_semantics = [#tpu.dimension_semantics<parallel>], iteration_bounds = array<i64: 2>, scalar_prefetch = 0 : i64, scratch_operands = 0 : i64, tpu.core_type = #tpu.core_type<tc>, window_params = [{transform_indices = @transform_0, window_bounds = array<i64: 1, 256, 4>}, {pipeline_mode = #tpu.pipeline_mode<synchronous>, transform_indices = @transform_1, window_bounds = array<i64: 4, 4>}, {pipeline_mode = #tpu.pipeline_mode<synchronous>, transform_indices = @transform_2, window_bounds = array<i64: 9, 4, 4>}, {pipeline_mode = #tpu.pipeline_mode<synchronous>, transform_indices = @transform_3, window_bounds = array<i64: 4, 16>}, {pipeline_mode = #tpu.pipeline_mode<synchronous>, transform_indices = @transform_4, window_bounds = array<i64: 4, 16>}, {pipeline_mode = #tpu.pipeline_mode<synchronous>, transform_indices = @transform_5, window_bounds = array<i64: 1, 4>}, {pipeline_mode = #tpu.pipeline_mode<synchronous>, transform_indices = @transform_6, window_bounds = array<i64: 1, 4>}, {pipeline_mode = #tpu.pipeline_mode<synchronous>, transform_indices = @transform_7, window_bounds = array<i64: 1, 4>}, {pipeline_mode = #tpu.pipeline_mode<synchronous>, transform_indices = @transform_8, window_bounds = array<i64: 1, 4>}, {transform_indices = @transform_9, window_bounds = array<i64: 1, 64, 16>}]} {
    %c0 = arith.constant 0 : index
    %c0_0 = arith.constant 0 : index
    %c0_1 = arith.constant 0 : index
    %0 = vector.load %arg1[%c0, %c0_0, %c0_1] : memref<1x256x4xf32, #tpu.memory_space<vmem>>, vector<1x256x4xf32>
    %1 = vector.shape_cast %0 : vector<1x256x4xf32> to vector<256x4xf32>
    %c0_2 = arith.constant 0 : index
    %c0_3 = arith.constant 0 : index
    %2 = vector.load %arg6[%c0_2, %c0_3] : memref<1x4xf32, #tpu.memory_space<vmem>>, vector<1x4xf32>
    %3 = vector.broadcast %2 : vector<1x4xf32> to vector<256x4xf32>
    %4 = arith.mulf %1, %3 : vector<256x4xf32>
    %c0_4 = arith.constant 0 : index
    %c0_5 = arith.constant 0 : index
    %5 = vector.load %arg7[%c0_4, %c0_5] : memref<1x4xf32, #tpu.memory_space<vmem>>, vector<1x4xf32>
    %6 = vector.broadcast %5 : vector<1x4xf32> to vector<256x4xf32>
    %7 = arith.addf %4, %6 : vector<256x4xf32>
    %cst = arith.constant 0.000000e+00 : f32
    %8 = vector.broadcast %cst : f32 to vector<256x4xf32>
    %9 = arith.maximumf %7, %8 : vector<256x4xf32>
    %c0_6 = arith.constant 0 : index
    %c0_7 = arith.constant 0 : index
    %10 = vector.load %arg2[%c0_6, %c0_7] : memref<4x4xf32, #tpu.memory_space<vmem>>, vector<4x4xf32>
    %cst_8 = arith.constant dense<0.000000e+00> : vector<256x4xf32>
    %11 = tpu.matmul %9, %10, %cst_8 {dimension_numbers = #tpu.dot_dimension_numbers<[1], [0], [0], [1], [0, 0, 1, 1], [], []>} : vector<256x4xf32>, vector<4x4xf32>, vector<256x4xf32> -> vector<256x4xf32>
    %c0_9 = arith.constant 0 : index
    %c0_10 = arith.constant 0 : index
    %12 = vector.load %arg8[%c0_9, %c0_10] : memref<1x4xf32, #tpu.memory_space<vmem>>, vector<1x4xf32>
    %13 = vector.broadcast %12 : vector<1x4xf32> to vector<256x4xf32>
    %14 = arith.addf %11, %13 : vector<256x4xf32>
    %cst_11 = arith.constant 0.000000e+00 : f32
    %15 = vector.broadcast %cst_11 : f32 to vector<256x4xf32>
    %16 = arith.maximumf %14, %15 : vector<256x4xf32>
    %17 = vector.shape_cast %16 : vector<256x4xf32> to vector<16x16x4xf32>
    %cst_12 = arith.constant 0.000000e+00 : f32
    %18 = vector.broadcast %cst_12 : f32 to vector<1x16x4xf32>
    %cst_13 = arith.constant 0.000000e+00 : f32
    %19 = vector.broadcast %cst_13 : f32 to vector<18x1x4xf32>
    %20 = tpu.concatenate %18, %17, %18 in 0 : vector<1x16x4xf32>, vector<16x16x4xf32>, vector<1x16x4xf32> -> vector<18x16x4xf32>
    %21 = tpu.concatenate %19, %20, %19 in 1 : vector<18x1x4xf32>, vector<18x16x4xf32>, vector<18x1x4xf32> -> vector<18x18x4xf32>
    %22 = vector.shape_cast %21 : vector<18x18x4xf32> to vector<9x2x18x4xf32>
    %23 = vector.extract_strided_slice %22 {offsets = [0, 0, 0, 0], sizes = [9, 1, 18, 4], strides = [1, 1, 1, 1]} : vector<9x2x18x4xf32> to vector<9x1x18x4xf32>
    %24 = vector.shape_cast %23 : vector<9x1x18x4xf32> to vector<9x18x4xf32>
    %25 = vector.shape_cast %24 : vector<9x18x4xf32> to vector<9x9x2x4xf32>
    %26 = vector.extract_strided_slice %25 {offsets = [0, 0, 0, 0], sizes = [9, 9, 1, 4], strides = [1, 1, 1, 1]} : vector<9x9x2x4xf32> to vector<9x9x1x4xf32>
    %27 = vector.shape_cast %26 : vector<9x9x1x4xf32> to vector<9x9x4xf32>
    %28 = vector.extract_strided_slice %25 {offsets = [0, 0, 1, 0], sizes = [9, 9, 1, 4], strides = [1, 1, 1, 1]} : vector<9x9x2x4xf32> to vector<9x9x1x4xf32>
    %29 = vector.shape_cast %28 : vector<9x9x1x4xf32> to vector<9x9x4xf32>
    %30 = vector.extract_strided_slice %22 {offsets = [0, 1, 0, 0], sizes = [9, 1, 18, 4], strides = [1, 1, 1, 1]} : vector<9x2x18x4xf32> to vector<9x1x18x4xf32>
    %31 = vector.shape_cast %30 : vector<9x1x18x4xf32> to vector<9x18x4xf32>
    %32 = vector.shape_cast %31 : vector<9x18x4xf32> to vector<9x9x2x4xf32>
    %33 = vector.extract_strided_slice %32 {offsets = [0, 0, 0, 0], sizes = [9, 9, 1, 4], strides = [1, 1, 1, 1]} : vector<9x9x2x4xf32> to vector<9x9x1x4xf32>
    %34 = vector.shape_cast %33 : vector<9x9x1x4xf32> to vector<9x9x4xf32>
    %35 = vector.extract_strided_slice %32 {offsets = [0, 0, 1, 0], sizes = [9, 9, 1, 4], strides = [1, 1, 1, 1]} : vector<9x9x2x4xf32> to vector<9x9x1x4xf32>
    %36 = vector.shape_cast %35 : vector<9x9x1x4xf32> to vector<9x9x4xf32>
    %cst_14 = arith.constant 0.000000e+00 : f32
    %37 = vector.broadcast %cst_14 : f32 to vector<64x4xf32>
    %38 = vector.extract_strided_slice %27 {offsets = [0, 0, 0], sizes = [8, 8, 4], strides = [1, 1, 1]} : vector<9x9x4xf32> to vector<8x8x4xf32>
    %39 = vector.shape_cast %38 : vector<8x8x4xf32> to vector<64x4xf32>
    %c0_15 = arith.constant 0 : index
    %c0_16 = arith.constant 0 : index
    %c0_17 = arith.constant 0 : index
    %40 = vector.load %arg3[%c0_15, %c0_16, %c0_17] : memref<9x4x4xf32, #tpu.memory_space<vmem>>, vector<1x4x4xf32>
    %41 = vector.shape_cast %40 : vector<1x4x4xf32> to vector<4x4xf32>
    %cst_18 = arith.constant dense<0.000000e+00> : vector<64x4xf32>
    %42 = tpu.matmul %39, %41, %cst_18 {dimension_numbers = #tpu.dot_dimension_numbers<[1], [0], [0], [1], [0, 0, 1, 1], [], []>} : vector<64x4xf32>, vector<4x4xf32>, vector<64x4xf32> -> vector<64x4xf32>
    %43 = arith.addf %37, %42 : vector<64x4xf32>
    %44 = vector.extract_strided_slice %29 {offsets = [0, 0, 0], sizes = [8, 8, 4], strides = [1, 1, 1]} : vector<9x9x4xf32> to vector<8x8x4xf32>
    %45 = vector.shape_cast %44 : vector<8x8x4xf32> to vector<64x4xf32>
    %c1 = arith.constant 1 : index
    %c0_19 = arith.constant 0 : index
    %c0_20 = arith.constant 0 : index
    %46 = vector.load %arg3[%c1, %c0_19, %c0_20] : memref<9x4x4xf32, #tpu.memory_space<vmem>>, vector<1x4x4xf32>
    %47 = vector.shape_cast %46 : vector<1x4x4xf32> to vector<4x4xf32>
    %cst_21 = arith.constant dense<0.000000e+00> : vector<64x4xf32>
    %48 = tpu.matmul %45, %47, %cst_21 {dimension_numbers = #tpu.dot_dimension_numbers<[1], [0], [0], [1], [0, 0, 1, 1], [], []>} : vector<64x4xf32>, vector<4x4xf32>, vector<64x4xf32> -> vector<64x4xf32>
    %49 = arith.addf %43, %48 : vector<64x4xf32>
    %50 = vector.extract_strided_slice %27 {offsets = [0, 1, 0], sizes = [8, 8, 4], strides = [1, 1, 1]} : vector<9x9x4xf32> to vector<8x8x4xf32>
    %51 = vector.shape_cast %50 : vector<8x8x4xf32> to vector<64x4xf32>
    %c2 = arith.constant 2 : index
    %c0_22 = arith.constant 0 : index
    %c0_23 = arith.constant 0 : index
    %52 = vector.load %arg3[%c2, %c0_22, %c0_23] : memref<9x4x4xf32, #tpu.memory_space<vmem>>, vector<1x4x4xf32>
    %53 = vector.shape_cast %52 : vector<1x4x4xf32> to vector<4x4xf32>
    %cst_24 = arith.constant dense<0.000000e+00> : vector<64x4xf32>
    %54 = tpu.matmul %51, %53, %cst_24 {dimension_numbers = #tpu.dot_dimension_numbers<[1], [0], [0], [1], [0, 0, 1, 1], [], []>} : vector<64x4xf32>, vector<4x4xf32>, vector<64x4xf32> -> vector<64x4xf32>
    %55 = arith.addf %49, %54 : vector<64x4xf32>
    %56 = vector.extract_strided_slice %34 {offsets = [0, 0, 0], sizes = [8, 8, 4], strides = [1, 1, 1]} : vector<9x9x4xf32> to vector<8x8x4xf32>
    %57 = vector.shape_cast %56 : vector<8x8x4xf32> to vector<64x4xf32>
    %c3 = arith.constant 3 : index
    %c0_25 = arith.constant 0 : index
    %c0_26 = arith.constant 0 : index
    %58 = vector.load %arg3[%c3, %c0_25, %c0_26] : memref<9x4x4xf32, #tpu.memory_space<vmem>>, vector<1x4x4xf32>
    %59 = vector.shape_cast %58 : vector<1x4x4xf32> to vector<4x4xf32>
    %cst_27 = arith.constant dense<0.000000e+00> : vector<64x4xf32>
    %60 = tpu.matmul %57, %59, %cst_27 {dimension_numbers = #tpu.dot_dimension_numbers<[1], [0], [0], [1], [0, 0, 1, 1], [], []>} : vector<64x4xf32>, vector<4x4xf32>, vector<64x4xf32> -> vector<64x4xf32>
    %61 = arith.addf %55, %60 : vector<64x4xf32>
    %62 = vector.extract_strided_slice %36 {offsets = [0, 0, 0], sizes = [8, 8, 4], strides = [1, 1, 1]} : vector<9x9x4xf32> to vector<8x8x4xf32>
    %63 = vector.shape_cast %62 : vector<8x8x4xf32> to vector<64x4xf32>
    %c4 = arith.constant 4 : index
    %c0_28 = arith.constant 0 : index
    %c0_29 = arith.constant 0 : index
    %64 = vector.load %arg3[%c4, %c0_28, %c0_29] : memref<9x4x4xf32, #tpu.memory_space<vmem>>, vector<1x4x4xf32>
    %65 = vector.shape_cast %64 : vector<1x4x4xf32> to vector<4x4xf32>
    %cst_30 = arith.constant dense<0.000000e+00> : vector<64x4xf32>
    %66 = tpu.matmul %63, %65, %cst_30 {dimension_numbers = #tpu.dot_dimension_numbers<[1], [0], [0], [1], [0, 0, 1, 1], [], []>} : vector<64x4xf32>, vector<4x4xf32>, vector<64x4xf32> -> vector<64x4xf32>
    %67 = arith.addf %61, %66 : vector<64x4xf32>
    %68 = vector.extract_strided_slice %34 {offsets = [0, 1, 0], sizes = [8, 8, 4], strides = [1, 1, 1]} : vector<9x9x4xf32> to vector<8x8x4xf32>
    %69 = vector.shape_cast %68 : vector<8x8x4xf32> to vector<64x4xf32>
    %c5 = arith.constant 5 : index
    %c0_31 = arith.constant 0 : index
    %c0_32 = arith.constant 0 : index
    %70 = vector.load %arg3[%c5, %c0_31, %c0_32] : memref<9x4x4xf32, #tpu.memory_space<vmem>>, vector<1x4x4xf32>
    %71 = vector.shape_cast %70 : vector<1x4x4xf32> to vector<4x4xf32>
    %cst_33 = arith.constant dense<0.000000e+00> : vector<64x4xf32>
    %72 = tpu.matmul %69, %71, %cst_33 {dimension_numbers = #tpu.dot_dimension_numbers<[1], [0], [0], [1], [0, 0, 1, 1], [], []>} : vector<64x4xf32>, vector<4x4xf32>, vector<64x4xf32> -> vector<64x4xf32>
    %73 = arith.addf %67, %72 : vector<64x4xf32>
    %74 = vector.extract_strided_slice %27 {offsets = [1, 0, 0], sizes = [8, 8, 4], strides = [1, 1, 1]} : vector<9x9x4xf32> to vector<8x8x4xf32>
    %75 = vector.shape_cast %74 : vector<8x8x4xf32> to vector<64x4xf32>
    %c6 = arith.constant 6 : index
    %c0_34 = arith.constant 0 : index
    %c0_35 = arith.constant 0 : index
    %76 = vector.load %arg3[%c6, %c0_34, %c0_35] : memref<9x4x4xf32, #tpu.memory_space<vmem>>, vector<1x4x4xf32>
    %77 = vector.shape_cast %76 : vector<1x4x4xf32> to vector<4x4xf32>
    %cst_36 = arith.constant dense<0.000000e+00> : vector<64x4xf32>
    %78 = tpu.matmul %75, %77, %cst_36 {dimension_numbers = #tpu.dot_dimension_numbers<[1], [0], [0], [1], [0, 0, 1, 1], [], []>} : vector<64x4xf32>, vector<4x4xf32>, vector<64x4xf32> -> vector<64x4xf32>
    %79 = arith.addf %73, %78 : vector<64x4xf32>
    %80 = vector.extract_strided_slice %29 {offsets = [1, 0, 0], sizes = [8, 8, 4], strides = [1, 1, 1]} : vector<9x9x4xf32> to vector<8x8x4xf32>
    %81 = vector.shape_cast %80 : vector<8x8x4xf32> to vector<64x4xf32>
    %c7 = arith.constant 7 : index
    %c0_37 = arith.constant 0 : index
    %c0_38 = arith.constant 0 : index
    %82 = vector.load %arg3[%c7, %c0_37, %c0_38] : memref<9x4x4xf32, #tpu.memory_space<vmem>>, vector<1x4x4xf32>
    %83 = vector.shape_cast %82 : vector<1x4x4xf32> to vector<4x4xf32>
    %cst_39 = arith.constant dense<0.000000e+00> : vector<64x4xf32>
    %84 = tpu.matmul %81, %83, %cst_39 {dimension_numbers = #tpu.dot_dimension_numbers<[1], [0], [0], [1], [0, 0, 1, 1], [], []>} : vector<64x4xf32>, vector<4x4xf32>, vector<64x4xf32> -> vector<64x4xf32>
    %85 = arith.addf %79, %84 : vector<64x4xf32>
    %86 = vector.extract_strided_slice %27 {offsets = [1, 1, 0], sizes = [8, 8, 4], strides = [1, 1, 1]} : vector<9x9x4xf32> to vector<8x8x4xf32>
    %87 = vector.shape_cast %86 : vector<8x8x4xf32> to vector<64x4xf32>
    %c8 = arith.constant 8 : index
    %c0_40 = arith.constant 0 : index
    %c0_41 = arith.constant 0 : index
    %88 = vector.load %arg3[%c8, %c0_40, %c0_41] : memref<9x4x4xf32, #tpu.memory_space<vmem>>, vector<1x4x4xf32>
    %89 = vector.shape_cast %88 : vector<1x4x4xf32> to vector<4x4xf32>
    %cst_42 = arith.constant dense<0.000000e+00> : vector<64x4xf32>
    %90 = tpu.matmul %87, %89, %cst_42 {dimension_numbers = #tpu.dot_dimension_numbers<[1], [0], [0], [1], [0, 0, 1, 1], [], []>} : vector<64x4xf32>, vector<4x4xf32>, vector<64x4xf32> -> vector<64x4xf32>
    %91 = arith.addf %85, %90 : vector<64x4xf32>
    %c0_43 = arith.constant 0 : index
    %c0_44 = arith.constant 0 : index
    %92 = vector.load %arg9[%c0_43, %c0_44] : memref<1x4xf32, #tpu.memory_space<vmem>>, vector<1x4xf32>
    %93 = vector.broadcast %92 : vector<1x4xf32> to vector<64x4xf32>
    %94 = arith.addf %91, %93 : vector<64x4xf32>
    %cst_45 = arith.constant 0.000000e+00 : f32
    %95 = vector.broadcast %cst_45 : f32 to vector<64x4xf32>
    %96 = arith.maximumf %94, %95 : vector<64x4xf32>
    %c0_46 = arith.constant 0 : index
    %c0_47 = arith.constant 0 : index
    %97 = vector.load %arg4[%c0_46, %c0_47] : memref<4x16xf32, #tpu.memory_space<vmem>>, vector<4x16xf32>
    %cst_48 = arith.constant dense<0.000000e+00> : vector<64x16xf32>
    %98 = tpu.matmul %96, %97, %cst_48 {dimension_numbers = #tpu.dot_dimension_numbers<[1], [0], [0], [1], [0, 0, 1, 1], [], []>} : vector<64x4xf32>, vector<4x16xf32>, vector<64x16xf32> -> vector<64x16xf32>
    %99 = vector.shape_cast %9 : vector<256x4xf32> to vector<16x16x4xf32>
    %100 = vector.shape_cast %99 : vector<16x16x4xf32> to vector<8x2x16x4xf32>
    %101 = vector.extract_strided_slice %100 {offsets = [0, 0, 0, 0], sizes = [8, 1, 16, 4], strides = [1, 1, 1, 1]} : vector<8x2x16x4xf32> to vector<8x1x16x4xf32>
    %102 = vector.shape_cast %101 : vector<8x1x16x4xf32> to vector<8x16x4xf32>
    %103 = vector.shape_cast %102 : vector<8x16x4xf32> to vector<8x8x2x4xf32>
    %104 = vector.extract_strided_slice %103 {offsets = [0, 0, 0, 0], sizes = [8, 8, 1, 4], strides = [1, 1, 1, 1]} : vector<8x8x2x4xf32> to vector<8x8x1x4xf32>
    %105 = vector.shape_cast %104 : vector<8x8x1x4xf32> to vector<8x8x4xf32>
    %106 = vector.shape_cast %105 : vector<8x8x4xf32> to vector<64x4xf32>
    %c0_49 = arith.constant 0 : index
    %c0_50 = arith.constant 0 : index
    %107 = vector.load %arg5[%c0_49, %c0_50] : memref<4x16xf32, #tpu.memory_space<vmem>>, vector<4x16xf32>
    %cst_51 = arith.constant dense<0.000000e+00> : vector<64x16xf32>
    %108 = tpu.matmul %106, %107, %cst_51 {dimension_numbers = #tpu.dot_dimension_numbers<[1], [0], [0], [1], [0, 0, 1, 1], [], []>} : vector<64x4xf32>, vector<4x16xf32>, vector<64x16xf32> -> vector<64x16xf32>
    %109 = arith.addf %98, %108 : vector<64x16xf32>
    %c0_52 = arith.constant 0 : index
    %c0_53 = arith.constant 0 : index
    %c0_54 = arith.constant 0 : index
    %110 = vector.load %arg10[%c0_52, %c0_53, %c0_54] : memref<1x64x16xf32, #tpu.memory_space<vmem>>, vector<1x64x16xf32>
    %111 = vector.shape_cast %110 : vector<1x64x16xf32> to vector<64x16xf32>
    %112 = vector.shape_cast %109 : vector<64x16xf32> to vector<1x64x16xf32>
    tpu.vector_store %arg10[%c0_52, %c0_53, %c0_54], %112 {strides = array<i32>} : memref<1x64x16xf32, #tpu.memory_space<vmem>>, vector<1x64x16xf32>,
    return
  }
  func.func @transform_0(%arg0: i32) -> (i32, i32, i32) {
    %c0_i32 = arith.constant 0 : i32
    %c0_i32_0 = arith.constant 0 : i32
    %c0_i32_1 = arith.constant 0 : i32
    return %arg0, %c0_i32, %c0_i32_0 : i32, i32, i32
  }
  func.func @transform_1(%arg0: i32) -> (i32, i32) {
    %c0_i32 = arith.constant 0 : i32
    %c0_i32_0 = arith.constant 0 : i32
    %c0_i32_1 = arith.constant 0 : i32
    return %c0_i32, %c0_i32_0 : i32, i32
  }
  func.func @transform_2(%arg0: i32) -> (i32, i32, i32) {
    %c0_i32 = arith.constant 0 : i32
    %c0_i32_0 = arith.constant 0 : i32
    %c0_i32_1 = arith.constant 0 : i32
    %c0_i32_2 = arith.constant 0 : i32
    return %c0_i32, %c0_i32_0, %c0_i32_1 : i32, i32, i32
  }
  func.func @transform_3(%arg0: i32) -> (i32, i32) {
    %c0_i32 = arith.constant 0 : i32
    %c0_i32_0 = arith.constant 0 : i32
    %c0_i32_1 = arith.constant 0 : i32
    return %c0_i32, %c0_i32_0 : i32, i32
  }
  func.func @transform_4(%arg0: i32) -> (i32, i32) {
    %c0_i32 = arith.constant 0 : i32
    %c0_i32_0 = arith.constant 0 : i32
    %c0_i32_1 = arith.constant 0 : i32
    return %c0_i32, %c0_i32_0 : i32, i32
  }
  func.func @transform_5(%arg0: i32) -> (i32, i32) {
    %c0_i32 = arith.constant 0 : i32
    %c0_i32_0 = arith.constant 0 : i32
    %c0_i32_1 = arith.constant 0 : i32
    return %c0_i32, %c0_i32_0 : i32, i32
  }
  func.func @transform_6(%arg0: i32) -> (i32, i32) {
    %c0_i32 = arith.constant 0 : i32
    %c0_i32_0 = arith.constant 0 : i32
    %c0_i32_1 = arith.constant 0 : i32
    return %c0_i32, %c0_i32_0 : i32, i32
  }
  func.func @transform_7(%arg0: i32) -> (i32, i32) {
    %c0_i32 = arith.constant 0 : i32
    %c0_i32_0 = arith.constant 0 : i32
    %c0_i32_1 = arith.constant 0 : i32
    return %c0_i32, %c0_i32_0 : i32, i32
  }
  func.func @transform_8(%arg0: i32) -> (i32, i32) {
    %c0_i32 = arith.constant 0 : i32
    %c0_i32_0 = arith.constant 0 : i32
    %c0_i32_1 = arith.constant 0 : i32
    return %c0_i32, %c0_i32_0 : i32, i32
  }
  func.func @transform_9(%arg0: i32) -> (i32, i32, i32) {
    %c0_i32 = arith.constant 0 : i32
    %c0_i32_0 = arith.constant 0 : i32
    %c0_i32_1 = arith.constant 0 : i32
    return %arg0, %c0_i32, %c0_i32_0 : i32, i32, i32
  }
}

</mosaic_0001>

<bundles_post_ra>
// kernel: preact_bottleneck_nchw.1
= control target key start
LH: loop header
LB: loop body
LE: loop exit
PB: predicated region body
PF: predicated region fallthrough
CT: control target
= control target key end

     0   :  { %14 = vsyncpa [#allocation3], 0  ;;  %s8966_s0 = inlined_call_operand.vmem [shape: f32[2,256,4], index: 0, kind: input, shape index: {}]   ;;  %s8967_s1 = inlined_call_operand.vmem [shape: f32[4,4], index: 1, kind: input, shape index: {}]   ;;  %s8968_s2 = inlined_call_operand.vmem [shape: f32[9,4,4], index: 2, kind: input, shape index: {}]   ;;  %s8969_s3 = inlined_call_operand.vmem [shape: f32[4,16], index: 3, kind: input, shape index: {}]   ;;  %s8970_s4 = inlined_call_operand.vmem [shape: f32[4,16], index: 4, kind: input, shape index: {}]   ;;  %s8971_s5 = inlined_call_operand.vmem [shape: f32[1,4], index: 5, kind: input, shape index: {}]   ;;  %s8972_s6 = inlined_call_operand.vmem [shape: f32[1,4], index: 6, kind: input, shape index: {}]   ;;  %s8973_s7 = inlined_call_operand.vmem [shape: f32[1,4], index: 7, kind: input, shape index: {}]   ;;  %s8974_s8 = inlined_call_operand.vmem [shape: f32[1,4], index: 8, kind: input, shape index: {}]   ;;  %s8975_s9 = inlined_call_operand.hbm [shape: f32[2,64,16], index: 9, kind: output, shape index: {}]  }
   0x1   :  { %16 = vsyncpa [#allocation3 + $0x1], 0  ;;  %s6070_s30 = smov 0   ;;  %s6072_s10 = smov 0  }
   0x2   :  { %s6074_s11 = smov 0   ;;  %s6076_s12 = smov 0  }
   0x3 LB: > { %s6091_s13 = sadd.s32 4294967295, %s6013_s12   ;;  %s5338_s14 = sadd.s32 4294967294, %s6013_s12   ;;  %s6013_s12 = sphi %s6076_s12, %s9515_s12   ;;  %s6009_s11 = sphi %s6074_s11, %s9514_s11   ;;  %s6005_s10 = sphi %s6072_s10, %s9513_s10   ;;  %s6001_s30 = sphi %s6070_s30, %s9512_s30  }
   0x4   : > { %s6095_s15 = sadd.s32 1, %s6013_s12   ;;  %s223_s16 = sadd.s32 1, %s6009_s11 }
   0x5   : > { %s220_s17 = ssub.s32 %s6013_s12, %s6095_s15  ;;  %p233_p0 = scmp.ne.s32.totalorder %s6009_s11, %s6005_s10 }
   0x6   : > { %p221_p1 = scmp.eq.s32.totalorder %s220_s17, 0  ;;  %p234_p2 = scmp.eq.s32.totalorder %s6091_s13, 1 }
   0x7   : > { %p239_p3 = scmp.ne.s32.totalorder %s6005_s10, %s6001_s30  ;;  %p240_p4 = scmp.eq.s32.totalorder %s5338_s14, 1 }
   0x8   : > { %s6106_s18 = scalar_select %p221_p1, %s6009_s11, %s223_s16  }
   0x9   : > { %p6108_p5 = por %p234_p2, %p233_p0  ;;  %p6112_p6 = por %p240_p4, %p239_p3 }
   0xa   : > { %p5341_p7 = scmp.ge.s32.totalorder %s6013_s12, 1  ;;  %p290_p8 = scmp.lt.s32.totalorder %s6013_s12, 3 }
   0xc   : > { %p291_p9 = pnand %p5341_p7, %p290_p8 }
   0xe   : > { %294 = sbr.rel (%p291_p9) target bundleno = 996 (0x3e4), region = 56 }
  0x15   : > { %v473_v0 = vld [vmem:[%s8967_s1] sm:$0xf]  ;;  %vm578_vm0 = vcmask 1043456   ;;  %p326_p10 = scmp.lt.s32.totalorder %s6091_s13, 1  ;;  %vm481_vm1 = vcmask 31744   ;;  %vm872_vm2 = vcmask 1040384  }
  0x16   : > { %5628 = vmatprep.subr.msk.mxu0 %vm578_vm0, %v473_v0  ;;  %v6128_v1 = vld [vmem:[%s8971_s5] ss:$0 sm:$0xff]  ;;  %vm1980_vm3 = vcmask 1041409   ;;  %vm1982_vm4 = vcmask 1042434   ;;  %vm1984_vm5 = vcmask 1043459   ;;  %vm1986_vm6 = vcmask 1044484  }
  0x17   : > { %5629 = vmatpush3.msk.msra.mxu0 %vm578_vm0, %v473_v0  ;;  %s327_s23 = scalar_select %p326_p10, %s6091_s13, 1  ;;  %v6138_v2 = vld [vmem:[%s8972_s6] ss:$0 sm:$0xff]  ;;  %vm1988_vm7 = vcmask 1045509   ;;  %vm1990_vm8 = vcmask 1046534   ;;  %vm1992_vm9 = vcmask 1047559  }
  0x18   : > { %s323_s26 = sand.u32 1, %s6005_s10   ;;  %vm5253_vm10 = vcmask 130048  }
  0x19   : > { %s5494_s24 = sshll.u32 %s327_s23, 8  ;;  %s5342_s27 = sshll.u32 %s323_s26, 6 }
  0x1a   : > { %s6133_s29 = scalar_lea.vmem %s8966_s0, %s5494_s24  ;;  %s325_s28 = scalar_lea.vmem [#allocation2], %s5342_s27 }
  0x1b   : > { %v331_v3 = vld [vmem:[%s6133_s29] sm:$0xff]  ;;  %v332_v4 = vld [vmem:[%s6133_s29 + $0x8] sm:$0xff]  ;;  %v333_v5 = vld [vmem:[%s6133_s29 + $0x10] sm:$0xff]  ;;  %s5276_s14 = sshll.u32 %s325_s28, 4  ;;  %s6017_s23 = smov [#allocation2]   ;;  %s8921_s14 = int_to_ptr.vmem [resolvable:$true] %s5276_s14 }
  0x1c   : > { %v370_v6 = vmul.f32 %v6128_v1, %v331_v3  ;;  %v371_v7 = vmul.f32 %v6128_v1, %v332_v4  ;;  %v372_v8 = vmul.f32 %v6128_v1, %v333_v5  ;;  %v334_v9 = vld [vmem:[%s6133_s29 + $0x18] sm:$0xff]  ;;  %v335_v10 = vld [vmem:[%s6133_s29 + $0x20] sm:$0xff]  ;;  %v336_v11 = vld [vmem:[%s6133_s29 + $0x28] sm:$0xff]  ;;  %s5951_s22 = scalar_lea.vmem %s8921_s14, 1024  ;;  %s5955_s24 = sshll.u32 %s6017_s23, 4  ;;  %s5956_s24 = int_to_ptr.vmem [resolvable:$false] %s5955_s24 }
  0x1d   : > { %v373_v12 = vmul.f32 %v6128_v1, %v334_v9  ;;  %v374_v13 = vmul.f32 %v6128_v1, %v335_v10  ;;  %v337_v14 = vld [vmem:[%s6133_s29 + $0x30] sm:$0xff]  ;;  %v375_v19 = vmul.f32 %v6128_v1, %v336_v11  ;;  %v338_v25 = vld [vmem:[%s6133_s29 + $0x38] sm:$0xff]  ;;  %v339_v33 = vld [vmem:[%s6133_s29 + $0x40] sm:$0xff]  ;;  %p5952_p11 = scmp.ne.s32.totalorder %s8921_s14, %s5951_s22  ;;  %s5957_s25 = scalar_lea.vmem %s5956_s24, 2048 }
  0x1e   : > { %v409_v15 = vadd.f32 %v6138_v2, %v370_v6  ;;  %v410_v16 = vadd.f32 %v6138_v2, %v371_v7  ;;  %v411_v17 = vadd.f32 %v6138_v2, %v372_v8  ;;  %v376_v20 = vmul.f32 %v6128_v1, %v337_v14  ;;  %v340_v34 = vld [vmem:[%s6133_s29 + $0x48] sm:$0xff]  ;;  %v341_v35 = vld [vmem:[%s6133_s29 + $0x50] sm:$0xff]  ;;  %v342_v37 = vld [vmem:[%s6133_s29 + $0x58] sm:$0xff]  ;;  %p5958_p0 = scmp.lt.s32.totalorder %s8921_s14, %s5956_s24  ;;  %p5959_p1 = scmp.lt.s32.totalorder %s5957_s25, %s5951_s22 }
  0x1f   : > { %v412_v18 = vadd.f32 %v6138_v2, %v373_v12  ;;  %v413_v24 = vadd.f32 %v6138_v2, %v374_v13  ;;  %v414_v27 = vadd.f32 %v6138_v2, %v375_v19  ;;  %v377_v28 = vmul.f32 %v6128_v1, %v338_v25  ;;  %v343_v38 = vld [vmem:[%s6133_s29 + $0x60] sm:$0xff]  ;;  %v344_v48 = vld [vmem:[%s6133_s29 + $0x68] sm:$0xff]  ;;  %v345_v49 = vld [vmem:[%s6133_s29 + $0x70] sm:$0xff]  ;;  %p5953_p12 = pnand %p5952_p11, %p6108_p5 }
  0x20   : > { %v6158_v21 = vmax.f32 %v409_v15, 0.0  ;;  %v6160_v22 = vmax.f32 %v410_v16, 0.0  ;;  %v443_v23 = vmax.f32 %v411_v17, 0.0  ;;  %v415_v30 = vadd.f32 %v6138_v2, %v376_v20  ;;  %v346_v57 = vld [vmem:[%s6133_s29 + $0x78] sm:$0xff]  ;;  %v347_v61 = vld [vmem:[%s6133_s29 + $0x80] sm:$0xff]  ;;  %v348_v0 = vld [vmem:[%s6133_s29 + $0x88] sm:$0xff]  ;;  %p5960_p2 = por %p5959_p1, %p5958_p0 }
  0x21   : > { %v444_v26 = vmax.f32 %v412_v18, 0.0  ;;  %v6171_v29 = vmax.f32 %v413_v24, 0.0  ;;  %v6175_v31 = vmax.f32 %v414_v27, 0.0  ;;  %v416_v32 = vadd.f32 %v6138_v2, %v377_v28  ;;  %v349_v3 = vld [vmem:[%s6133_s29 + $0x90] sm:$0xff]  ;;  %v350_v11 = vld [vmem:[%s6133_s29 + $0x98] sm:$0xff]  ;;  %v351_v12 = vld [vmem:[%s6133_s29 + $0xa0] sm:$0xff]  ;;  %p5954_p13 = pneg %p5953_p12 }
  0x22   : > { %9119 = vst [vmem:[#allocation5_spill] sm:$0xff] %v6158_v21  ;;  %9120 = vst [vmem:[#allocation6_spill] sm:$0xff] %v6160_v22  ;;  %5630 = vmatprep.mubr.msk.f32.mxu0 %vm481_vm1, %v6158_v21  ;;  %v447_v36 = vmax.f32 %v415_v30, 0.0  ;;  %v378_v39 = vmul.f32 %v6128_v1, %v339_v33  ;;  %v379_v40 = vmul.f32 %v6128_v1, %v340_v34  ;;  %v352_v19 = vld [vmem:[%s6133_s29 + $0xa8] sm:$0xff]  ;;  %v353_v20 = vld [vmem:[%s6133_s29 + $0xb0] sm:$0xff] }
  0x23   : > { %5631 = vmatmul.mubr.msk.f32.vlgmr.msra.gmra.mrb[0].mxu0 %vm481_vm1, %v6160_v22  ;;  %9121 = vst [vmem:[#allocation7_spill] sm:$0xff] %v6171_v29  ;;  %9122 = vst [vmem:[#allocation8_spill] sm:$0xff] %v6175_v31  ;;  %v380_v41 = vmul.f32 %v6128_v1, %v341_v35  ;;  %v448_v42 = vmax.f32 %v416_v32, 0.0  ;;  %v381_v43 = vmul.f32 %v6128_v1, %v342_v37  ;;  %v354_v30 = vld [vmem:[%s6133_s29 + $0xb8] sm:$0xff]  ;;  %v355_v32 = vld [vmem:[%s6133_s29 + $0xc0] sm:$0xff]  ;;  %p5961_p3 = pnand %p5960_p2, %p5954_p13 }
  0x24   : > { %5633 = vmatprep.mubr.msk.f32.mxu0 %vm481_vm1, %v443_v23  ;;  %v417_v44 = vadd.f32 %v6138_v2, %v378_v39  ;;  %v418_v45 = vadd.f32 %v6138_v2, %v379_v40  ;;  %v382_v47 = vmul.f32 %v6128_v1, %v343_v38  ;;  %v383_v53 = vmul.f32 %v6128_v1, %v344_v48  ;;  %v356_v39 = vld [vmem:[%s6133_s29 + $0xc8] sm:$0xff]  ;;  %v357_v40 = vld [vmem:[%s6133_s29 + $0xd0] sm:$0xff]  ;;  %v359_v48 = vld [vmem:[%s6133_s29 + $0xe0] sm:$0xff] }
  0x25   : > { %v419_v46 = vadd.f32 %v6138_v2, %v380_v41  ;;  %v420_v52 = vadd.f32 %v6138_v2, %v381_v43  ;;  %v384_v56 = vmul.f32 %v6128_v1, %v345_v49  ;;  %v385_v60 = vmul.f32 %v6128_v1, %v346_v57  ;;  %v360_v57 = vld [vmem:[%s6133_s29 + $0xe8] sm:$0xff] }
  0x26   : > { %v6198_v50 = vmax.f32 %v417_v44, 0.0  ;;  %v6201_v51 = vmax.f32 %v418_v45, 0.0  ;;  %v421_v55 = vadd.f32 %v6138_v2, %v382_v47  ;;  %v422_v59 = vadd.f32 %v6138_v2, %v383_v53  ;;  %v358_v47 = vld [vmem:[%s6133_s29 + $0xd8] sm:$0xff] }
  0x27   : > { %5634 = vmatmul.mubr.msk.f32.gmra.mrb[2].mxu0 %vm481_vm1, %v444_v26  ;;  %v451_v54 = vmax.f32 %v419_v46, 0.0  ;;  %v452_v58 = vmax.f32 %v420_v52, 0.0  ;;  %v423_v63 = vadd.f32 %v6138_v2, %v384_v56  ;;  %v386_v4 = vmul.f32 %v6128_v1, %v347_v61 }
  0x28   : > { %5636 = vmatprep.mubr.msk.f32.mxu0 %vm481_vm1, %v6171_v29  ;;  %9123 = vst [vmem:[#allocation9_spill] sm:$0xff] %v6198_v50  ;;  %9124 = vst [vmem:[#allocation10_spill] sm:$0xff] %v6201_v51  ;;  %v6216_v62 = vmax.f32 %v421_v55, 0.0  ;;  %v6223_v5 = vmax.f32 %v422_v59, 0.0  ;;  %v424_v6 = vadd.f32 %v6138_v2, %v385_v60  ;;  %v387_v7 = vmul.f32 %v6128_v1, %v348_v0 }
  0x29   : > { %v455_v8 = vmax.f32 %v423_v63, 0.0  ;;  %v425_v9 = vadd.f32 %v6138_v2, %v386_v4  ;;  %v388_v10 = vmul.f32 %v6128_v1, %v349_v3  ;;  %v389_v15 = vmul.f32 %v6128_v1, %v350_v11  ;;  %v362_v4 = vld [vmem:[%s6133_s29 + $0xf8] sm:$0xff] }
  0x2a   : > { %9125 = vst [vmem:[#allocation11_spill] sm:$0xff] %v6216_v62  ;;  %9126 = vst [vmem:[#allocation12_spill] sm:$0xff] %v6223_v5  ;;  %v456_v13 = vmax.f32 %v424_v6, 0.0  ;;  %v426_v14 = vadd.f32 %v6138_v2, %v387_v7  ;;  %v390_v18 = vmul.f32 %v6128_v1, %v351_v12  ;;  %v391_v25 = vmul.f32 %v6128_v1, %v352_v19 }
  0x2b   : > { %5637 = vmatmul.mubr.msk.f32.gmra.mrb[4].mxu0 %vm481_vm1, %v6175_v31  ;;  %v6238_v16 = vmax.f32 %v425_v9, 0.0  ;;  %v427_v17 = vadd.f32 %v6138_v2, %v388_v10  ;;  %v428_v24 = vadd.f32 %v6138_v2, %v389_v15  ;;  %v392_v28 = vmul.f32 %v6128_v1, %v353_v20 }
  0x2c   : > { %5639 = vmatprep.mubr.msk.f32.mxu0 %vm481_vm1, %v447_v36  ;;  %v6245_v23 = vmax.f32 %v426_v14, 0.0  ;;  %v429_v27 = vadd.f32 %v6138_v2, %v390_v18  ;;  %v430_v34 = vadd.f32 %v6138_v2, %v391_v25  ;;  %v393_v35 = vmul.f32 %v6128_v1, %v354_v30 }
  0x2d   : > { %9127 = vst [vmem:[#allocation13_spill] sm:$0xff] %v6238_v16  ;;  %v459_v26 = vmax.f32 %v427_v17, 0.0  ;;  %v460_v33 = vmax.f32 %v428_v24, 0.0  ;;  %v431_v37 = vadd.f32 %v6138_v2, %v392_v28  ;;  %v394_v38 = vmul.f32 %v6128_v1, %v355_v32 }
  0x2e   : > { %9128 = vst [vmem:[#allocation14_spill] sm:$0xff] %v6245_v23  ;;  %v6260_v36 = vmax.f32 %v429_v27, 0.0  ;;  %v6267_v41 = vmax.f32 %v430_v34, 0.0  ;;  %v395_v43 = vmul.f32 %v6128_v1, %v356_v39  ;;  %v396_v46 = vmul.f32 %v6128_v1, %v357_v40 }
  0x2f   : > { %5640 = vmatmul.mubr.msk.f32.gmra.mrb[6].mxu0 %vm481_vm1, %v448_v42  ;;  %v432_v42 = vadd.f32 %v6138_v2, %v393_v35  ;;  %v463_v44 = vmax.f32 %v431_v37, 0.0  ;;  %v433_v45 = vadd.f32 %v6138_v2, %v394_v38  ;;  %v397_v53 = vmul.f32 %v6128_v1, %v358_v47 }
  0x30   : > { %5642 = vmatprep.mubr.msk.f32.mxu0 %vm481_vm1, %v6198_v50  ;;  %9129 = vst [vmem:[#allocation15_spill] sm:$0xff] %v6260_v36  ;;  %9130 = vst [vmem:[#allocation16_spill] sm:$0xff] %v6267_v41  ;;  %v434_v52 = vadd.f32 %v6138_v2, %v395_v43  ;;  %v435_v55 = vadd.f32 %v6138_v2, %v396_v46  ;;  %v398_v56 = vmul.f32 %v6128_v1, %v359_v48  ;;  %v6015_v14 = vmov 1983009808  }
  0x31   : > { %v464_v49 = vmax.f32 %v432_v42, 0.0  ;;  %v436_v60 = vadd.f32 %v6138_v2, %v397_v53  ;;  %v399_v61 = vmul.f32 %v6128_v1, %v360_v57  ;;  %v1010_v15 = vunpack.c.l.s4 %v6015_v14 }
  0x32   : > { %v6289_v59 = vmax.f32 %v434_v52, 0.0  ;;  %v467_v63 = vmax.f32 %v435_v55, 0.0  ;;  %v437_v0 = vadd.f32 %v6138_v2, %v398_v56  ;;  %v1012_v17 = vlaneseq }
  0x33   : > { %5643 = vmatmul.mubr.msk.f32.gmra.mrb[8].mxu0 %vm481_vm1, %v6201_v51  ;;  %v468_v6 = vmax.f32 %v436_v60, 0.0  ;;  %v438_v7 = vadd.f32 %v6138_v2, %v399_v61  ;;  %v1011_v18 = vunpack.c.0.s8 %v1010_v15  ;;  %v6016_v20 = vmov 0.0   ;;  %v6387_v61 = vld [vmem:[%s8973_s7] ss:$0 sm:$0xff] }
  0x34   : > { %5645 = vmatprep.mubr.msk.f32.mxu0 %vm481_vm1, %v451_v54  ;;  %v6282_v54 = vmax.f32 %v433_v45, 0.0  ;;  %9132 = vst [vmem:[#allocation18_spill] sm:$0xff] %v6289_v59  ;;  %v6303_v9 = vmax.f32 %v437_v0, 0.0  ;;  %v1013_v19 = vshrl.u32 %v1012_v17, 7  ;;  %v6316_v24 = vrot.slane %v6016_v20, 7 }
  0x35   : > { %v6307_v11 = vmax.f32 %v438_v7, 0.0 }
  0x36   : > { %9131 = vst [vmem:[#allocation17_spill] sm:$0xff] %v6282_v54  ;;  %9133 = vst [vmem:[#allocation19_spill] sm:$0xff] %v6303_v9  ;;  %v956_v25 = vsel %vm872_vm2, 0.0, %v6316_v24  ;;  %v6325_v28 = vsub.s32 1, %v1013_v19  ;;  %v1025_v34 = vcombine.high %v6316_v24, %v6316_v24 }
  0x37   : > { %5646 = vmatmul.mubr.msk.f32.gmra.mrb[10].mxu0 %vm481_vm1, %v452_v58  ;;  %v361_v58 = vld [vmem:[%s6133_s29 + $0xf0] sm:$0xff]  ;;  %9134 = vst [vmem:[#allocation20_spill] sm:$0xff] %v6307_v11  ;;  %9135 = vst [vmem:[#allocation21_spill] sm:$0xff] %v6316_v24  ;;  %s5495_s29 = sshll.u32 %s6091_s13, 10  ;;  %s8925_s13 = scalar_lea.sflag [#allocation3], %s323_s26 }
  0x38   : > { %5648 = vmatprep.mubr.msk.f32.mxu0 %vm481_vm1, %v6216_v62  ;;  %v400_v3 = vmul.f32 %v6128_v1, %v361_v58  ;;  %s8919_s21 = scalar_lea.hbm %s8975_s9, %s5495_s29 }
  0x3a   : > { %v439_v10 = vadd.f32 %v6138_v2, %v400_v3 }
  0x3b   : > { %5649 = vmatmul.mubr.msk.f32.gmra.mrb[12].mxu0 %vm481_vm1, %v6223_v5 }
  0x3c   : > { %5651 = vmatprep.mubr.msk.f32.mxu0 %vm481_vm1, %v455_v8  ;;  %v401_v8 = vmul.f32 %v6128_v1, %v362_v4 }
  0x3e   : > { %v440_v12 = vadd.f32 %v6138_v2, %v401_v8  ;;  %v6318_v2 = vsub.s32 %v1011_v18, %v1013_v19 }
  0x3f   : > { %5652 = vmatmul.mubr.msk.f32.gmra.mrb[14].mxu0 %vm481_vm1, %v456_v13  ;;  %v471_v13 = vmax.f32 %v439_v10, 0.0 }
  0x40   : > { %5654 = vmatprep.mubr.msk.f32.mxu0 %vm481_vm1, %v6238_v16  ;;  %v472_v1 = vmax.f32 %v440_v12, 0.0  ;;  %v6323_v27 = vrot.slane %v956_v25, %v6318_v2  ;;  %v6342_v35 = vrot.slane %v6316_v24, %v6318_v2  ;;  %v6351_v40 = vrot.slane %v1025_v34, %v6318_v2 }
  0x42   : > { %v6332_v32 = vcombine.high %v6323_v27, %v6323_v27  ;;  %v1727_v37 = vrot.slane %v6323_v27, %v6325_v28  ;;  %v6355_v42 = vcombine.high %v6342_v35, %v6342_v35  ;;  %v1743_v45 = vrot.slane %v6342_v35, %v6325_v28 }
  0x43   : > { %5655 = vmatmul.mubr.msk.f32.gmra.mrb[16].mxu0 %vm481_vm1, %v6245_v23  ;;  %v6368_v47 = vcombine.high %v6351_v40, %v6351_v40  ;;  %v1751_v52 = vrot.slane %v6351_v40, %v6325_v28 }
  0x44   : > { %5657 = vmatprep.mubr.msk.f32.mxu0 %vm481_vm1, %v459_v26  ;;  %v1008_v26 = vcombine.high %v956_v25, %v956_v25  ;;  %v1731_v38 = vrot.slane %v6332_v32, %v6325_v28  ;;  %v1747_v48 = vrot.slane %v6355_v42, %v6325_v28 }
  0x45   : > { %v1755_v55 = vrot.slane %v6368_v47, %v6325_v28 }
  0x46   : > { %v6328_v30 = vrot.slane %v1008_v26, %v6318_v2  ;;  %v1981_v46 = vsel %vm1980_vm3, %v1731_v38, %v1727_v37 }
  0x47   : > { %5658 = vmatmul.mubr.msk.f32.gmra.mrb[18].mxu0 %vm481_vm1, %v460_v33 }
  0x48   : > { %5660 = vmatprep.mubr.msk.f32.mxu0 %vm481_vm1, %v6260_v36  ;;  %v6336_v33 = vcombine.high %v6328_v30, %v6328_v30  ;;  %v1735_v39 = vrot.slane %v6328_v30, %v6325_v28 }
  0x4a   : > { %v1739_v43 = vrot.slane %v6336_v33, %v6325_v28 }
  0x4b   : > { %5661 = vmatmul.mubr.msk.f32.gmra.mrb[20].mxu0 %vm481_vm1, %v6267_v41 }
  0x4c   : > { %5663 = vmatprep.mubr.msk.f32.mxu0 %vm481_vm1, %v463_v44  ;;  %v5381_v44 = vld [vmem:[%s8968_s2 + $0x4] sm:$0xf] }
  0x4d   : > { %5678 = vmatprep.subr.msk.mxu0 %vm578_vm0, %v5381_v44 }
  0x4e   : > { %5679 = vmatpush3.msk.msra.mxu0 %vm578_vm0, %v5381_v44 }
  0x4f   : > { %5664 = vmatmul.mubr.msk.f32.gmra.mrb[22].mxu0 %vm481_vm1, %v464_v49  ;;  %v1983_v49 = vsel %vm1982_vm4, %v1735_v39, %v1981_v46 }
  0x50   : > { %5666 = vmatprep.mubr.msk.f32.mxu0 %vm481_vm1, %v6282_v54  ;;  %v1985_v53 = vsel %vm1984_vm5, %v1739_v43, %v1983_v49 }
  0x51   : > { %v1987_v56 = vsel %vm1986_vm6, %v1743_v45, %v1985_v53 }
  0x52   : > { %v1989_v57 = vsel %vm1988_vm7, %v1747_v48, %v1987_v56  ;;  %v6418_v56 = vld [vmem:[%s8968_s2] sm:$0xf] }
  0x53   : > { %5667 = vmatmul.mubr.msk.f32.gmra.mrb[24].mxu0 %vm481_vm1, %v6289_v59  ;;  %v1991_v58 = vsel %vm1990_vm8, %v1751_v52, %v1989_v57  ;;  %5832 = vmatprep.subr.msk.mxu1 %vm578_vm0, %v6418_v56 }
  0x54   : > { %5669 = vmatprep.mubr.msk.f32.mxu0 %vm481_vm1, %v467_v63  ;;  %v1993_v60 = vsel %vm1992_vm9, %v1755_v55, %v1991_v58  ;;  %5833 = vmatpush3.msk.msra.mxu1 %vm578_vm0, %v6418_v56 }
  0x55   : > { %5692 = vmatprep.subr.msk.mxu0 %vm578_vm0, %v6418_v56 }
  0x57   : > { %5670 = vmatmul.mubr.msk.f32.gmra.mrb[26].mxu0 %vm481_vm1, %v468_v6 }
  0x58   : > { %5672 = vmatprep.mubr.msk.f32.mxu0 %vm481_vm1, %v6303_v9 }
  0x5b   : > { %5673 = vmatmul.mubr.msk.f32.gmra.mrb[28].mxu0 %vm481_vm1, %v6307_v11 }
  0x5c   : > { %5675 = vmatprep.mubr.msk.f32.mxu0 %vm481_vm1, %v471_v13 }
  0x5f   : > { %5676 = vmatmul.mubr.msk.f32.gmra.mrb[30].mxu0 %vm481_vm1, %v472_v1  ;;  %v6392_v1 = vsub.s32 0, %v1013_v19 }
  0x60   : > { %5680 = vmatprep.mubr.msk.f32.mxu0 %vm481_vm1, %v1993_v60 }
  0xf6   : > { %v5632_v63 = vpop.f32.mrb[0].mxu0 }
  0xf7   : > { %v654_v0 = vadd.f32 %v5632_v63, %v6387_v61  ;;  %v648_v3 = vpop.f32.mrb[1].mxu0 }
  0xf8   : > { %v649_v4 = vadd.f32 %v6387_v61, %v648_v3 }
  0xf9   : > { %v808_v6 = vmax.f32 %v654_v0, 0.0 }
  0xfa   : > { %v807_v7 = vmax.f32 %v649_v4, 0.0  ;;  %v5635_v8 = vpop.f32.mrb[2].mxu0 }
  0xfb   : > { %v876_v10 = vrot.slane %v808_v6, 7  ;;  %v664_v12 = vadd.f32 %v5635_v8, %v6387_v61  ;;  %v658_v13 = vpop.f32.mrb[3].mxu0 }
  0xfc   : > { %v875_v14 = vrot.slane %v807_v7, 7  ;;  %v659_v15 = vadd.f32 %v6387_v61, %v658_v13 }
  0xfd   : > { %v974_v17 = vsel %vm872_vm2, %v876_v10, 0.0  ;;  %v810_v18 = vmax.f32 %v664_v12, 0.0 }
  0xfe   : > { %v1433_v20 = vrot.slane %v974_v17, %v6318_v2  ;;  %v877_v25 = vsel %vm872_vm2, %v875_v14, %v876_v10  ;;  %v957_v26 = vsel %vm872_vm2, 0.0, %v875_v14  ;;  %v809_v34 = vmax.f32 %v659_v15, 0.0  ;;  %v5638_v37 = vpop.f32.mrb[4].mxu0 }
  0xff   : > { %v1393_v38 = vcombine.high %v957_v26, %v957_v26  ;;  %v1400_v39 = vrot.slane %v957_v26, %v6318_v2  ;;  %v1410_v43 = vcombine.high %v877_v25, %v877_v25  ;;  %v6401_v19 = vrot.slane %v877_v25, %v6318_v2  ;;  %v668_v44 = vpop.f32.mrb[5].mxu0 }
 0x100   : > { %v6404_v45 = vrot.slane %v1433_v20, %v6392_v1  ;;  %v879_v46 = vrot.slane %v810_v18, 7  ;;  %v878_v48 = vrot.slane %v809_v34, 7  ;;  %v6413_v55 = vadd.f32 %v5638_v37, %v6387_v61 }
 0x101   : > { %9136 = vst [vmem:[#allocation22_spill] sm:$0xff] %v6401_v19  ;;  %v6407_v49 = vrot.slane %v1393_v38, %v6318_v2  ;;  %v1408_v52 = vcombine.high %v1400_v39, %v1400_v39  ;;  %v6410_v53 = vrot.slane %v1410_v43, %v6318_v2  ;;  %v6422_v57 = vcombine.high %v6401_v19, %v6401_v19 }
 0x102   : > { %9137 = vst [vmem:[#allocation23_spill] sm:$0xff] %v6404_v45  ;;  %v2830_v58 = vrot.slane %v1400_v39, %v6392_v1  ;;  %v6427_v60 = vrot.slane %v6401_v19, %v6392_v1  ;;  %v3276_v63 = vrot.slane %v1400_v39, %v6325_v28  ;;  %v5641_v0 = vpop.f32.mrb[6].mxu0  ;;  %v975_v12 = vsel %vm872_vm2, %v879_v46, 0.0 }
 0x103   : > { %9138 = vst [vmem:[#allocation24_spill] sm:$0xff] %v6407_v49  ;;  %9139 = vst [vmem:[#allocation25_spill] sm:$0xff] %v6410_v53  ;;  %v6434_v3 = vcombine.high %v6407_v49, %v6407_v49  ;;  %v2834_v4 = vrot.slane %v1408_v52, %v6392_v1  ;;  %v6439_v6 = vrot.slane %v6407_v49, %v6392_v1  ;;  %v678_v8 = vpop.f32.mrb[7].mxu0  ;;  %v958_v14 = vsel %vm872_vm2, 0.0, %v878_v48 }
 0x104   : > { %9140 = vst [vmem:[#allocation26_spill] sm:$0xff] %v6422_v57  ;;  %9141 = vst [vmem:[#allocation27_spill] sm:$0xff] %v6427_v60  ;;  %v3280_v7 = vrot.slane %v1408_v52, %v6325_v28  ;;  %v880_v13 = vsel %vm872_vm2, %v878_v48, %v879_v46  ;;  %v1089_v26 = vrot.slane %v975_v12, %v6318_v2  ;;  %v812_v48 = vmax.f32 %v6413_v55, 0.0 }
 0x105   : > { %9142 = vst [vmem:[#allocation28_spill] sm:$0xff] %v6434_v3  ;;  %9143 = vst [vmem:[#allocation29_spill] sm:$0xff] %v6439_v6  ;;  %v6453_v15 = vrot.slane %v6434_v3, %v6392_v1  ;;  %v6456_v17 = vsel %vm1980_vm3, %v2834_v4, %v2830_v58  ;;  %v1049_v34 = vcombine.high %v958_v14, %v958_v14 }
 0x106   : > { %9145 = vst [vmem:[#allocation31_spill] sm:$0xff] %v6456_v17  ;;  %v6463_v25 = vsel %vm1980_vm3, %v3280_v7, %v3276_v63  ;;  %v1056_v37 = vrot.slane %v958_v14, %v6318_v2  ;;  %v5644_v38 = vpop.f32.mrb[8].mxu0  ;;  %v6469_v39 = vsel %vm1980_vm3, %v6439_v6, %v2834_v4  ;;  %v1066_v43 = vcombine.high %v880_v13, %v880_v13 }
 0x107   : > { %9144 = vst [vmem:[#allocation30_spill] sm:$0xff] %v6453_v15  ;;  %9146 = vst [vmem:[#allocation32_spill] sm:$0xff] %v6463_v25  ;;  %v6472_v46 = vrot.slane %v880_v13, %v6318_v2  ;;  %v688_v52 = vpop.f32.mrb[9].mxu0  ;;  %v6476_v58 = vrot.slane %v1089_v26, %v6392_v1  ;;  %v1063_v63 = vrot.slane %v1049_v34, %v6318_v2  ;;  %v882_v36 = vrot.slane %v812_v48, 7 }
 0x108   : > { %9147 = vst [vmem:[#allocation33_spill] sm:$0xff] %v6469_v39  ;;  %v1064_v7 = vcombine.high %v1056_v37, %v1056_v37  ;;  %v669_v12 = vadd.f32 %v6387_v61, %v668_v44  ;;  %v6481_v14 = vrot.slane %v1066_v43, %v6318_v2  ;;  %v1759_v13 = vrot.slane %v1056_v37, %v6325_v28 }
 0x109   : > { %9148 = vst [vmem:[#allocation34_spill] sm:$0xff] %v6476_v58  ;;  %v6485_v4 = vcombine.high %v6472_v46, %v6472_v46  ;;  %v6490_v10 = vcombine.high %v1063_v63, %v1063_v63  ;;  %v1767_v34 = vrot.slane %v1063_v63, %v6325_v28  ;;  %v2202_v11 = vrot.slane %v1056_v37, %v6392_v1  ;;  %v5400_v37 = vld [vmem:[%s8968_s2 + $0x8] sm:$0xf] }
 0x10a   : > { %v1763_v26 = vrot.slane %v1064_v7, %v6325_v28  ;;  %v2206_v44 = vrot.slane %v1064_v7, %v6392_v1  ;;  %v5647_v20 = vpop.f32.mrb[10].mxu0  ;;  %v6497_v43 = vcombine.high %v6481_v14, %v6481_v14  ;;  %v2210_v55 = vrot.slane %v1063_v63, %v6392_v1  ;;  %5706 = vmatprep.subr.msk.mxu1 %vm578_vm0, %v5400_v37 }
 0x10b   : > { %v6503_v59 = vpop.f32.mrb[11].mxu0  ;;  %v6512_v54 = vrot.slane %v6490_v10, %v6392_v1  ;;  %v6522_v18 = vrot.slane %v6472_v46, %v6392_v1  ;;  %v6526_v7 = vrot.slane %v6485_v4, %v6392_v1  ;;  %v684_v16 = vadd.f32 %v5641_v0, %v6387_v61 }
 0x10c   : > { %9149 = vst [vmem:[#allocation35_spill] sm:$0xff] %v6497_v43  ;;  %v1994_v41 = vsel %vm1980_vm3, %v1763_v26, %v1759_v13  ;;  %v2430_v13 = vsel %vm1980_vm3, %v2206_v44, %v2202_v11  ;;  %v2644_v9 = vsel %vm1980_vm3, %v2210_v55, %v2206_v44  ;;  %v679_v5 = vadd.f32 %v6387_v61, %v678_v8 }
 0x10d   : > { %9150 = vst [vmem:[#allocation36_spill] sm:$0xff] %v6512_v54  ;;  %v6518_v63 = vsel %vm1982_vm4, %v1767_v34, %v1994_v41  ;;  %9151 = vst [vmem:[#allocation37_spill] sm:$0xff] %v6522_v18  ;;  %v6531_v26 = vsel %vm1982_vm4, %v2210_v55, %v2430_v13  ;;  %v811_v41 = vmax.f32 %v669_v12, 0.0  ;;  %v2645_v23 = vsel %vm1982_vm4, %v6512_v54, %v2644_v9 }
 0x10e   : > { %9152 = vst [vmem:[#allocation38_spill] sm:$0xff] %v6526_v7  ;;  %9153 = vst [vmem:[#allocation39_spill] sm:$0xff] %v6531_v26  ;;  %v6534_v34 = vpop.f32.mrb[12].mxu0  ;;  %v694_v11 = vadd.f32 %v5644_v38, %v6387_v61  ;;  %v6545_v37 = vsel %vm1984_vm5, %v6522_v18, %v2645_v23  ;;  %v976_v48 = vsel %vm872_vm2, %v882_v36, 0.0  ;;  %v689_v55 = vadd.f32 %v6387_v61, %v688_v52 }
 0x10f   : > { %v6541_v51 = vpop.f32.mrb[13].mxu0  ;;  %9154 = vst [vmem:[#allocation40_spill] sm:$0xff] %v6545_v37  ;;  %v881_v12 = vrot.slane %v811_v41, 7  ;;  %v1474_v44 = vrot.slane %v976_v48, %v6318_v2  ;;  %v814_v9 = vmax.f32 %v684_v16, 0.0  ;;  %v813_v13 = vmax.f32 %v679_v5, 0.0 }
 0x110   : > { %v816_v0 = vmax.f32 %v694_v11, 0.0  ;;  %v6552_v8 = vrot.slane %v6481_v14, %v6392_v1  ;;  %v815_v23 = vmax.f32 %v689_v55, 0.0  ;;  %v6560_v48 = vadd.f32 %v5647_v20, %v6387_v61 }
 0x111   : > { %v883_v38 = vsel %vm872_vm2, %v881_v12, %v882_v36  ;;  %v959_v62 = vsel %vm872_vm2, 0.0, %v881_v12  ;;  %v6565_v16 = vrot.slane %v1474_v44, %v6392_v1  ;;  %v885_v36 = vrot.slane %v814_v9, 7 }
 0x112   : > { %9155 = vst [vmem:[#allocation41_spill] sm:$0xff] %v6552_v8  ;;  %v6556_v50 = vpop.f32.mrb[14].mxu0  ;;  %v1434_v31 = vcombine.high %v959_v62, %v959_v62  ;;  %v1441_v41 = vrot.slane %v959_v62, %v6318_v2  ;;  %v1451_v52 = vcombine.high %v883_v38, %v883_v38  ;;  %v6568_v11 = vrot.slane %v883_v38, %v6318_v2 }
 0x113   : > { %v6562_v5 = vpop.f32.mrb[15].mxu0  ;;  %9156 = vst [vmem:[#allocation42_spill] sm:$0xff] %v6565_v16  ;;  %v884_v12 = vrot.slane %v813_v13, 7  ;;  %v888_v62 = vrot.slane %v816_v0, 7  ;;  %v977_v49 = vsel %vm872_vm2, %v885_v36, 0.0  ;;  %v709_v58 = vadd.f32 %v6387_v61, %v6541_v51 }
 0x114   : > { %9157 = vst [vmem:[#allocation43_spill] sm:$0xff] %v6568_v11  ;;  %v1448_v55 = vrot.slane %v1434_v31, %v6318_v2  ;;  %v1449_v22 = vcombine.high %v1441_v41, %v1441_v41  ;;  %v6572_v29 = vrot.slane %v1451_v52, %v6318_v2  ;;  %v6576_v20 = vcombine.high %v6568_v11, %v6568_v11 }
 0x115   : > { %v2862_v21 = vrot.slane %v1441_v41, %v6392_v1  ;;  %v6581_v44 = vrot.slane %v6568_v11, %v6392_v1  ;;  %v3308_v9 = vrot.slane %v1441_v41, %v6325_v28 }
 0x116   : > { %9158 = vst [vmem:[#allocation44_spill] sm:$0xff] %v6572_v29  ;;  %9159 = vst [vmem:[#allocation45_spill] sm:$0xff] %v6576_v20  ;;  %v6584_v13 = vpop.f32.mrb[16].mxu0  ;;  %v6586_v31 = vcombine.high %v1448_v55, %v1448_v55  ;;  %v2866_v38 = vrot.slane %v1449_v22, %v6392_v1  ;;  %v2870_v0 = vrot.slane %v1448_v55, %v6392_v1 }
 0x117   : > { %9160 = vst [vmem:[#allocation46_spill] sm:$0xff] %v6581_v44  ;;  %v6592_v16 = vpop.f32.mrb[17].mxu0  ;;  %v6596_v45 = vcombine.high %v6572_v29, %v6572_v29  ;;  %v6600_v41 = vrot.slane %v6576_v20, %v6392_v1  ;;  %v6604_v39 = vrot.slane %v6572_v29, %v6392_v1  ;;  %v3312_v19 = vrot.slane %v1449_v22, %v6325_v28 }
 0x118   : > { %9161 = vst [vmem:[#allocation47_spill] sm:$0xff] %v6586_v31  ;;  %v6609_v3 = vrot.slane %v6586_v31, %v6392_v1  ;;  %v3090_v52 = vsel %vm1980_vm3, %v2866_v38, %v2862_v21  ;;  %v3316_v11 = vrot.slane %v1448_v55, %v6325_v28  ;;  %v1130_v22 = vrot.slane %v977_v49, %v6318_v2 }
 0x119   : > { %9162 = vst [vmem:[#allocation48_spill] sm:$0xff] %v6596_v45  ;;  %9163 = vst [vmem:[#allocation49_spill] sm:$0xff] %v6600_v41  ;;  %v6616_v25 = vsel %vm1982_vm4, %v2870_v0, %v3090_v52  ;;  %v3536_v21 = vsel %vm1980_vm3, %v3312_v19, %v3308_v9  ;;  %v886_v52 = vsel %vm872_vm2, %v884_v12, %v885_v36  ;;  %v978_v9 = vsel %vm872_vm2, %v888_v62, 0.0 }
 0x11a   : > { %9164 = vst [vmem:[#allocation50_spill] sm:$0xff] %v6604_v39  ;;  %9165 = vst [vmem:[#allocation51_spill] sm:$0xff] %v6609_v3  ;;  %v3758_v39 = vsel %vm1980_vm3, %v2870_v0, %v2866_v38  ;;  %v6623_v60 = vpop.f32.mrb[18].mxu0  ;;  %v960_v38 = vsel %vm872_vm2, 0.0, %v884_v12  ;;  %v1107_v0 = vcombine.high %v886_v52, %v886_v52  ;;  %v6644_v36 = vsel %vm1982_vm4, %v3316_v11, %v3536_v21 }
 0x11b   : > { %9166 = vst [vmem:[#allocation52_spill] sm:$0xff] %v6616_v25  ;;  %v3759_v55 = vsel %vm1982_vm4, %v6609_v3, %v3758_v39  ;;  %v6630_v31 = vpop.f32.mrb[19].mxu0  ;;  %v1090_v29 = vcombine.high %v960_v38, %v960_v38  ;;  %v1097_v19 = vrot.slane %v960_v38, %v6318_v2  ;;  %v6640_v39 = vrot.slane %v886_v52, %v6318_v2 }
 0x11c   : > { %v6634_v41 = vsel %vm1984_vm5, %v6581_v44, %v3759_v55  ;;  %9168 = vst [vmem:[#allocation54_spill] sm:$0xff] %v6644_v36  ;;  %v6647_v20 = vrot.slane %v1130_v22, %v6392_v1  ;;  %v1515_v55 = vrot.slane %v978_v9, %v6318_v2  ;;  %v887_v49 = vrot.slane %v815_v23, 7 }
 0x11d   : > { %9167 = vst [vmem:[#allocation53_spill] sm:$0xff] %v6634_v41  ;;  %v6653_v12 = vrot.slane %v1090_v29, %v6318_v2  ;;  %v1105_v38 = vcombine.high %v1097_v19, %v1097_v19  ;;  %v6656_v52 = vrot.slane %v1107_v0, %v6318_v2  ;;  %v6660_v44 = vcombine.high %v6640_v39, %v6640_v39 }
 0x11e   : > { %9169 = vst [vmem:[#allocation55_spill] sm:$0xff] %v6647_v20  ;;  %v6650_v41 = vpop.f32.mrb[20].mxu0  ;;  %v1791_v22 = vrot.slane %v1097_v19, %v6325_v28  ;;  %v2234_v21 = vrot.slane %v1097_v19, %v6392_v1  ;;  %v6670_v29 = vrot.slane %v6640_v39, %v6392_v1  ;;  %v6679_v3 = vrot.slane %v1515_v55, %v6392_v1 }
 0x11f   : > { %9170 = vst [vmem:[#allocation56_spill] sm:$0xff] %v6656_v52  ;;  %9171 = vst [vmem:[#allocation57_spill] sm:$0xff] %v6660_v44  ;;  %v6662_v11 = vpop.f32.mrb[21].mxu0  ;;  %v6674_v0 = vcombine.high %v6653_v12, %v6653_v12  ;;  %v1795_v9 = vrot.slane %v1105_v38, %v6325_v28  ;;  %v2238_v36 = vrot.slane %v1105_v38, %v6392_v1  ;;  %v961_v25 = vsel %vm872_vm2, 0.0, %v887_v49 }
 0x120   : > { %9172 = vst [vmem:[#allocation58_spill] sm:$0xff] %v6670_v29  ;;  %9173 = vst [vmem:[#allocation59_spill] sm:$0xff] %v6679_v3  ;;  %v6683_v23 = vrot.slane %v6653_v12, %v6392_v1  ;;  %v889_v19 = vsel %vm872_vm2, %v887_v49, %v888_v62  ;;  %v818_v45 = vmax.f32 %v6560_v48, 0.0  ;;  %v1475_v48 = vcombine.high %v961_v25, %v961_v25 }
 0x121   : > { %v6695_v55 = vsel %vm1980_vm3, %v1795_v9, %v1791_v22  ;;  %v6698_v3 = vsel %vm1980_vm3, %v2238_v36, %v2234_v21  ;;  %v1482_v49 = vrot.slane %v961_v25, %v6318_v2  ;;  %v1492_v57 = vcombine.high %v889_v19, %v889_v19 }
 0x122   : > { %9174 = vst [vmem:[#allocation60_spill] sm:$0xff] %v6683_v23  ;;  %v6688_v15 = vpop.f32.mrb[22].mxu0  ;;  %9175 = vst [vmem:[#allocation61_spill] sm:$0xff] %v6698_v3  ;;  %v6704_v62 = vsel %vm1980_vm3, %v6683_v23, %v2238_v36  ;;  %v6708_v6 = vrot.slane %v889_v19, %v6318_v2  ;;  %v891_v38 = vrot.slane %v818_v45, 7  ;;  %v699_v22 = vadd.f32 %v6387_v61, %v6503_v59 }
 0x123   : > { %v6700_v17 = vpop.f32.mrb[23].mxu0  ;;  %9176 = vst [vmem:[#allocation62_spill] sm:$0xff] %v6704_v62  ;;  %v714_v21 = vadd.f32 %v6534_v34, %v6387_v61  ;;  %v6716_v9 = vrot.slane %v6674_v0, %v6392_v1  ;;  %v6719_v36 = vrot.slane %v1475_v48, %v6318_v2  ;;  %v1490_v53 = vcombine.high %v1482_v49, %v1482_v49 }
 0x124   : > { %9177 = vst [vmem:[#allocation63_spill] sm:$0xff] %v6708_v6  ;;  %v6722_v25 = vrot.slane %v1492_v57, %v6318_v2  ;;  %v6728_v45 = vcombine.high %v6708_v6, %v6708_v6  ;;  %v2894_v59 = vrot.slane %v1482_v49, %v6392_v1  ;;  %v6733_v34 = vrot.slane %v6708_v6, %v6392_v1 }
 0x125   : > { %9178 = vst [vmem:[#allocation64_spill] sm:$0xff] %v6716_v9  ;;  %9179 = vst [vmem:[#allocation65_spill] sm:$0xff] %v6719_v36  ;;  %v3340_v20 = vrot.slane %v1482_v49, %v6325_v28  ;;  %v6740_v57 = vcombine.high %v6719_v36, %v6719_v36  ;;  %v6745_v29 = vrot.slane %v6719_v36, %v6392_v1  ;;  %v817_v49 = vmax.f32 %v699_v22, 0.0 }
 0x126   : > { %9180 = vst [vmem:[#allocation66_spill] sm:$0xff] %v6722_v25  ;;  %v6724_v19 = vpop.f32.mrb[24].mxu0  ;;  %9181 = vst [vmem:[#allocation67_spill] sm:$0xff] %v6728_v45  ;;  %v2898_v25 = vrot.slane %v1490_v53, %v6392_v1  ;;  %v3344_v45 = vrot.slane %v1490_v53, %v6325_v28  ;;  %v820_v9 = vmax.f32 %v714_v21, 0.0  ;;  %v9189_v53 = vrot.slane %v6490_v10, %v6325_v28 }
 0x127   : > { %9182 = vst [vmem:[#allocation68_spill] sm:$0xff] %v6733_v34  ;;  %v6736_v48 = vpop.f32.mrb[25].mxu0  ;;  %9183 = vst [vmem:[#allocation69_spill] sm:$0xff] %v6740_v57  ;;  %v979_v34 = vsel %vm872_vm2, %v891_v38, 0.0  ;;  %v6753_v23 = vrot.slane %v6740_v57, %v6392_v1  ;;  %v890_v21 = vrot.slane %v817_v49, 7 }
 0x128   : > { %9184 = vst [vmem:[#allocation70_spill] sm:$0xff] %v6745_v29  ;;  %v6756_v3 = vsel %vm1980_vm3, %v2898_v25, %v2894_v59  ;;  %v6765_v62 = vsel %vm1980_vm3, %v3344_v45, %v3340_v20  ;;  %v1171_v22 = vrot.slane %v979_v34, %v6318_v2  ;;  %v894_v6 = vrot.slane %v820_v9, 7 }
 0x129   : > { %9185 = vst [vmem:[#allocation71_spill] sm:$0xff] %v6753_v23  ;;  %9186 = vst [vmem:[#allocation72_spill] sm:$0xff] %v6756_v3  ;;  %v6772_v59 = vsel %vm1980_vm3, %v6745_v29, %v2898_v25  ;;  %v1996_v20 = vsel %vm1984_vm5, %v9189_v53, %v6518_v63  ;;  %v724_v45 = vadd.f32 %v6556_v50, %v6387_v61  ;;  %v962_v34 = vsel %vm872_vm2, 0.0, %v890_v21 }
 0x12a   : > { %v6762_v8 = vpop.f32.mrb[26].mxu0  ;;  %9187 = vst [vmem:[#allocation73_spill] sm:$0xff] %v6765_v62  ;;  %9188 = vst [vmem:[#allocation74_spill] sm:$0xff] %v6772_v59  ;;  %v892_v9 = vsel %vm872_vm2, %v890_v21, %v891_v38  ;;  %v980_v49 = vsel %vm872_vm2, %v894_v6, 0.0  ;;  %v1787_v25 = vrot.slane %v6497_v43, %v6325_v28  ;;  %v1131_v59 = vcombine.high %v962_v34, %v962_v34 }
 0x12b   : > { %v6768_v18 = vpop.f32.mrb[27].mxu0  ;;  %v1138_v51 = vrot.slane %v962_v34, %v6318_v2  ;;  %v1148_v57 = vcombine.high %v892_v9, %v892_v9  ;;  %v6790_v10 = vrot.slane %v892_v9, %v6318_v2  ;;  %v6795_v50 = vrot.slane %v1171_v22, %v6392_v1 }
 0x12c   : > { %v1556_v38 = vrot.slane %v980_v49, %v6318_v2  ;;  %v819_v53 = vmax.f32 %v709_v58, 0.0  ;;  %v9191_v21 = vrot.slane %v6472_v46, %v6325_v28  ;;  %v6805_v34 = vrot.slane %v1131_v59, %v6318_v2 }
 0x12d   : > { %9190 = vst [vmem:[#allocation75_spill] sm:$0xff] %v6795_v50  ;;  %v1146_v9 = vcombine.high %v1138_v51, %v1138_v51  ;;  %v6808_v23 = vrot.slane %v1148_v57, %v6318_v2  ;;  %v822_v29 = vmax.f32 %v724_v45, 0.0  ;;  %v6812_v22 = vcombine.high %v6790_v10, %v6790_v10 }
 0x12e   : > { %v6792_v63 = vpop.f32.mrb[28].mxu0  ;;  %v1997_v36 = vsel %vm1986_vm6, %v9191_v21, %v1996_v20  ;;  %v1823_v58 = vrot.slane %v1138_v51, %v6325_v28  ;;  %v2266_v20 = vrot.slane %v1138_v51, %v6392_v1  ;;  %v6820_v59 = vcombine.high %v6805_v34, %v6805_v34 }
 0x12f   : > { %v6802_v62 = vpop.f32.mrb[29].mxu0  ;;  %9192 = vst [vmem:[#allocation76_spill] sm:$0xff] %v6808_v23  ;;  %9193 = vst [vmem:[#allocation77_spill] sm:$0xff] %v6812_v22  ;;  %v1827_v49 = vrot.slane %v1146_v9, %v6325_v28  ;;  %v2270_v57 = vrot.slane %v1146_v9, %v6392_v1  ;;  %v6826_v45 = vrot.slane %v6790_v10, %v6392_v1  ;;  %v893_v51 = vrot.slane %v819_v53, 7 }
 0x130   : > { %v6832_v46 = vrot.slane %v6805_v34, %v6392_v1  ;;  %v9196_v3 = vrot.slane %v6485_v4, %v6325_v28  ;;  %v6847_v21 = vrot.slane %v1556_v38, %v6392_v1 }
 0x131   : > { %9194 = vst [vmem:[#allocation78_spill] sm:$0xff] %v6826_v45  ;;  %v6841_v7 = vsel %vm1980_vm3, %v1827_v49, %v1823_v58  ;;  %v6844_v45 = vsel %vm1980_vm3, %v2270_v57, %v2266_v20  ;;  %v895_v4 = vsel %vm872_vm2, %v893_v51, %v894_v6  ;;  %v719_v6 = vadd.f32 %v6387_v61, %v6562_v5 }
 0x132   : > { %9195 = vst [vmem:[#allocation79_spill] sm:$0xff] %v6832_v46  ;;  %v1998_v50 = vsel %vm1988_vm7, %v9196_v3, %v1997_v36  ;;  %9197 = vst [vmem:[#allocation80_spill] sm:$0xff] %v6844_v45  ;;  %v6851_v53 = vsel %vm1980_vm3, %v6832_v46, %v2270_v57  ;;  %v963_v3 = vsel %vm872_vm2, 0.0, %v893_v51  ;;  %v9200_v36 = vrot.slane %v6481_v14, %v6325_v28 }
 0x133   : > { %9198 = vst [vmem:[#allocation81_spill] sm:$0xff] %v6847_v21  ;;  %9199 = vst [vmem:[#allocation82_spill] sm:$0xff] %v6851_v53  ;;  %v1516_v49 = vcombine.high %v963_v3, %v963_v3  ;;  %v1523_v20 = vrot.slane %v963_v3, %v6318_v2  ;;  %v1533_v9 = vcombine.high %v895_v4, %v895_v4  ;;  %v897_v57 = vrot.slane %v822_v29, 7 }
 0x134   : > { %v1999_v58 = vsel %vm1990_vm8, %v9200_v36, %v1998_v50  ;;  %v6861_v38 = vrot.slane %v895_v4, %v6318_v2  ;;  %v734_v51 = vadd.f32 %v6584_v13, %v6387_v61  ;;  %v6872_v14 = vrot.slane %v6820_v59, %v6392_v1 }
 0x135   : > { %v6864_v21 = vsel %vm1992_vm9, %v1787_v25, %v1999_v58  ;;  %v6875_v50 = vrot.slane %v1516_v49, %v6318_v2  ;;  %v1531_v3 = vcombine.high %v1523_v20, %v1523_v20  ;;  %v6878_v4 = vrot.slane %v1533_v9, %v6318_v2 }
 0x136   : > { %9201 = vst [vmem:[#allocation83_spill] sm:$0xff] %v6861_v38  ;;  %9202 = vst [vmem:[#allocation84_spill] sm:$0xff] %v6864_v21  ;;  %5681 = vmatmul.mubr.msk.f32.vlgmr.msra.gmra.mrb[32].mxu0 %vm481_vm1, %v6864_v21  ;;  %v6884_v5 = vcombine.high %v6861_v38, %v6861_v38  ;;  %v2926_v13 = vrot.slane %v1523_v20, %v6392_v1  ;;  %v6889_v29 = vrot.slane %v6861_v38, %v6392_v1 }
 0x137   : > { %9203 = vst [vmem:[#allocation85_spill] sm:$0xff] %v6872_v14  ;;  %9204 = vst [vmem:[#allocation86_spill] sm:$0xff] %v6875_v50  ;;  %v3372_v25 = vrot.slane %v1523_v20, %v6325_v28  ;;  %5693 = vmatpush3.msk.msra.mxu0 %vm578_vm0, %v6418_v56  ;;  %v6896_v9 = vcombine.high %v6875_v50, %v6875_v50  ;;  %v2930_v36 = vrot.slane %v1531_v3, %v6392_v1 }
 0x138   : > { %9205 = vst [vmem:[#allocation87_spill] sm:$0xff] %v6878_v4  ;;  %9206 = vst [vmem:[#allocation88_spill] sm:$0xff] %v6884_v5  ;;  %v6901_v58 = vrot.slane %v6875_v50, %v6392_v1  ;;  %v3376_v49 = vrot.slane %v1531_v3, %v6325_v28  ;;  %v981_v20 = vsel %vm872_vm2, %v897_v57, 0.0  ;;  %v824_v5 = vmax.f32 %v734_v51, 0.0 }
 0x139   : > { %9207 = vst [vmem:[#allocation89_spill] sm:$0xff] %v6889_v29  ;;  %9208 = vst [vmem:[#allocation90_spill] sm:$0xff] %v6896_v9  ;;  %v821_v29 = vmax.f32 %v719_v6, 0.0  ;;  %v6909_v56 = vrot.slane %v6896_v9, %v6392_v1  ;;  %v6912_v4 = vsel %vm1980_vm3, %v2930_v36, %v2926_v13  ;;  %v1212_v21 = vrot.slane %v981_v20, %v6318_v2 }
 0x13a   : > { %9209 = vst [vmem:[#allocation91_spill] sm:$0xff] %v6901_v58  ;;  %9211 = vst [vmem:[#allocation93_spill] sm:$0xff] %v6912_v4  ;;  %v6919_v53 = vsel %vm1980_vm3, %v3376_v49, %v3372_v25  ;;  %v900_v51 = vrot.slane %v824_v5, 7  ;;  %v6924_v38 = vsel %vm1980_vm3, %v6901_v58, %v2930_v36  ;;  %v729_v13 = vadd.f32 %v6387_v61, %v6592_v16 }
 0x13b   : > { %9210 = vst [vmem:[#allocation92_spill] sm:$0xff] %v6909_v56  ;;  %9212 = vst [vmem:[#allocation94_spill] sm:$0xff] %v6919_v53  ;;  %v896_v6 = vrot.slane %v821_v29, 7  ;;  %v6930_v14 = vcombine.high %v6656_v52, %v6656_v52  ;;  %v1811_v3 = vrot.slane %v6660_v44, %v6325_v28  ;;  %v1815_v29 = vrot.slane %v6656_v52, %v6325_v28 }
 0x13c   : > { %9213 = vst [vmem:[#allocation95_spill] sm:$0xff] %v6924_v38  ;;  %v982_v5 = vsel %vm872_vm2, %v900_v51, 0.0  ;;  %v6944_v9 = vrot.slane %v1212_v21, %v6392_v1 }
 0x13d   : > { %9214 = vst [vmem:[#allocation96_spill] sm:$0xff] %v6930_v14  ;;  %v898_v25 = vsel %vm872_vm2, %v896_v6, %v897_v57  ;;  %v964_v49 = vsel %vm872_vm2, 0.0, %v896_v6  ;;  %v1597_v50 = vrot.slane %v982_v5, %v6318_v2  ;;  %v823_v57 = vmax.f32 %v729_v13, 0.0 }
 0x13e   : > { %v1172_v36 = vcombine.high %v964_v49, %v964_v49  ;;  %v1179_v20 = vrot.slane %v964_v49, %v6318_v2  ;;  %v1189_v16 = vcombine.high %v898_v25, %v898_v25  ;;  %v6941_v38 = vrot.slane %v898_v25, %v6318_v2  ;;  %9215 = vst [vmem:[#allocation97_spill] sm:$0xff] %v6944_v9 }
 0x13f   : > { %v1819_v6 = vrot.slane %v6930_v14, %v6325_v28  ;;  %v9216_v25 = vrot.slane %v6653_v12, %v6325_v28  ;;  %v9217_v9 = vrot.slane %v6674_v0, %v6325_v28 }
 0x140   : > { %v6950_v53 = vrot.slane %v1172_v36, %v6318_v2  ;;  %v1187_v56 = vcombine.high %v1179_v20, %v1179_v20  ;;  %v6953_v58 = vrot.slane %v1189_v16, %v6318_v2  ;;  %v6962_v49 = vcombine.high %v6941_v38, %v6941_v38 }
 0x141   : > { %v2002_v21 = vsel %vm1982_vm4, %v9216_v25, %v6695_v55  ;;  %v1855_v13 = vrot.slane %v1179_v20, %v6325_v28  ;;  %v2298_v36 = vrot.slane %v1179_v20, %v6392_v1  ;;  %v6976_v55 = vrot.slane %v6941_v38, %v6392_v1 }
 0x142   : > { %v6970_v16 = vcombine.high %v6950_v53, %v6950_v53  ;;  %v1859_v4 = vrot.slane %v1187_v56, %v6325_v28  ;;  %v2302_v12 = vrot.slane %v1187_v56, %v6392_v1  ;;  %v6982_v5 = vrot.slane %v6950_v53, %v6392_v1 }
 0x143   : > { %v899_v20 = vrot.slane %v823_v57, 7  ;;  %v2003_v46 = vsel %vm1984_vm5, %v9217_v9, %v2002_v21  ;;  %v6998_v25 = vrot.slane %v1597_v50, %v6392_v1  ;;  %v9219_v21 = vrot.slane %v6640_v39, %v6325_v28 }
 0x144   : > { %v6991_v45 = vsel %vm1980_vm3, %v1859_v4, %v1855_v13  ;;  %v6995_v14 = vrot.slane %v6970_v16, %v6392_v1  ;;  %v7001_v57 = vsel %vm1980_vm3, %v2302_v12, %v2298_v36  ;;  %v7015_v50 = vsel %vm1980_vm3, %v6982_v5, %v2302_v12 }
 0x145   : > { %9218 = vst [vmem:[#allocation98_spill] sm:$0xff] %v6998_v25  ;;  %v901_v0 = vsel %vm872_vm2, %v899_v20, %v900_v51  ;;  %v965_v9 = vsel %vm872_vm2, 0.0, %v899_v20  ;;  %v2004_v4 = vsel %vm1986_vm6, %v9219_v21, %v2003_v46  ;;  %9221 = vst [vmem:[#allocation100_spill] sm:$0xff] %v7015_v50  ;;  %v744_v36 = vadd.f32 %v6623_v60, %v6387_v61 }
 0x146   : > { %v1557_v13 = vcombine.high %v965_v9, %v965_v9  ;;  %v1564_v56 = vrot.slane %v965_v9, %v6318_v2  ;;  %v1574_v52 = vcombine.high %v901_v0, %v901_v0  ;;  %v7011_v44 = vrot.slane %v901_v0, %v6318_v2 }
 0x147   : > { %v2005_v51 = vsel %vm1988_vm7, %v1811_v3, %v2004_v4  ;;  %v739_v39 = vadd.f32 %v6387_v61, %v6630_v31  ;;  %v754_v0 = vadd.f32 %v6650_v41, %v6387_v61 }
 0x148   : > { %9220 = vst [vmem:[#allocation99_spill] sm:$0xff] %v7011_v44  ;;  %v7023_v46 = vrot.slane %v1557_v13, %v6318_v2  ;;  %v1572_v20 = vcombine.high %v1564_v56, %v1564_v56  ;;  %v7026_v9 = vrot.slane %v1574_v52, %v6318_v2  ;;  %v7032_v12 = vcombine.high %v7011_v44, %v7011_v44 }
 0x149   : > { %v2958_v3 = vrot.slane %v1564_v56, %v6392_v1  ;;  %v7037_v60 = vrot.slane %v7011_v44, %v6392_v1  ;;  %v3404_v31 = vrot.slane %v1564_v56, %v6325_v28  ;;  %v2006_v25 = vsel %vm1990_vm8, %v1815_v29, %v2005_v51 }
 0x14a   : > { %9222 = vst [vmem:[#allocation101_spill] sm:$0xff] %v7023_v46  ;;  %9223 = vst [vmem:[#allocation102_spill] sm:$0xff] %v7026_v9  ;;  %v7042_v21 = vcombine.high %v7023_v46, %v7023_v46  ;;  %v2962_v52 = vrot.slane %v1572_v20, %v6392_v1  ;;  %v7047_v41 = vrot.slane %v7023_v46, %v6392_v1 }
 0x14b   : > { %9224 = vst [vmem:[#allocation103_spill] sm:$0xff] %v7032_v12  ;;  %9225 = vst [vmem:[#allocation104_spill] sm:$0xff] %v7037_v60  ;;  %v3408_v4 = vrot.slane %v1572_v20, %v6325_v28  ;;  %v826_v60 = vmax.f32 %v744_v36, 0.0  ;;  %v825_v12 = vmax.f32 %v739_v39, 0.0  ;;  %v7068_v29 = vsel %vm1992_vm9, %v1819_v6, %v2006_v25 }
 0x14c   : > { %9226 = vst [vmem:[#allocation105_spill] sm:$0xff] %v7042_v21  ;;  %9227 = vst [vmem:[#allocation106_spill] sm:$0xff] %v7047_v41  ;;  %v7055_v56 = vrot.slane %v7042_v21, %v6392_v1  ;;  %v7058_v9 = vsel %vm1980_vm3, %v2962_v52, %v2958_v3  ;;  %v7072_v39 = vsel %vm1980_vm3, %v7047_v41, %v2962_v52  ;;  %5683 = vmatprep.mubr.msk.f32.mxu0 %vm481_vm1, %v7068_v29  ;;  %v7087_v52 = vpop.f32.mrb[30].mxu0 }
 0x14d   : > { %9229 = vst [vmem:[#allocation108_spill] sm:$0xff] %v7058_v9  ;;  %v7065_v37 = vsel %vm1980_vm3, %v3408_v4, %v3404_v31  ;;  %9231 = vst [vmem:[#allocation110_spill] sm:$0xff] %v7068_v29  ;;  %v903_v51 = vrot.slane %v826_v60, 7  ;;  %v902_v36 = vrot.slane %v825_v12, 7  ;;  %v828_v3 = vmax.f32 %v754_v0, 0.0 }
 0x14e   : > { %9228 = vst [vmem:[#allocation107_spill] sm:$0xff] %v7055_v56  ;;  %9230 = vst [vmem:[#allocation109_spill] sm:$0xff] %v7065_v37  ;;  %v749_v13 = vadd.f32 %v6387_v61, %v6662_v11  ;;  %v7080_v31 = vcombine.high %v6808_v23, %v6808_v23 }
 0x14f   : > { %9232 = vst [vmem:[#allocation111_spill] sm:$0xff] %v7072_v39  ;;  %v983_v6 = vsel %vm872_vm2, %v903_v51, 0.0  ;;  %v904_v25 = vsel %vm872_vm2, %v902_v36, %v903_v51  ;;  %v966_v12 = vsel %vm872_vm2, 0.0, %v902_v36  ;;  %9234 = vst [vmem:[#allocation113_spill] sm:$0xff] %v7087_v52  ;;  %v906_v29 = vrot.slane %v828_v3, 7 }
 0x150   : > { %9233 = vst [vmem:[#allocation112_spill] sm:$0xff] %v7080_v31  ;;  %v1253_v0 = vrot.slane %v983_v6, %v6318_v2  ;;  %v1213_v4 = vcombine.high %v966_v12, %v966_v12  ;;  %v1220_v11 = vrot.slane %v966_v12, %v6318_v2  ;;  %v1230_v20 = vcombine.high %v904_v25, %v904_v25 }
 0x151   : > { %v7092_v50 = vrot.slane %v904_v25, %v6318_v2  ;;  %v827_v39 = vmax.f32 %v749_v13, 0.0  ;;  %v984_v25 = vsel %vm872_vm2, %v906_v29, 0.0 }
 0x152   : > { %v7097_v36 = vrot.slane %v1253_v0, %v6392_v1  ;;  %v7100_v60 = vrot.slane %v1213_v4, %v6318_v2  ;;  %v1228_v52 = vcombine.high %v1220_v11, %v1220_v11  ;;  %v7105_v12 = vrot.slane %v1230_v20, %v6318_v2  ;;  %v7114_v0 = vpop.f32.mrb[31].mxu0 }
 0x153   : > { %v7109_v3 = vcombine.high %v7092_v50, %v7092_v50  ;;  %v1887_v13 = vrot.slane %v1220_v11, %v6325_v28  ;;  %9236 = vst [vmem:[#allocation115_spill] sm:$0xff] %v7114_v0  ;;  %v2330_v20 = vrot.slane %v1220_v11, %v6392_v1  ;;  %v905_v0 = vrot.slane %v827_v39, 7 }
 0x154   : > { %9235 = vst [vmem:[#allocation114_spill] sm:$0xff] %v7097_v36  ;;  %v7118_v4 = vcombine.high %v7100_v60, %v7100_v60  ;;  %v1891_v6 = vrot.slane %v1228_v52, %v6325_v28  ;;  %v2334_v51 = vrot.slane %v1228_v52, %v6392_v1  ;;  %v7127_v21 = vrot.slane %v7100_v60, %v6392_v1 }
 0x155   : > { %v7141_v52 = vrot.slane %v7092_v50, %v6392_v1  ;;  %v1638_v56 = vrot.slane %v984_v25, %v6318_v2  ;;  %v907_v39 = vsel %vm872_vm2, %v905_v0, %v906_v29  ;;  %v967_v46 = vsel %vm872_vm2, 0.0, %v905_v0 }
 0x156   : > { %v7133_v37 = vsel %vm1980_vm3, %v1891_v6, %v1887_v13  ;;  %v7137_v11 = vrot.slane %v7118_v4, %v6392_v1  ;;  %v7144_v44 = vsel %vm1980_vm3, %v2334_v51, %v2330_v20  ;;  %v1598_v41 = vcombine.high %v967_v46, %v967_v46 }
 0x157   : > { %v1605_v6 = vrot.slane %v967_v46, %v6318_v2  ;;  %v1615_v13 = vcombine.high %v907_v39, %v907_v39  ;;  %v7151_v9 = vrot.slane %v907_v39, %v6318_v2  ;;  %v7155_v36 = vsel %vm1980_vm3, %v7127_v21, %v2334_v51 }
 0x158   : > { %9238 = vst [vmem:[#allocation117_spill] sm:$0xff] %v7155_v36  ;;  %v7158_v20 = vrot.slane %v1638_v56, %v6392_v1  ;;  %v764_v25 = vadd.f32 %v6688_v15, %v6387_v61  ;;  %v759_v29 = vadd.f32 %v6387_v61, %v6700_v17  ;;  %v7165_v0 = vrot.slane %v1598_v41, %v6318_v2 }
 0x159   : > { %9237 = vst [vmem:[#allocation116_spill] sm:$0xff] %v7151_v9  ;;  %v1613_v46 = vcombine.high %v1605_v6, %v1605_v6  ;;  %v7168_v39 = vrot.slane %v1615_v13, %v6318_v2  ;;  %v9242_v51 = vrot.slane %v6805_v34, %v6325_v28  ;;  %v2990_v15 = vrot.slane %v1605_v6, %v6392_v1 }
 0x15a   : > { %9239 = vst [vmem:[#allocation118_spill] sm:$0xff] %v7158_v20  ;;  %9240 = vst [vmem:[#allocation119_spill] sm:$0xff] %v7165_v0  ;;  %v7177_v20 = vcombine.high %v7151_v9, %v7151_v9  ;;  %v7182_v17 = vrot.slane %v7151_v9, %v6392_v1  ;;  %v3436_v41 = vrot.slane %v1605_v6, %v6325_v28  ;;  %v829_v36 = vmax.f32 %v759_v29, 0.0 }
 0x15b   : > { %9241 = vst [vmem:[#allocation120_spill] sm:$0xff] %v7168_v39  ;;  %v2009_v56 = vsel %vm1982_vm4, %v9242_v51, %v6841_v7  ;;  %v7187_v13 = vcombine.high %v7165_v0, %v7165_v0  ;;  %v2994_v34 = vrot.slane %v1613_v46, %v6392_v1  ;;  %v7192_v7 = vrot.slane %v7165_v0, %v6392_v1 }
 0x15c   : > { %9243 = vst [vmem:[#allocation121_spill] sm:$0xff] %v7177_v20  ;;  %9244 = vst [vmem:[#allocation122_spill] sm:$0xff] %v7182_v17  ;;  %v3440_v51 = vrot.slane %v1613_v46, %v6325_v28  ;;  %v9247_v17 = vrot.slane %v6820_v59, %v6325_v28  ;;  %v830_v39 = vmax.f32 %v764_v25, 0.0  ;;  %v9251_v59 = vrot.slane %v6790_v10, %v6325_v28 }
 0x15d   : > { %9245 = vst [vmem:[#allocation123_spill] sm:$0xff] %v7187_v13  ;;  %9246 = vst [vmem:[#allocation124_spill] sm:$0xff] %v7192_v7  ;;  %v7203_v54 = vrot.slane %v7187_v13, %v6392_v1  ;;  %v7206_v26 = vsel %vm1980_vm3, %v2994_v34, %v2990_v15  ;;  %v7221_v15 = vsel %vm1980_vm3, %v7192_v7, %v2994_v34 }
 0x15e   : > { %v2010_v6 = vsel %vm1984_vm5, %v9247_v17, %v2009_v56  ;;  %9249 = vst [vmem:[#allocation126_spill] sm:$0xff] %v7206_v26  ;;  %v7213_v9 = vsel %vm1980_vm3, %v3440_v51, %v3436_v41  ;;  %v909_v29 = vrot.slane %v830_v39, 7  ;;  %v908_v56 = vrot.slane %v829_v36, 7  ;;  %9252 = vst [vmem:[#allocation128_spill] sm:$0xff] %v7221_v15 }
 0x15f   : > { %9248 = vst [vmem:[#allocation125_spill] sm:$0xff] %v7203_v54  ;;  %9250 = vst [vmem:[#allocation127_spill] sm:$0xff] %v7213_v9  ;;  %v2011_v25 = vsel %vm1986_vm6, %v9251_v59, %v2010_v6  ;;  %v9253_v17 = vrot.slane %v6812_v22, %v6325_v28  ;;  %v774_v41 = vadd.f32 %v6724_v19, %v6387_v61 }
 0x160   : > { %v769_v51 = vadd.f32 %v6387_v61, %v6736_v48  ;;  %v9254_v10 = vrot.slane %v6808_v23, %v6325_v28  ;;  %v985_v39 = vsel %vm872_vm2, %v909_v29, 0.0  ;;  %v910_v34 = vsel %vm872_vm2, %v908_v56, %v909_v29 }
 0x161   : > { %v2012_v46 = vsel %vm1988_vm7, %v9253_v17, %v2011_v25  ;;  %v968_v6 = vsel %vm872_vm2, 0.0, %v908_v56  ;;  %v9255_v59 = vrot.slane %v7080_v31, %v6325_v28  ;;  %v1294_v19 = vrot.slane %v985_v39, %v6318_v2 }
 0x162   : > { %v2013_v36 = vsel %vm1990_vm8, %v9254_v10, %v2012_v46  ;;  %v1254_v61 = vcombine.high %v968_v6, %v968_v6  ;;  %v1261_v48 = vrot.slane %v968_v6, %v6318_v2  ;;  %v1271_v46 = vcombine.high %v910_v34, %v910_v34 }
 0x163   : > { %v7242_v25 = vsel %vm1992_vm9, %v9255_v59, %v2013_v36  ;;  %v7249_v17 = vrot.slane %v910_v34, %v6318_v2  ;;  %v832_v29 = vmax.f32 %v774_v41, 0.0  ;;  %v831_v56 = vmax.f32 %v769_v51, 0.0 }
 0x164   : > { %9256 = vst [vmem:[#allocation129_spill] sm:$0xff] %v7242_v25  ;;  %5684 = vmatmul.mubr.msk.f32.gmra.mrb[34].mxu0 %vm481_vm1, %v7242_v25  ;;  %v7252_v10 = vrot.slane %v1294_v19, %v6392_v1  ;;  %v7255_v36 = vrot.slane %v1254_v61, %v6318_v2  ;;  %v1269_v59 = vcombine.high %v1261_v48, %v1261_v48 }
 0x165   : > { %v7259_v39 = vcombine.high %v6953_v58, %v6953_v58  ;;  %v7262_v6 = vrot.slane %v1271_v46, %v6318_v2  ;;  %v7266_v34 = vcombine.high %v7249_v17, %v7249_v17  ;;  %v1919_v41 = vrot.slane %v1261_v48, %v6325_v28 }
 0x166   : > { %9257 = vst [vmem:[#allocation130_spill] sm:$0xff] %v7252_v10  ;;  %v7273_v19 = vcombine.high %v7255_v36, %v7255_v36  ;;  %v1923_v61 = vrot.slane %v1269_v59, %v6325_v28  ;;  %v2362_v20 = vrot.slane %v1261_v48, %v6392_v1  ;;  %v2366_v46 = vrot.slane %v1269_v59, %v6392_v1 }
 0x167   : > { %v7282_v15 = vrot.slane %v7255_v36, %v6392_v1  ;;  %v912_v13 = vrot.slane %v832_v29, 7  ;;  %v911_v0 = vrot.slane %v831_v56, 7  ;;  %v7295_v59 = vrot.slane %v7249_v17, %v6392_v1 }
 0x168   : > { %v7287_v9 = vsel %vm1980_vm3, %v1923_v61, %v1919_v41  ;;  %v7291_v48 = vrot.slane %v7273_v19, %v6392_v1  ;;  %v7298_v25 = vsel %vm1980_vm3, %v2366_v46, %v2362_v20  ;;  %v1875_v20 = vrot.slane %v6962_v49, %v6325_v28 }
 0x169   : > { %v986_v29 = vsel %vm872_vm2, %v912_v13, 0.0  ;;  %v913_v56 = vsel %vm872_vm2, %v911_v0, %v912_v13  ;;  %v969_v51 = vsel %vm872_vm2, 0.0, %v911_v0  ;;  %v7307_v26 = vsel %vm1980_vm3, %v7282_v15, %v2366_v46 }
 0x16a   : > { %v1679_v41 = vrot.slane %v986_v29, %v6318_v2  ;;  %v1639_v61 = vcombine.high %v969_v51, %v969_v51  ;;  %v1646_v54 = vrot.slane %v969_v51, %v6318_v2  ;;  %v1656_v7 = vcombine.high %v913_v56, %v913_v56  ;;  %9258 = vst [vmem:[#allocation131_spill] sm:$0xff] %v7307_v26 }
 0x16b   : > { %v7310_v10 = vrot.slane %v913_v56, %v6318_v2  ;;  %v1879_v13 = vrot.slane %v6953_v58, %v6325_v28  ;;  %v1883_v46 = vrot.slane %v7259_v39, %v6325_v28  ;;  %v9264_v22 = vrot.slane %v6950_v53, %v6325_v28 }
 0x16c   : > { %v7317_v0 = vrot.slane %v1679_v41, %v6392_v1  ;;  %v7320_v29 = vrot.slane %v1639_v61, %v6318_v2  ;;  %v1654_v51 = vcombine.high %v1646_v54, %v1646_v54  ;;  %v7325_v26 = vrot.slane %v1656_v7, %v6318_v2 }
 0x16d   : > { %9259 = vst [vmem:[#allocation132_spill] sm:$0xff] %v7310_v10  ;;  %v7329_v56 = vcombine.high %v7310_v10, %v7310_v10  ;;  %v3022_v31 = vrot.slane %v1646_v54, %v6392_v1  ;;  %v7334_v41 = vrot.slane %v7310_v10, %v6392_v1  ;;  %v2016_v43 = vsel %vm1982_vm4, %v9264_v22, %v6991_v45 }
 0x16e   : > { %9260 = vst [vmem:[#allocation133_spill] sm:$0xff] %v7317_v0  ;;  %9261 = vst [vmem:[#allocation134_spill] sm:$0xff] %v7325_v26  ;;  %v7338_v61 = vcombine.high %v7320_v29, %v7320_v29  ;;  %v3026_v0 = vrot.slane %v1654_v51, %v6392_v1  ;;  %v7343_v7 = vrot.slane %v7320_v29, %v6392_v1 }
 0x16f   : > { %9262 = vst [vmem:[#allocation135_spill] sm:$0xff] %v7329_v56  ;;  %9263 = vst [vmem:[#allocation136_spill] sm:$0xff] %v7334_v41  ;;  %v3472_v26 = vrot.slane %v1654_v51, %v6325_v28  ;;  %v3468_v56 = vrot.slane %v1646_v54, %v6325_v28  ;;  %v7367_v23 = vrot.slane %v6962_v49, %v6392_v1 }
 0x170   : > { %v7358_v24 = vrot.slane %v7338_v61, %v6392_v1  ;;  %v7361_v51 = vsel %vm1980_vm3, %v3026_v0, %v3022_v31  ;;  %v7374_v22 = vsel %vm1980_vm3, %v7343_v7, %v3026_v0  ;;  %v9266_v45 = vrot.slane %v6970_v16, %v6325_v28  ;;  %v7394_v0 = vld [vmem:[%s8973_s7] ss:$0 sm:$0xff] }
 0x171   : > { %v7370_v41 = vsel %vm1980_vm3, %v3472_v26, %v3468_v56  ;;  %9265 = vst [vmem:[#allocation137_spill] sm:$0xff] %v7374_v22  ;;  %v7382_v31 = vrot.slane %v6953_v58, %v6392_v1  ;;  %v9267_v49 = vrot.slane %v6941_v38, %v6325_v28  ;;  %v2452_v26 = vsel %vm1982_vm4, %v6982_v5, %v7001_v57 }
 0x172   : > { %v2017_v53 = vsel %vm1984_vm5, %v9266_v45, %v2016_v43  ;;  %v784_v43 = vadd.f32 %v7394_v0, %v6762_v8  ;;  %v779_v58 = vadd.f32 %v7394_v0, %v6768_v18  ;;  %v7403_v38 = vrot.slane %v7259_v39, %v6392_v1 }
 0x173   : > { %v2018_v54 = vsel %vm1986_vm6, %v9267_v49, %v2017_v53  ;;  %v2453_v5 = vsel %vm1984_vm5, %v6995_v14, %v2452_v26  ;;  %v1246_v57 = vcombine.high %v7105_v12, %v7105_v12 }
 0x174   : > { %v2019_v16 = vsel %vm1988_vm7, %v1875_v20, %v2018_v54  ;;  %v2454_v8 = vsel %vm1986_vm6, %v6976_v55, %v2453_v5  ;;  %v834_v45 = vmax.f32 %v784_v43, 0.0  ;;  %v833_v53 = vmax.f32 %v779_v58, 0.0 }
 0x175   : > { %v2020_v56 = vsel %vm1990_vm8, %v1879_v13, %v2019_v16  ;;  %v2455_v39 = vsel %vm1988_vm7, %v7367_v23, %v2454_v8  ;;  %v1907_v20 = vrot.slane %v7109_v3, %v6325_v28  ;;  %v1911_v54 = vrot.slane %v7105_v12, %v6325_v28 }
 0x176   : > { %v7413_v18 = vsel %vm1992_vm9, %v1883_v46, %v2020_v56  ;;  %v2456_v13 = vsel %vm1990_vm8, %v7382_v31, %v2455_v39  ;;  %v915_v49 = vrot.slane %v834_v45, 7  ;;  %v914_v26 = vrot.slane %v833_v53, 7 }
 0x177   : > { %9268 = vst [vmem:[#allocation138_spill] sm:$0xff] %v7413_v18  ;;  %5686 = vmatprep.mubr.msk.f32.mxu0 %vm481_vm1, %v7413_v18  ;;  %v9269_v46 = vrot.slane %v7100_v60, %v6325_v28  ;;  %v7432_v58 = vsel %vm1992_vm9, %v7403_v38, %v2456_v13  ;;  %v1915_v16 = vrot.slane %v1246_v57, %v6325_v28 }
 0x178   : > { %9270 = vst [vmem:[#allocation139_spill] sm:$0xff] %v7432_v58  ;;  %v9271_v5 = vrot.slane %v7118_v4, %v6325_v28  ;;  %v7441_v8 = vrot.slane %v7109_v3, %v6392_v1  ;;  %5700 = vmatprep.mubr.msk.f32.mxu1 %vm481_vm1, %v7432_v58  ;;  %v916_v60 = vsel %vm872_vm2, %v914_v26, %v915_v49  ;;  %v970_v45 = vsel %vm872_vm2, 0.0, %v914_v26 }
 0x179   : > { %v2023_v43 = vsel %vm1982_vm4, %v9269_v46, %v7133_v37  ;;  %v987_v37 = vsel %vm872_vm2, %v915_v49, 0.0  ;;  %v9272_v53 = vrot.slane %v7092_v50, %v6325_v28  ;;  %v1295_v13 = vcombine.high %v970_v45, %v970_v45 }
 0x17a   : > { %v2024_v56 = vsel %vm1984_vm5, %v9271_v5, %v2023_v43  ;;  %v1335_v39 = vrot.slane %v987_v37, %v6318_v2  ;;  %v1302_v3 = vrot.slane %v970_v45, %v6318_v2  ;;  %v1312_v46 = vcombine.high %v916_v60, %v916_v60 }
 0x17b   : > { %v2025_v4 = vsel %vm1986_vm6, %v9272_v53, %v2024_v56  ;;  %v7455_v43 = vrot.slane %v916_v60, %v6318_v2  ;;  %v7460_v49 = vrot.slane %v7105_v12, %v6392_v1  ;;  %v7463_v26 = vrot.slane %v1246_v57, %v6392_v1 }
 0x17c   : > { %v2026_v5 = vsel %vm1988_vm7, %v1907_v20, %v2025_v4  ;;  %v7466_v50 = vrot.slane %v1335_v39, %v6392_v1  ;;  %v1309_v56 = vrot.slane %v1295_v13, %v6318_v2  ;;  %v1310_v37 = vcombine.high %v1302_v3, %v1302_v3 }
 0x17d   : > { %v2459_v60 = vsel %vm1982_vm4, %v7127_v21, %v7144_v44  ;;  %v7473_v45 = vrot.slane %v1312_v46, %v6318_v2  ;;  %v7477_v12 = vcombine.high %v7455_v43, %v7455_v43  ;;  %v1951_v57 = vrot.slane %v1302_v3, %v6325_v28 }
 0x17e   : > { %v1967_v20 = vrot.slane %v7455_v43, %v6325_v28  ;;  %v1311_v53 = vcombine.high %v1309_v56, %v1309_v56  ;;  %v1955_v4 = vrot.slane %v1310_v37, %v6325_v28  ;;  %v2394_v39 = vrot.slane %v1302_v3, %v6392_v1 }
 0x17f   : > { %v2398_v13 = vrot.slane %v1310_v37, %v6392_v1  ;;  %v1959_v44 = vrot.slane %v1309_v56, %v6325_v28  ;;  %v2402_v21 = vrot.slane %v1309_v56, %v6392_v1  ;;  %v2027_v46 = vsel %vm1990_vm8, %v1911_v54, %v2026_v5 }
 0x180   : > { %v2460_v18 = vsel %vm1984_vm5, %v7137_v11, %v2459_v60  ;;  %v1963_v58 = vrot.slane %v1311_v53, %v6325_v28  ;;  %v2036_v22 = vsel %vm1980_vm3, %v1955_v4, %v1951_v57  ;;  %v7493_v10 = vrot.slane %v1311_v53, %v6392_v1 }
 0x181   : > { %v7497_v3 = vrot.slane %v7455_v43, %v6392_v1  ;;  %v2472_v37 = vsel %vm1980_vm3, %v2398_v13, %v2394_v39  ;;  %v7501_v56 = vsel %vm1992_vm9, %v1915_v16, %v2027_v46  ;;  %v2461_v54 = vsel %vm1986_vm6, %v7141_v52, %v2460_v18 }
 0x182   : > { %9273 = vst [vmem:[#allocation140_spill] sm:$0xff] %v7501_v56  ;;  %v1287_v5 = vcombine.high %v7262_v6, %v7262_v6  ;;  %v7508_v60 = vsel %vm1980_vm3, %v2402_v21, %v2398_v13  ;;  %5687 = vmatmul.mubr.msk.f32.gmra.mrb[36].mxu0 %vm481_vm1, %v7501_v56  ;;  %v2462_v43 = vsel %vm1988_vm7, %v7441_v8, %v2461_v54 }
 0x183   : > { %v1939_v57 = vrot.slane %v7266_v34, %v6325_v28  ;;  %v9274_v16 = vrot.slane %v7255_v36, %v6325_v28  ;;  %v2463_v53 = vsel %vm1990_vm8, %v7460_v49, %v2462_v43  ;;  %v1943_v4 = vrot.slane %v7262_v6, %v6325_v28 }
 0x184   : > { %v1947_v39 = vrot.slane %v1287_v5, %v6325_v28  ;;  %v9275_v13 = vrot.slane %v7273_v19, %v6325_v28  ;;  %v7532_v54 = vsel %vm1992_vm9, %v7463_v26, %v2463_v53  ;;  %v7540_v43 = vrot.slane %v7266_v34, %v6392_v1  ;;  %v7549_v19 = vld [vmem:[%s8968_s2 + $0xc] sm:$0xf] }
 0x185   : > { %v2030_v18 = vsel %vm1982_vm4, %v9274_v16, %v7287_v9  ;;  %9276 = vst [vmem:[#allocation141_spill] sm:$0xff] %v7532_v54  ;;  %v9277_v9 = vrot.slane %v7249_v17, %v6325_v28  ;;  %v7544_v16 = vrot.slane %v7262_v6, %v6392_v1  ;;  %5701 = vmatmul.mubr.msk.f32.vlgmr.msra.gmra.mrb[0].mxu1 %vm481_vm1, %v7532_v54  ;;  %v9289_v54 = vld [vmem:[#allocation36_spill] sm:$0xff] }
 0x186   : > { %v2031_v46 = vsel %vm1984_vm5, %v9275_v13, %v2030_v18  ;;  %v2466_v18 = vsel %vm1982_vm4, %v7282_v15, %v7298_v25  ;;  %v794_v34 = vadd.f32 %v7394_v0, %v6792_v63  ;;  %v1328_v6 = vcombine.high %v7473_v45, %v7473_v45 }
 0x187   : > { %v2032_v36 = vsel %vm1986_vm6, %v9277_v9, %v2031_v46  ;;  %v7563_v13 = vrot.slane %v1287_v5, %v6392_v1  ;;  %v2467_v46 = vsel %vm1984_vm5, %v7291_v48, %v2466_v18  ;;  %v1971_v63 = vrot.slane %v7477_v12, %v6325_v28 }
 0x188   : > { %v2033_v17 = vsel %vm1988_vm7, %v1939_v57, %v2032_v36  ;;  %v5950_v57 = vld [vmem:[%s8968_s2 + $0x8] sm:$0xf]  ;;  %v2468_v25 = vsel %vm1986_vm6, %v7295_v59, %v2467_v46  ;;  %v836_v5 = vmax.f32 %v794_v34, 0.0  ;;  %v1979_v36 = vrot.slane %v1328_v6, %v6325_v28 }
 0x189   : > { %v2034_v53 = vsel %vm1990_vm8, %v1943_v4, %v2033_v17  ;;  %5707 = vmatpush3.msk.msra.mxu1 %vm578_vm0, %v5950_v57  ;;  %v1975_v4 = vrot.slane %v7473_v45, %v6325_v28  ;;  %v2469_v9 = vsel %vm1988_vm7, %v7540_v43, %v2468_v25  ;;  %v7590_v17 = vrot.slane %v7477_v12, %v6392_v1 }
 0x18a   : > { %v7574_v15 = vsel %vm1992_vm9, %v1947_v39, %v2034_v53  ;;  %5720 = vmatprep.subr.msk.mxu1 %vm578_vm0, %v7549_v19  ;;  %v2037_v39 = vsel %vm1982_vm4, %v1959_v44, %v2036_v22  ;;  %v2470_v18 = vsel %vm1990_vm8, %v7544_v16, %v2469_v9  ;;  %v918_v34 = vrot.slane %v836_v5, 7 }
 0x18b   : > { %9278 = vst [vmem:[#allocation142_spill] sm:$0xff] %v7574_v15  ;;  %5689 = vmatprep.mubr.msk.f32.mxu0 %vm481_vm1, %v7574_v15  ;;  %v2038_v53 = vsel %vm1984_vm5, %v1963_v58, %v2037_v39  ;;  %v7597_v46 = vrot.slane %v7473_v45, %v6392_v1  ;;  %v7601_v57 = vsel %vm1992_vm9, %v7563_v13, %v2470_v18 }
 0x18c   : > { %9279 = vst [vmem:[#allocation143_spill] sm:$0xff] %v7601_v57  ;;  %v2039_v22 = vsel %vm1986_vm6, %v1967_v20, %v2038_v53  ;;  %v2473_v44 = vsel %vm1982_vm4, %v2402_v21, %v2472_v37  ;;  %v789_v12 = vadd.f32 %v7394_v0, %v6802_v62  ;;  %5703 = vmatprep.mubr.msk.f32.mxu1 %vm481_vm1, %v7601_v57  ;;  %v988_v58 = vsel %vm872_vm2, %v918_v34, 0.0  ;;  %v9288_v57 = vld [vmem:[#allocation39_spill] sm:$0xff] }
 0x18d   : > { %v2040_v25 = vsel %vm1988_vm7, %v1971_v63, %v2039_v22  ;;  %v2474_v45 = vsel %vm1984_vm5, %v7493_v10, %v2473_v44  ;;  %v2170_v5 = vrot.slane %v6323_v27, %v6392_v1  ;;  %v1720_v20 = vrot.slane %v988_v58, %v6318_v2 }
 0x18e   : > { %v2041_v21 = vsel %vm1990_vm8, %v1975_v4, %v2040_v25  ;;  %v2475_v62 = vsel %vm1986_vm6, %v7497_v3, %v2474_v45  ;;  %v835_v37 = vmax.f32 %v789_v12, 0.0  ;;  %v7623_v39 = vrot.slane %v1328_v6, %v6392_v1 }
 0x18f   : > { %v7620_v9 = vsel %vm1992_vm9, %v1979_v36, %v2041_v21  ;;  %v2476_v63 = vsel %vm1988_vm7, %v7590_v17, %v2475_v62  ;;  %v2174_v27 = vrot.slane %v6332_v32, %v6392_v1  ;;  %v7630_v18 = vrot.slane %v1720_v20, %v6392_v1 }
 0x190   : > { %9280 = vst [vmem:[#allocation144_spill] sm:$0xff] %v7620_v9  ;;  %5690 = vmatmul.mubr.msk.f32.gmra.mrb[38].mxu0 %vm481_vm1, %v7620_v9  ;;  %v2477_v4 = vsel %vm1990_vm8, %v7597_v46, %v2476_v63  ;;  %v917_v36 = vrot.slane %v835_v37, 7  ;;  %v2178_v6 = vrot.slane %v6328_v30, %v6392_v1  ;;  %v2182_v32 = vrot.slane %v6336_v33, %v6392_v1 }
 0x191   : > { %9281 = vst [vmem:[#allocation145_spill] sm:$0xff] %v7630_v18  ;;  %v7640_v53 = vsel %vm1992_vm9, %v7623_v39, %v2477_v4  ;;  %v2186_v22 = vrot.slane %v6342_v35, %v6392_v1  ;;  %v2190_v44 = vrot.slane %v6355_v42, %v6392_v1  ;;  %v2194_v58 = vrot.slane %v6351_v40, %v6392_v1  ;;  %v9284_v4 = vld [vmem:[#allocation35_spill] sm:$0xff]  ;;  %v9290_v18 = vld [vmem:[#allocation40_spill] sm:$0xff] }
 0x192   : > { %9282 = vst [vmem:[#allocation146_spill] sm:$0xff] %v7640_v53  ;;  %5704 = vmatmul.mubr.msk.f32.gmra.mrb[2].mxu1 %vm481_vm1, %v7640_v53  ;;  %v919_v12 = vsel %vm872_vm2, %v917_v36, %v918_v34  ;;  %v971_v30 = vsel %vm872_vm2, 0.0, %v917_v36  ;;  %v2423_v25 = vsel %vm1980_vm3, %v2174_v27, %v2170_v5  ;;  %v2198_v42 = vrot.slane %v6368_v47, %v6392_v1  ;;  %v9283_v34 = vld [vmem:[#allocation21_spill] sm:$0xff] }
 0x193   : > { %v1680_v45 = vcombine.high %v971_v30, %v971_v30  ;;  %v1687_v33 = vrot.slane %v971_v30, %v6318_v2  ;;  %v1697_v20 = vcombine.high %v919_v12, %v919_v12  ;;  %v7657_v35 = vrot.slane %v919_v12, %v6318_v2 }
 0x194   : > { %v2424_v21 = vsel %vm1982_vm4, %v2178_v6, %v2423_v25  ;;  %v973_v62 = vsel %vm872_vm2, %v9283_v34, 0.0  ;;  %v2637_v37 = vsel %vm1980_vm3, %v2178_v6, %v2174_v27  ;;  %v2230_v36 = vrot.slane %v9284_v4, %v6392_v1 }
 0x195   : > { %v7666_v40 = vrot.slane %v1680_v45, %v6318_v2  ;;  %v1695_v5 = vcombine.high %v1687_v33, %v1687_v33  ;;  %v7669_v63 = vrot.slane %v1697_v20, %v6318_v2  ;;  %v7675_v47 = vcombine.high %v7657_v35, %v7657_v35 }
 0x196   : > { %v3054_v12 = vrot.slane %v1687_v33, %v6392_v1  ;;  %v7680_v30 = vrot.slane %v7657_v35, %v6392_v1  ;;  %v3500_v27 = vrot.slane %v1687_v33, %v6325_v28  ;;  %v2425_v4 = vsel %vm1984_vm5, %v2182_v32, %v2424_v21 }
 0x197   : > { %v7685_v6 = vcombine.high %v7666_v40, %v7666_v40  ;;  %v7688_v25 = vrot.slane %v1695_v5, %v6392_v1  ;;  %v3504_v45 = vrot.slane %v1695_v5, %v6325_v28  ;;  %v7695_v34 = vrot.slane %v7666_v40, %v6392_v1 }
 0x198   : > { %9285 = vst [vmem:[#allocation21_spill] sm:$0xff] %v7680_v30  ;;  %v1048_v33 = vrot.slane %v973_v62, %v6318_v2  ;;  %v2638_v9 = vsel %vm1982_vm4, %v2182_v32, %v2637_v37  ;;  %v2426_v62 = vsel %vm1986_vm6, %v2186_v22, %v2425_v4  ;;  %v2432_v20 = vsel %vm1984_vm5, %v9289_v54, %v9288_v57  ;;  %v9292_v4 = vld [vmem:[#allocation37_spill] sm:$0xff] }
 0x199   : > { %9286 = vst [vmem:[#allocation35_spill] sm:$0xff] %v7688_v25  ;;  %v7702_v15 = vrot.slane %v7685_v6, %v6392_v1  ;;  %v7706_v5 = vsel %vm1980_vm3, %v7688_v25, %v3054_v12  ;;  %v7713_v21 = vsel %vm1980_vm3, %v3504_v45, %v3500_v27  ;;  %v2639_v37 = vsel %vm1984_vm5, %v2186_v22, %v2638_v9  ;;  %v9291_v25 = vld [vmem:[#allocation38_spill] sm:$0xff]  ;;  %v9293_v9 = vld [vmem:[#allocation41_spill] sm:$0xff] }
 0x19a   : > { %v2608_v32 = vrot.slane %v1048_v33, %v6392_v1  ;;  %v2427_v53 = vsel %vm1988_vm7, %v2190_v44, %v2426_v62  ;;  %v2640_v12 = vsel %vm1986_vm6, %v2190_v44, %v2639_v37  ;;  %v2647_v56 = vsel %vm1986_vm6, %v9291_v25, %v9290_v18 }
 0x19b   : > { %9287 = vst [vmem:[#allocation147_spill] sm:$0xff] %v7702_v15  ;;  %v2428_v27 = vsel %vm1990_vm8, %v2194_v58, %v2427_v53  ;;  %v2641_v45 = vsel %vm1988_vm7, %v2194_v58, %v2640_v12  ;;  %v2433_v33 = vsel %vm1986_vm6, %v9292_v4, %v2432_v20  ;;  %v2648_v22 = vsel %vm1988_vm7, %v9293_v9, %v2647_v56  ;;  %v9294_v58 = vld [vmem:[#allocation34_spill] sm:$0xff]  ;;  %v9296_v56 = vld [vmem:[#allocation57_spill] sm:$0xff]  ;;  %v9301_v4 = vld [vmem:[#allocation60_spill] sm:$0xff] }
 0x19c   : > { %v2429_v44 = vsel %vm1992_vm9, %v2198_v42, %v2428_v27  ;;  %v2642_v62 = vsel %vm1990_vm8, %v2198_v42, %v2641_v45  ;;  %v2434_v54 = vsel %vm1988_vm7, %v9291_v25, %v2433_v33  ;;  %v2649_v57 = vsel %vm1990_vm8, %v2230_v36, %v2648_v22  ;;  %v9298_v25 = vld [vmem:[#allocation56_spill] sm:$0xff]  ;;  %v9300_v45 = vld [vmem:[#allocation61_spill] sm:$0xff] }
 0x19d   : > { %5694 = vmatprep.mubr.msk.f32.mxu0 %vm481_vm1, %v2429_v44  ;;  %v2643_v18 = vsel %vm1992_vm9, %v2608_v32, %v2642_v62  ;;  %v2435_v53 = vsel %vm1990_vm8, %v9293_v9, %v2434_v54  ;;  %v7743_v20 = vsel %vm1992_vm9, %v9294_v58, %v2649_v57  ;;  %v2254_v37 = vrot.slane %v9296_v56, %v6392_v1  ;;  %v9299_v32 = vld [vmem:[#allocation96_spill] sm:$0xff]  ;;  %v7761_v9 = vld [vmem:[%s8968_s2 + $0x10] sm:$0xf]  ;;  %v9303_v44 = vld [vmem:[#allocation62_spill] sm:$0xff] }
 0x19e   : > { %9295 = vst [vmem:[#allocation39_spill] sm:$0xff] %v7743_v20  ;;  %5708 = vmatprep.mubr.msk.f32.mxu1 %vm481_vm1, %v2643_v18  ;;  %v7749_v42 = vsel %vm1992_vm9, %v2230_v36, %v2435_v53  ;;  %v2258_v12 = vrot.slane %v9298_v25, %v6392_v1  ;;  %v2262_v27 = vrot.slane %v9299_v32, %v6392_v1  ;;  %v9302_v36 = vld [vmem:[#allocation64_spill] sm:$0xff]  ;;  %v9304_v54 = vld [vmem:[#allocation77_spill] sm:$0xff]  ;;  %v9305_v18 = vld [vmem:[#allocation58_spill] sm:$0xff] }
 0x19f   : > { %9297 = vst [vmem:[#allocation36_spill] sm:$0xff] %v7749_v42  ;;  %v2438_v33 = vsel %vm1982_vm4, %v9301_v4, %v9300_v45  ;;  %5695 = vmatmul.mubr.msk.f32.vlgmr.msra.gmra.mrb[32].mxu0 %vm481_vm1, %v7749_v42  ;;  %5709 = vmatmul.mubr.msk.f32.vlgmr.msra.gmra.mrb[4].mxu1 %vm481_vm1, %v7743_v20  ;;  %v2652_v62 = vsel %vm1982_vm4, %v9302_v36, %v9303_v44  ;;  %v9306_v56 = vld [vmem:[#allocation76_spill] sm:$0xff]  ;;  %v9309_v44 = vld [vmem:[#allocation79_spill] sm:$0xff]  ;;  %v9311_v20 = vld [vmem:[#allocation85_spill] sm:$0xff] }
 0x1a0   : > { %v2439_v22 = vsel %vm1984_vm5, %v9302_v36, %v2438_v33  ;;  %v2286_v57 = vrot.slane %v9304_v54, %v6392_v1  ;;  %5721 = vmatpush3.msk.msra.mxu1 %vm578_vm0, %v7549_v19  ;;  %v2653_v58 = vsel %vm1984_vm5, %v9305_v18, %v2652_v62  ;;  %v2290_v25 = vrot.slane %v9306_v56, %v6392_v1  ;;  %v9307_v32 = vld [vmem:[#allocation112_spill] sm:$0xff]  ;;  %v9310_v54 = vld [vmem:[#allocation82_spill] sm:$0xff] }
 0x1a1   : > { %v2440_v53 = vsel %vm1986_vm6, %v9305_v18, %v2439_v22  ;;  %v2294_v45 = vrot.slane %v9307_v32, %v6392_v1  ;;  %v2654_v33 = vsel %vm1986_vm6, %v2254_v37, %v2653_v58  ;;  %v9308_v36 = vld [vmem:[#allocation80_spill] sm:$0xff]  ;;  %v2659_v22 = vsel %vm1982_vm4, %v9311_v20, %v9310_v54  ;;  %5734 = vmatprep.subr.msk.mxu1 %vm578_vm0, %v7761_v9  ;;  %v9312_v56 = vld [vmem:[#allocation78_spill] sm:$0xff] }
 0x1a2   : > { %v2441_v4 = vsel %vm1988_vm7, %v2254_v37, %v2440_v53  ;;  %v2445_v19 = vsel %vm1982_vm4, %v9309_v44, %v9308_v36  ;;  %v2655_v18 = vsel %vm1988_vm7, %v2258_v12, %v2654_v33  ;;  %v2660_v37 = vsel %vm1984_vm5, %v9312_v56, %v2659_v22 }
 0x1a3   : > { %v2442_v62 = vsel %vm1990_vm8, %v2258_v12, %v2441_v4  ;;  %v2446_v53 = vsel %vm1984_vm5, %v9311_v20, %v2445_v19  ;;  %v2656_v32 = vsel %vm1990_vm8, %v2262_v27, %v2655_v18  ;;  %v2661_v44 = vsel %vm1986_vm6, %v2286_v57, %v2660_v37  ;;  %v9314_v12 = vld [vmem:[#allocation55_spill] sm:$0xff]  ;;  %v9316_v19 = vld [vmem:[#allocation100_spill] sm:$0xff]  ;;  %v9317_v18 = vld [vmem:[#allocation117_spill] sm:$0xff] }
 0x1a4   : > { %v7801_v58 = vsel %vm1992_vm9, %v2262_v27, %v2442_v62  ;;  %v2447_v36 = vsel %vm1986_vm6, %v9312_v56, %v2446_v53  ;;  %v7811_v4 = vsel %vm1992_vm9, %v9314_v12, %v2656_v32  ;;  %v2662_v33 = vsel %vm1988_vm7, %v2290_v25, %v2661_v44  ;;  %v9319_v56 = vld [vmem:[#allocation75_spill] sm:$0xff]  ;;  %v9322_v44 = vld [vmem:[#allocation97_spill] sm:$0xff] }
 0x1a5   : > { %9313 = vst [vmem:[#allocation40_spill] sm:$0xff] %v7801_v58  ;;  %5697 = vmatprep.mubr.msk.f32.mxu0 %vm481_vm1, %v7801_v58  ;;  %9315 = vst [vmem:[#allocation38_spill] sm:$0xff] %v7811_v4  ;;  %v2448_v20 = vsel %vm1988_vm7, %v2286_v57, %v2447_v36  ;;  %v2666_v27 = vsel %vm1982_vm4, %v6995_v14, %v9316_v19  ;;  %5711 = vmatprep.mubr.msk.f32.mxu1 %vm481_vm1, %v7811_v4  ;;  %v9364_v4 = vld [vmem:[#allocation106_spill] sm:$0xff] }
 0x1a6   : > { %v2449_v54 = vsel %vm1990_vm8, %v2290_v25, %v2448_v20  ;;  %v2663_v22 = vsel %vm1990_vm8, %v2294_v45, %v2662_v33  ;;  %v2667_v62 = vsel %vm1984_vm5, %v6976_v55, %v2666_v27  ;;  %v2673_v57 = vsel %vm1982_vm4, %v7137_v11, %v9317_v18  ;;  %v9327_v33 = vld [vmem:[#allocation26_spill] sm:$0xff] }
 0x1a7   : > { %v7828_v53 = vsel %vm1992_vm9, %v2294_v45, %v2449_v54  ;;  %v7832_v14 = vsel %vm1992_vm9, %v9319_v56, %v2663_v22  ;;  %v2668_v37 = vsel %vm1986_vm6, %v7367_v23, %v2667_v62  ;;  %v2674_v25 = vsel %vm1984_vm5, %v7141_v52, %v2673_v57  ;;  %v9321_v45 = vld [vmem:[#allocation131_spill] sm:$0xff]  ;;  %v9331_v22 = vld [vmem:[#allocation29_spill] sm:$0xff]  ;;  %v9333_v57 = vld [vmem:[#allocation30_spill] sm:$0xff] }
 0x1a8   : > { %9318 = vst [vmem:[#allocation37_spill] sm:$0xff] %v7828_v53  ;;  %9320 = vst [vmem:[#allocation41_spill] sm:$0xff] %v7832_v14  ;;  %5698 = vmatmul.mubr.msk.f32.gmra.mrb[34].mxu0 %vm481_vm1, %v7828_v53  ;;  %5712 = vmatmul.mubr.msk.f32.gmra.mrb[6].mxu1 %vm481_vm1, %v7832_v14  ;;  %v2669_v55 = vsel %vm1988_vm7, %v7382_v31, %v2668_v37  ;;  %v2675_v11 = vsel %vm1986_vm6, %v7441_v8, %v2674_v25  ;;  %v9335_v25 = vld [vmem:[#allocation52_spill] sm:$0xff] }
 0x1a9   : > { %v2680_v32 = vsel %vm1982_vm4, %v7291_v48, %v9321_v45  ;;  %v2670_v23 = vsel %vm1990_vm8, %v7403_v38, %v2669_v55  ;;  %v2676_v52 = vsel %vm1988_vm7, %v7460_v49, %v2675_v11  ;;  %v2687_v31 = vsel %vm1982_vm4, %v7493_v10, %v7508_v60  ;;  %v9336_v55 = vld [vmem:[#allocation51_spill] sm:$0xff]  ;;  %v9365_v53 = vld [vmem:[#allocation120_spill] sm:$0xff] }
 0x1aa   : > { %v2681_v36 = vsel %vm1984_vm5, %v7295_v59, %v2680_v32  ;;  %v7860_v8 = vsel %vm1992_vm9, %v9322_v44, %v2670_v23  ;;  %v2677_v48 = vsel %vm1990_vm8, %v7463_v26, %v2676_v52  ;;  %v2688_v49 = vsel %vm1984_vm5, %v7497_v3, %v2687_v31  ;;  %v9324_v59 = vld [vmem:[#allocation114_spill] sm:$0xff]  ;;  %v9326_v26 = vld [vmem:[#allocation25_spill] sm:$0xff]  ;;  %v9337_v45 = vld [vmem:[#allocation27_spill] sm:$0xff] }
 0x1ab   : > { %9323 = vst [vmem:[#allocation34_spill] sm:$0xff] %v7860_v8  ;;  %v2682_v38 = vsel %vm1986_vm6, %v7540_v43, %v2681_v36  ;;  %5714 = vmatprep.mubr.msk.f32.mxu1 %vm481_vm1, %v7860_v8  ;;  %v7872_v12 = vsel %vm1992_vm9, %v9324_v59, %v2677_v48  ;;  %v2689_v60 = vsel %vm1986_vm6, %v7590_v17, %v2688_v49  ;;  %v9328_v17 = vld [vmem:[#allocation130_spill] sm:$0xff]  ;;  %v9340_v31 = vld [vmem:[#allocation67_spill] sm:$0xff] }
 0x1ac   : > { %9325 = vst [vmem:[#allocation57_spill] sm:$0xff] %v7872_v12  ;;  %v2683_v10 = vsel %vm1988_vm7, %v7544_v16, %v2682_v38  ;;  %v7880_v20 = vcombine.high %v9326_v26, %v9326_v26  ;;  %5715 = vmatmul.mubr.msk.f32.gmra.mrb[0].mxu1 %vm481_vm1, %v7872_v12  ;;  %v2690_v43 = vsel %vm1988_vm7, %v7597_v46, %v2689_v60  ;;  %v9330_v46 = vld [vmem:[#allocation31_spill] sm:$0xff]  ;;  %v9338_v23 = vld [vmem:[#allocation46_spill] sm:$0xff]  ;;  %v9342_v38 = vld [vmem:[#allocation49_spill] sm:$0xff] }
 0x1ad   : > { %v2684_v3 = vsel %vm1990_vm8, %v7563_v13, %v2683_v10  ;;  %v7890_v19 = vrot.slane %v9327_v33, %v6392_v1  ;;  %v7894_v16 = vrot.slane %v9326_v26, %v6392_v1  ;;  %v2691_v54 = vsel %vm1990_vm8, %v7623_v39, %v2690_v43  ;;  %v9334_v39 = vld [vmem:[#allocation48_spill] sm:$0xff]  ;;  %v9339_v36 = vld [vmem:[#allocation66_spill] sm:$0xff] }
 0x1ae   : > { %v7898_v27 = vsel %vm1992_vm9, %v9328_v17, %v2684_v3  ;;  %v7904_v13 = vrot.slane %v7880_v20, %v6392_v1  ;;  %v3084_v62 = vsel %vm1982_vm4, %v9331_v22, %v9330_v46  ;;  %v7913_v18 = vsel %vm1992_vm9, %v7466_v50, %v2691_v54  ;;  %v9344_v10 = vld [vmem:[#allocation72_spill] sm:$0xff]  ;;  %v9345_v60 = vld [vmem:[#allocation70_spill] sm:$0xff]  ;;  %v9348_v22 = vld [vmem:[#allocation71_spill] sm:$0xff] }
 0x1af   : > { %9329 = vst [vmem:[#allocation56_spill] sm:$0xff] %v7898_v27  ;;  %5717 = vmatprep.mubr.msk.f32.mxu1 %vm481_vm1, %v7898_v27  ;;  %9332 = vst [vmem:[#allocation96_spill] sm:$0xff] %v7913_v18  ;;  %v3085_v56 = vsel %vm1984_vm5, %v9333_v57, %v3084_v62  ;;  %v7919_v37 = vrot.slane %v9334_v39, %v6392_v1  ;;  %v3092_v11 = vsel %vm1984_vm5, %v9336_v55, %v9335_v25  ;;  %v9346_v17 = vld [vmem:[#allocation50_spill] sm:$0xff]  ;;  %v9349_v55 = vld [vmem:[#allocation68_spill] sm:$0xff] }
 0x1b0   : > { %v3086_v32 = vsel %vm1986_vm6, %v9337_v45, %v3085_v56  ;;  %v3093_v52 = vsel %vm1986_vm6, %v9338_v23, %v3092_v11  ;;  %v7930_v50 = vcombine.high %v9339_v36, %v9339_v36  ;;  %v7934_v44 = vrot.slane %v9340_v31, %v6392_v1  ;;  %5718 = vmatmul.mubr.msk.f32.gmra.mrb[2].mxu1 %vm481_vm1, %v7913_v18  ;;  %v9358_v18 = vld [vmem:[#allocation102_spill] sm:$0xff] }
 0x1b1   : > { %v3087_v48 = vsel %vm1988_vm7, %v7890_v19, %v3086_v32  ;;  %v3094_v49 = vsel %vm1988_vm7, %v9342_v38, %v3093_v52  ;;  %v7944_v59 = vrot.slane %v9339_v36, %v6392_v1  ;;  %v3098_v3 = vsel %vm1982_vm4, %v9345_v60, %v9344_v10  ;;  %v9350_v32 = vld [vmem:[#allocation87_spill] sm:$0xff]  ;;  %v9354_v60 = vld [vmem:[#allocation93_spill] sm:$0xff] }
 0x1b2   : > { %9341 = vst [vmem:[#allocation61_spill] sm:$0xff] %v7934_v44  ;;  %v3088_v43 = vsel %vm1990_vm8, %v7894_v16, %v3087_v48  ;;  %v3095_v54 = vsel %vm1990_vm8, %v9346_v17, %v3094_v49  ;;  %v7955_v46 = vrot.slane %v7930_v50, %v6392_v1  ;;  %v3099_v62 = vsel %vm1984_vm5, %v9348_v22, %v3098_v3  ;;  %v9351_v48 = vld [vmem:[#allocation88_spill] sm:$0xff]  ;;  %v9355_v3 = vld [vmem:[#allocation91_spill] sm:$0xff] }
 0x1b3   : > { %9343 = vst [vmem:[#allocation60_spill] sm:$0xff] %v7944_v59  ;;  %v3089_v56 = vsel %vm1992_vm9, %v7904_v13, %v3088_v43  ;;  %v3096_v25 = vsel %vm1992_vm9, %v7919_v37, %v3095_v54  ;;  %v3100_v11 = vsel %vm1986_vm6, %v9349_v55, %v3099_v62  ;;  %v7967_v23 = vcombine.high %v9350_v32, %v9350_v32  ;;  %v9372_v55 = vld [vmem:[#allocation125_spill] sm:$0xff] }
 0x1b4   : > { %9347 = vst [vmem:[#allocation64_spill] sm:$0xff] %v7955_v46  ;;  %5722 = vmatprep.mubr.msk.f32.mxu1 %vm481_vm1, %v3089_v56  ;;  %v3101_v52 = vsel %vm1988_vm7, %v7934_v44, %v3100_v11  ;;  %v7974_v49 = vrot.slane %v9351_v48, %v6392_v1  ;;  %v7978_v10 = vrot.slane %v9350_v32, %v6392_v1  ;;  %v9357_v56 = vld [vmem:[#allocation92_spill] sm:$0xff] }
 0x1b5   : > { %v3105_v43 = vsel %vm1982_vm4, %v9355_v3, %v9354_v60  ;;  %5723 = vmatmul.mubr.msk.f32.vlgmr.msra.gmra.mrb[4].mxu1 %vm481_vm1, %v3096_v25  ;;  %v3102_v54 = vsel %vm1990_vm8, %v7944_v59, %v3101_v52  ;;  %v7988_v62 = vrot.slane %v7967_v23, %v6392_v1  ;;  %v7994_v27 = vcombine.high %v9358_v18, %v9358_v18  ;;  %v7999_v60 = vld [vmem:[%s8968_s2 + $0x14] sm:$0xf]  ;;  %v9359_v52 = vld [vmem:[#allocation89_spill] sm:$0xff]  ;;  %v9371_v44 = vld [vmem:[#allocation124_spill] sm:$0xff] }
 0x1b6   : > { %9352 = vst [vmem:[#allocation62_spill] sm:$0xff] %v7974_v49  ;;  %9353 = vst [vmem:[#allocation77_spill] sm:$0xff] %v7978_v10  ;;  %v3106_v11 = vsel %vm1984_vm5, %v9357_v56, %v3105_v43  ;;  %5735 = vmatpush3.msk.msra.mxu1 %vm578_vm0, %v7761_v9  ;;  %v3103_v25 = vsel %vm1992_vm9, %v7955_v46, %v3102_v54  ;;  %v9360_v43 = vld [vmem:[#allocation103_spill] sm:$0xff]  ;;  %v8013_v8 = vrot.slane %v9358_v18, %v6392_v1  ;;  %v9363_v54 = vld [vmem:[#allocation108_spill] sm:$0xff] }
 0x1b7   : > { %9356 = vst [vmem:[#allocation58_spill] sm:$0xff] %v7988_v62  ;;  %v3107_v3 = vsel %vm1986_vm6, %v9359_v52, %v3106_v11  ;;  %v8009_v12 = vrot.slane %v9360_v43, %v6392_v1  ;;  %5725 = vmatprep.mubr.msk.f32.mxu1 %vm481_vm1, %v3103_v25  ;;  %v8020_v9 = vrot.slane %v7994_v27, %v6392_v1  ;;  %v9366_v46 = vld [vmem:[#allocation107_spill] sm:$0xff] }
 0x1b8   : > { %9362 = vst [vmem:[#allocation112_spill] sm:$0xff] %v8013_v8  ;;  %v3108_v14 = vsel %vm1988_vm7, %v7974_v49, %v3107_v3  ;;  %v3112_v11 = vsel %vm1982_vm4, %v9364_v4, %v9363_v54  ;;  %v8027_v58 = vcombine.high %v9365_v53, %v9365_v53  ;;  %v9367_v3 = vld [vmem:[#allocation121_spill] sm:$0xff]  ;;  %v8039_v49 = vrot.slane %v9365_v53, %v6392_v1  ;;  %v9368_v54 = vld [vmem:[#allocation104_spill] sm:$0xff] }
 0x1b9   : > { %9361 = vst [vmem:[#allocation76_spill] sm:$0xff] %v8009_v12  ;;  %v3109_v42 = vsel %vm1990_vm8, %v7978_v10, %v3108_v14  ;;  %v3113_v25 = vsel %vm1984_vm5, %v9366_v46, %v3112_v11  ;;  %v8035_v59 = vrot.slane %v9367_v3, %v6392_v1  ;;  %5748 = vmatprep.subr.msk.mxu1 %vm578_vm0, %v7999_v60  ;;  %v9370_v10 = vld [vmem:[#allocation126_spill] sm:$0xff] }
 0x1ba   : > { %v3110_v4 = vsel %vm1992_vm9, %v7988_v62, %v3109_v42  ;;  %v3114_v14 = vsel %vm1986_vm6, %v9368_v54, %v3113_v25  ;;  %v8049_v11 = vrot.slane %v8027_v58, %v6392_v1  ;;  %v3119_v46 = vsel %vm1982_vm4, %v9371_v44, %v9370_v10  ;;  %v9373_v42 = vld [vmem:[#allocation134_spill] sm:$0xff]  ;;  %v9374_v25 = vld [vmem:[#allocation135_spill] sm:$0xff] }
 0x1bb   : > { %5726 = vmatmul.mubr.msk.f32.gmra.mrb[6].mxu1 %vm481_vm1, %v3110_v4  ;;  %v3115_v52 = vsel %vm1988_vm7, %v8009_v12, %v3114_v14  ;;  %v3120_v56 = vsel %vm1984_vm5, %v9372_v55, %v3119_v46  ;;  %v8061_v62 = vcombine.high %v9373_v42, %v9373_v42  ;;  %v8065_v54 = vrot.slane %v9374_v25, %v6392_v1  ;;  %v9376_v44 = vld [vmem:[#allocation122_spill] sm:$0xff] }
 0x1bc   : > { %9369 = vst [vmem:[#allocation80_spill] sm:$0xff] %v8049_v11  ;;  %v3116_v22 = vsel %vm1990_vm8, %v8013_v8, %v3115_v52  ;;  %v3121_v10 = vsel %vm1986_vm6, %v9376_v44, %v3120_v56  ;;  %v8073_v4 = vrot.slane %v9373_v42, %v6392_v1  ;;  %v3126_v46 = vsel %vm1982_vm4, %v7343_v7, %v7361_v51  ;;  %v9379_v8 = vld [vmem:[#allocation136_spill] sm:$0xff] }
 0x1bd   : > { %9375 = vst [vmem:[#allocation79_spill] sm:$0xff] %v8065_v54  ;;  %v3117_v14 = vsel %vm1992_vm9, %v8020_v9, %v3116_v22  ;;  %v3122_v12 = vsel %vm1988_vm7, %v8035_v59, %v3121_v10  ;;  %v8084_v52 = vrot.slane %v8061_v62, %v6392_v1  ;;  %v3127_v56 = vsel %vm1984_vm5, %v7358_v24, %v3126_v46 }
 0x1be   : > { %9377 = vst [vmem:[#allocation82_spill] sm:$0xff] %v8073_v4  ;;  %5728 = vmatprep.mubr.msk.f32.mxu1 %vm481_vm1, %v3117_v14  ;;  %v3123_v44 = vsel %vm1990_vm8, %v8039_v49, %v3122_v12  ;;  %v3128_v7 = vsel %vm1986_vm6, %v9379_v8, %v3127_v56  ;;  %v8095_v51 = vcombine.high %v7669_v63, %v7669_v63 }
 0x1bf   : > { %9378 = vst [vmem:[#allocation85_spill] sm:$0xff] %v8084_v52  ;;  %v8099_v22 = vrot.slane %v7675_v47, %v6392_v1  ;;  %v3124_v10 = vsel %vm1992_vm9, %v8049_v11, %v3123_v44  ;;  %v3129_v46 = vsel %vm1988_vm7, %v8065_v54, %v3128_v7  ;;  %v8107_v12 = vrot.slane %v7669_v63, %v6392_v1  ;;  %v9383_v11 = vld [vmem:[#allocation24_spill] sm:$0xff] }
 0x1c0   : > { %v3133_v14 = vsel %vm1982_vm4, %v7695_v34, %v7706_v5  ;;  %5729 = vmatmul.mubr.msk.f32.gmra.mrb[0].mxu1 %vm481_vm1, %v3124_v10  ;;  %v3130_v56 = vsel %vm1990_vm8, %v8073_v4, %v3129_v46  ;;  %v8117_v8 = vrot.slane %v8095_v51, %v6392_v1  ;;  %v3296_v7 = vrot.slane %v9327_v33, %v6325_v28  ;;  %v9382_v4 = vld [vmem:[#allocation32_spill] sm:$0xff] }
 0x1c1   : > { %9380 = vst [vmem:[#allocation78_spill] sm:$0xff] %v8099_v22  ;;  %9381 = vst [vmem:[#allocation55_spill] sm:$0xff] %v8107_v12  ;;  %v3134_v44 = vsel %vm1984_vm5, %v7702_v15, %v3133_v14  ;;  %v3131_v54 = vsel %vm1992_vm9, %v8084_v52, %v3130_v56  ;;  %v3300_v10 = vrot.slane %v9326_v26, %v6325_v28  ;;  %v9385_v52 = vld [vmem:[#allocation54_spill] sm:$0xff]  ;;  %v9388_v15 = vld [vmem:[#allocation28_spill] sm:$0xff] }
 0x1c2   : > { %v3135_v5 = vsel %vm1986_vm6, %v7680_v30, %v3134_v44  ;;  %v3304_v46 = vrot.slane %v7880_v20, %v6325_v28  ;;  %5731 = vmatprep.mubr.msk.f32.mxu1 %vm481_vm1, %v3131_v54  ;;  %v9384_v33 = vrot.slane %v9383_v11, %v6325_v28  ;;  %v3336_v44 = vrot.slane %v9334_v39, %v6325_v28  ;;  %v9386_v30 = vld [vmem:[#allocation47_spill] sm:$0xff] }
 0x1c3   : > { %v3136_v14 = vsel %vm1988_vm7, %v8099_v22, %v3135_v5  ;;  %v9387_v26 = vrot.slane %v9386_v30, %v6325_v28  ;;  %v9389_v5 = vrot.slane %v9388_v15, %v6325_v28  ;;  %v9390_v11 = vld [vmem:[#allocation43_spill] sm:$0xff]  ;;  %v3360_v39 = vrot.slane %v9340_v31, %v6325_v28 }
 0x1c4   : > { %v3530_v56 = vsel %vm1982_vm4, %v9384_v33, %v9382_v4  ;;  %v3137_v54 = vsel %vm1990_vm8, %v8107_v12, %v3136_v14  ;;  %v9391_v4 = vrot.slane %v9390_v11, %v6325_v28  ;;  %v9394_v12 = vld [vmem:[#allocation45_spill] sm:$0xff] }
 0x1c5   : > { %v3538_v20 = vsel %vm1984_vm5, %v9387_v26, %v9385_v52  ;;  %v3531_v22 = vsel %vm1984_vm5, %v9389_v5, %v3530_v56  ;;  %v3138_v30 = vsel %vm1992_vm9, %v8117_v8, %v3137_v54  ;;  %v9392_v52 = vld [vmem:[#allocation22_spill] sm:$0xff]  ;;  %v9395_v15 = vrot.slane %v9394_v12, %v6325_v28 }
 0x1c6   : > { %v3539_v33 = vsel %vm1986_vm6, %v9391_v4, %v3538_v20  ;;  %v9393_v26 = vrot.slane %v9392_v52, %v6325_v28  ;;  %v3364_v5 = vrot.slane %v9339_v36, %v6325_v28  ;;  %5732 = vmatmul.mubr.msk.f32.gmra.mrb[2].mxu1 %vm481_vm1, %v3138_v30  ;;  %v9396_v20 = vld [vmem:[#allocation44_spill] sm:$0xff]  ;;  %v9398_v4 = vld [vmem:[#allocation73_spill] sm:$0xff] }
 0x1c7   : > { %v3540_v56 = vsel %vm1988_vm7, %v9395_v15, %v3539_v33  ;;  %v9397_v54 = vrot.slane %v9396_v20, %v6325_v28  ;;  %v9399_v52 = vld [vmem:[#allocation65_spill] sm:$0xff]  ;;  %v3392_v15 = vrot.slane %v9351_v48, %v6325_v28 }
 0x1c8   : > { %v3532_v14 = vsel %vm1986_vm6, %v9393_v26, %v3531_v22  ;;  %v3368_v22 = vrot.slane %v7930_v50, %v6325_v28  ;;  %v9400_v12 = vrot.slane %v9399_v52, %v6325_v28  ;;  %v9401_v26 = vld [vmem:[#allocation69_spill] sm:$0xff]  ;;  %v3424_v52 = vrot.slane %v9360_v43, %v6325_v28 }
 0x1c9   : > { %v3533_v31 = vsel %vm1988_vm7, %v3296_v7, %v3532_v14  ;;  %v3541_v11 = vsel %vm1990_vm8, %v9397_v54, %v3540_v56  ;;  %v9402_v7 = vrot.slane %v9401_v26, %v6325_v28  ;;  %v9403_v56 = vld [vmem:[#allocation63_spill] sm:$0xff]  ;;  %v9410_v26 = vld [vmem:[#allocation109_spill] sm:$0xff] }
 0x1ca   : > { %v3544_v33 = vsel %vm1982_vm4, %v9400_v12, %v9398_v4  ;;  %v3534_v36 = vsel %vm1990_vm8, %v3300_v10, %v3533_v31  ;;  %v3542_v30 = vsel %vm1992_vm9, %v3336_v44, %v3541_v11  ;;  %v9404_v20 = vrot.slane %v9403_v56, %v6325_v28  ;;  %v9405_v11 = vld [vmem:[#allocation94_spill] sm:$0xff]  ;;  %v9415_v56 = vld [vmem:[#allocation105_spill] sm:$0xff] }
 0x1cb   : > { %v3545_v14 = vsel %vm1984_vm5, %v9402_v7, %v3544_v33  ;;  %v3535_v50 = vsel %vm1992_vm9, %v3304_v46, %v3534_v36  ;;  %v3396_v10 = vrot.slane %v9350_v32, %v6325_v28  ;;  %v3400_v44 = vrot.slane %v7967_v23, %v6325_v28  ;;  %v9406_v4 = vld [vmem:[#allocation86_spill] sm:$0xff]  ;;  %v9411_v7 = vld [vmem:[#allocation101_spill] sm:$0xff] }
 0x1cc   : > { %v3546_v54 = vsel %vm1986_vm6, %v9404_v20, %v3545_v14  ;;  %5736 = vmatprep.mubr.msk.f32.mxu1 %vm481_vm1, %v3535_v50  ;;  %v9407_v48 = vrot.slane %v9406_v4, %v6325_v28  ;;  %v3428_v12 = vrot.slane %v9358_v18, %v6325_v28  ;;  %v9408_v23 = vld [vmem:[#allocation90_spill] sm:$0xff]  ;;  %v3432_v36 = vrot.slane %v7994_v27, %v6325_v28  ;;  %v8227_v18 = vld [vmem:[%s8968_s2 + $0x18] sm:$0xf] }
 0x1cd   : > { %v3547_v31 = vsel %vm1988_vm7, %v3360_v39, %v3546_v54  ;;  %5737 = vmatmul.mubr.msk.f32.vlgmr.msra.gmra.mrb[4].mxu1 %vm481_vm1, %v3542_v30  ;;  %v9409_v33 = vrot.slane %v9408_v23, %v6325_v28  ;;  %v9412_v14 = vrot.slane %v9411_v7, %v6325_v28  ;;  %v9413_v30 = vld [vmem:[#allocation83_spill] sm:$0xff]  ;;  %v9416_v20 = vrot.slane %v9415_v56, %v6325_v28  ;;  %v9428_v56 = vld [vmem:[#allocation113_spill] sm:$0xff] }
 0x1ce   : > { %v3551_v46 = vsel %vm1982_vm4, %v9407_v48, %v9405_v11  ;;  %v3548_v32 = vsel %vm1990_vm8, %v3364_v5, %v3547_v31  ;;  %5749 = vmatpush3.msk.msra.mxu1 %vm578_vm0, %v7999_v60  ;;  %v9414_v50 = vrot.slane %v9413_v30, %v6325_v28  ;;  %v3456_v31 = vrot.slane %v9367_v3, %v6325_v28  ;;  %v9417_v60 = vld [vmem:[#allocation99_spill] sm:$0xff] }
 0x1cf   : > { %v3552_v39 = vsel %vm1984_vm5, %v9409_v33, %v3551_v46  ;;  %v3558_v43 = vsel %vm1982_vm4, %v9412_v14, %v9410_v26  ;;  %v3549_v5 = vsel %vm1992_vm9, %v3368_v22, %v3548_v32  ;;  %v9418_v22 = vrot.slane %v9417_v60, %v6325_v28  ;;  %v9419_v3 = vld [vmem:[#allocation127_spill] sm:$0xff]  ;;  %5762 = vmatprep.subr.msk.mxu1 %vm578_vm0, %v8227_v18 }
 0x1d0   : > { %v3553_v27 = vsel %vm1986_vm6, %v9414_v50, %v3552_v39  ;;  %v3559_v54 = vsel %vm1984_vm5, %v9416_v20, %v3558_v43  ;;  %5739 = vmatprep.mubr.msk.f32.mxu1 %vm481_vm1, %v3549_v5  ;;  %v3460_v48 = vrot.slane %v9365_v53, %v6325_v28  ;;  %v3464_v46 = vrot.slane %v8027_v58, %v6325_v28  ;;  %v9420_v33 = vld [vmem:[#allocation119_spill] sm:$0xff] }
 0x1d1   : > { %v3554_v11 = vsel %vm1988_vm7, %v3392_v15, %v3553_v27  ;;  %v3560_v4 = vsel %vm1986_vm6, %v9418_v22, %v3559_v54  ;;  %v9421_v39 = vrot.slane %v9420_v33, %v6325_v28  ;;  %v3488_v26 = vrot.slane %v9374_v25, %v6325_v28  ;;  %v9422_v7 = vld [vmem:[#allocation123_spill] sm:$0xff]  ;;  %v9424_v25 = vld [vmem:[#allocation116_spill] sm:$0xff] }
 0x1d2   : > { %v3555_v32 = vsel %vm1990_vm8, %v3396_v10, %v3554_v11  ;;  %v3561_v23 = vsel %vm1988_vm7, %v3424_v52, %v3560_v4  ;;  %v9423_v10 = vrot.slane %v9422_v7, %v6325_v28  ;;  %v3492_v14 = vrot.slane %v9373_v42, %v6325_v28 }
 0x1d3   : > { %v3565_v15 = vsel %vm1982_vm4, %v9421_v39, %v9419_v3  ;;  %v3556_v53 = vsel %vm1992_vm9, %v3400_v44, %v3555_v32  ;;  %v3562_v58 = vsel %vm1990_vm8, %v3428_v12, %v3561_v23  ;;  %v9425_v5 = vrot.slane %v9424_v25, %v6325_v28  ;;  %v9433_v23 = vld [vmem:[#allocation115_spill] sm:$0xff]  ;;  %v9434_v3 = vld [vmem:[#allocation33_spill] sm:$0xff] }
 0x1d4   : > { %v3566_v52 = vsel %vm1984_vm5, %v9423_v10, %v3565_v15  ;;  %5740 = vmatmul.mubr.msk.f32.gmra.mrb[6].mxu1 %vm481_vm1, %v3556_v53  ;;  %v3563_v43 = vsel %vm1992_vm9, %v3432_v36, %v3562_v58  ;;  %v3496_v44 = vrot.slane %v8061_v62, %v6325_v28  ;;  %v9426_v12 = vrot.slane %v7320_v29, %v6325_v28  ;;  %v9429_v29 = vld [vmem:[#allocation132_spill] sm:$0xff] }
 0x1d5   : > { %v3567_v30 = vsel %vm1986_vm6, %v9425_v5, %v3566_v52  ;;  %5742 = vmatprep.mubr.msk.f32.mxu1 %vm481_vm1, %v3563_v43  ;;  %v9427_v36 = vrot.slane %v7338_v61, %v6325_v28  ;;  %v804_v20 = vadd.f32 %v7394_v0, %v9428_v56  ;;  %v3520_v62 = vrot.slane %v7675_v47, %v6325_v28  ;;  %v9443_v56 = vld [vmem:[#allocation42_spill] sm:$0xff] }
 0x1d6   : > { %v3572_v50 = vsel %vm1982_vm4, %v9426_v12, %v7370_v41  ;;  %v3568_v42 = vsel %vm1988_vm7, %v3456_v31, %v3567_v30  ;;  %v9430_v41 = vrot.slane %v9429_v29, %v6325_v28  ;;  %v3524_v31 = vrot.slane %v7669_v63, %v6325_v28  ;;  %v9439_v30 = vld [vmem:[#allocation71_spill] sm:$0xff]  ;;  %v9441_v12 = vld [vmem:[#allocation92_spill] sm:$0xff] }
 0x1d7   : > { %v3573_v27 = vsel %vm1984_vm5, %v9427_v36, %v3572_v50  ;;  %v3569_v54 = vsel %vm1990_vm8, %v3460_v48, %v3568_v42  ;;  %v3528_v61 = vrot.slane %v8095_v51, %v6325_v28  ;;  %v838_v4 = vmax.f32 %v804_v20, 0.0  ;;  %v9442_v42 = vld [vmem:[#allocation35_spill] sm:$0xff] }
 0x1d8   : > { %v3574_v11 = vsel %vm1986_vm6, %v9430_v41, %v3573_v27  ;;  %v3570_v60 = vsel %vm1992_vm9, %v3464_v46, %v3569_v54  ;;  %v9431_v47 = vrot.slane %v7666_v40, %v6325_v28  ;;  %v9432_v63 = vrot.slane %v7685_v6, %v6325_v28 }
 0x1d9   : > { %v3575_v22 = vsel %vm1988_vm7, %v3488_v26, %v3574_v11  ;;  %5743 = vmatmul.mubr.msk.f32.gmra.mrb[0].mxu1 %vm481_vm1, %v3570_v60  ;;  %v799_v46 = vadd.f32 %v7394_v0, %v9433_v23  ;;  %v3752_v33 = vsel %vm1982_vm4, %v9333_v57, %v9434_v3  ;;  %v921_v39 = vrot.slane %v838_v4, 7  ;;  %v9436_v57 = vld [vmem:[#allocation53_spill] sm:$0xff]  ;;  %v9446_v60 = vld [vmem:[#allocation111_spill] sm:$0xff] }
 0x1da   : > { %v3579_v48 = vsel %vm1982_vm4, %v9431_v47, %v7713_v21  ;;  %v3576_v32 = vsel %vm1990_vm8, %v3492_v14, %v3575_v22  ;;  %v9435_v21 = vrot.slane %v7657_v35, %v6325_v28  ;;  %v3753_v6 = vsel %vm1984_vm5, %v9337_v45, %v3752_v33  ;;  %v9447_v22 = vld [vmem:[#allocation107_spill] sm:$0xff]  ;;  %v8381_v47 = vld [vmem:[%s8968_s2 + $0x1c] sm:$0xf] }
 0x1db   : > { %v3580_v51 = vsel %vm1984_vm5, %v9432_v63, %v3579_v48  ;;  %v3577_v40 = vsel %vm1992_vm9, %v3496_v44, %v3576_v32  ;;  %v837_v0 = vmax.f32 %v799_v46, 0.0  ;;  %v3754_v53 = vsel %vm1986_vm6, %v7890_v19, %v3753_v6  ;;  %v9440_v44 = vld [vmem:[#allocation95_spill] sm:$0xff] }
 0x1dc   : > { %v3581_v15 = vsel %vm1986_vm6, %v9435_v21, %v3580_v51  ;;  %5745 = vmatprep.mubr.msk.f32.mxu1 %vm481_vm1, %v3577_v40  ;;  %v3761_v58 = vsel %vm1986_vm6, %v9342_v38, %v9436_v57  ;;  %v989_v7 = vsel %vm872_vm2, %v921_v39, 0.0  ;;  %v3755_v10 = vsel %vm1988_vm7, %v7894_v16, %v3754_v53  ;;  %v9437_v38 = vld [vmem:[#allocation23_spill] sm:$0xff]  ;;  %v9438_v16 = vld [vmem:[#allocation74_spill] sm:$0xff]  ;;  %v9448_v51 = vld [vmem:[#allocation128_spill] sm:$0xff] }
 0x1dd   : > { %v3582_v26 = vsel %vm1988_vm7, %v3520_v62, %v3581_v15  ;;  %v3762_v45 = vsel %vm1988_vm7, %v9346_v17, %v3761_v58  ;;  %v1376_v52 = vrot.slane %v989_v7, %v6318_v2  ;;  %v920_v43 = vrot.slane %v837_v0, 7  ;;  %v9451_v57 = vld [vmem:[#allocation104_spill] sm:$0xff] }
 0x1de   : > { %v3583_v35 = vsel %vm1990_vm8, %v3524_v31, %v3582_v26  ;;  %v3756_v19 = vsel %vm1990_vm8, %v7904_v13, %v3755_v10  ;;  %v3763_v5 = vsel %vm1990_vm8, %v7919_v37, %v3762_v45  ;;  %v3766_v17 = vsel %vm1982_vm4, %v9439_v30, %v9438_v16  ;;  %v9445_v31 = vld [vmem:[#allocation89_spill] sm:$0xff]  ;;  %v9455_v16 = vld [vmem:[#allocation64_spill] sm:$0xff] }
 0x1df   : > { %v3584_v14 = vsel %vm1992_vm9, %v3528_v61, %v3583_v35  ;;  %v3757_v25 = vsel %vm1992_vm9, %v9437_v38, %v3756_v19  ;;  %v3773_v50 = vsel %vm1982_vm4, %v9441_v12, %v9440_v44  ;;  %v3800_v13 = vsel %vm1980_vm3, %v7695_v34, %v9442_v42  ;;  %v9444_v34 = vld [vmem:[#allocation68_spill] sm:$0xff]  ;;  %v9449_v26 = vld [vmem:[#allocation61_spill] sm:$0xff]  ;;  %v9458_v42 = vld [vmem:[#allocation122_spill] sm:$0xff] }
 0x1e0   : > { %5746 = vmatmul.mubr.msk.f32.gmra.mrb[2].mxu1 %vm481_vm1, %v3584_v14  ;;  %v922_v36 = vsel %vm872_vm2, %v920_v43, %v921_v39  ;;  %v972_v27 = vsel %vm872_vm2, 0.0, %v920_v43  ;;  %v3764_v37 = vsel %vm1992_vm9, %v9443_v56, %v3763_v5  ;;  %v8369_v41 = vrot.slane %v1376_v52, %v6392_v1  ;;  %v9452_v14 = vld [vmem:[#allocation60_spill] sm:$0xff]  ;;  %v9453_v19 = vld [vmem:[#allocation77_spill] sm:$0xff] }
 0x1e1   : > { %5750 = vmatprep.mubr.msk.f32.mxu1 %vm481_vm1, %v3757_v25  ;;  %v1336_v20 = vcombine.high %v972_v27, %v972_v27  ;;  %v1343_v62 = vrot.slane %v972_v27, %v6318_v2  ;;  %v1353_v54 = vcombine.high %v922_v36, %v922_v36  ;;  %v8366_v29 = vrot.slane %v922_v36, %v6318_v2  ;;  %v9454_v25 = vld [vmem:[#allocation76_spill] sm:$0xff]  ;;  %v9459_v27 = vld [vmem:[#allocation59_spill] sm:$0xff] }
 0x1e2   : > { %v3767_v11 = vsel %vm1984_vm5, %v9444_v34, %v3766_v17  ;;  %v3774_v61 = vsel %vm1984_vm5, %v9445_v31, %v3773_v50  ;;  %v3780_v4 = vsel %vm1982_vm4, %v9447_v22, %v9446_v60  ;;  %v3787_v23 = vsel %vm1982_vm4, %v9372_v55, %v9448_v51  ;;  %v9456_v17 = vld [vmem:[#allocation58_spill] sm:$0xff]  ;;  %v9457_v12 = vld [vmem:[#allocation112_spill] sm:$0xff]  ;;  %v9462_v31 = vld [vmem:[#allocation137_spill] sm:$0xff] }
 0x1e3   : > { %v8384_v48 = vrot.slane %v1336_v20, %v6318_v2  ;;  %v1351_v32 = vcombine.high %v1343_v62, %v1343_v62  ;;  %v8387_v63 = vrot.slane %v1353_v54, %v6318_v2  ;;  %v8395_v46 = vcombine.high %v8366_v29, %v8366_v29  ;;  %v9463_v60 = vld [vmem:[#allocation147_spill] sm:$0xff] }
 0x1e4   : > { %5751 = vmatmul.mubr.msk.f32.vlgmr.msra.gmra.mrb[4].mxu1 %vm481_vm1, %v3764_v37  ;;  %v3944_v3 = vrot.slane %v1343_v62, %v6392_v1  ;;  %v8400_v33 = vrot.slane %v8366_v29, %v6392_v1  ;;  %v4103_v40 = vrot.slane %v1343_v62, %v6325_v28  ;;  %v4119_v15 = vrot.slane %v8366_v29, %v6325_v28  ;;  %v9460_v37 = vld [vmem:[#allocation81_spill] sm:$0xff]  ;;  %v9461_v29 = vld [vmem:[#allocation98_spill] sm:$0xff] }
 0x1e5   : > { %5763 = vmatpush3.msk.msra.mxu1 %vm578_vm0, %v8227_v18  ;;  %v1352_v39 = vcombine.high %v8384_v48, %v8384_v48  ;;  %v3948_v55 = vrot.slane %v1351_v32, %v6392_v1  ;;  %v4107_v21 = vrot.slane %v1351_v32, %v6325_v28  ;;  %v3952_v6 = vrot.slane %v8384_v48, %v6392_v1  ;;  %v9450_v18 = vld [vmem:[#allocation62_spill] sm:$0xff]  ;;  %v9466_v32 = vld [vmem:[#allocation21_spill] sm:$0xff] }
 0x1e6   : > { %5776 = vmatprep.subr.msk.mxu1 %vm578_vm0, %v8381_v47  ;;  %v3768_v0 = vsel %vm1986_vm6, %v9449_v26, %v3767_v11  ;;  %v3775_v53 = vsel %vm1986_vm6, %v9450_v18, %v3774_v61  ;;  %v3781_v58 = vsel %vm1984_vm5, %v9451_v57, %v3780_v4  ;;  %v4111_v10 = vrot.slane %v8384_v48, %v6325_v28  ;;  %v9465_v4 = vld [vmem:[#allocation136_spill] sm:$0xff]  ;;  %v9470_v26 = vld [vmem:[#allocation82_spill] sm:$0xff]  ;;  %v9471_v18 = vld [vmem:[#allocation55_spill] sm:$0xff] }
 0x1e7   : > { %v3956_v7 = vrot.slane %v1352_v39, %v6392_v1  ;;  %v3973_v35 = vsel %vm1980_vm3, %v3948_v55, %v3944_v3  ;;  %v4115_v45 = vrot.slane %v1352_v39, %v6325_v28  ;;  %v4132_v52 = vsel %vm1980_vm3, %v4107_v21, %v4103_v40  ;;  %v9468_v3 = vld [vmem:[#allocation79_spill] sm:$0xff]  ;;  %v9469_v39 = vld [vmem:[#allocation78_spill] sm:$0xff] }
 0x1e8   : > { %v3769_v43 = vsel %vm1988_vm7, %v9452_v14, %v3768_v0  ;;  %v3776_v38 = vsel %vm1988_vm7, %v9453_v19, %v3775_v53  ;;  %v3782_v5 = vsel %vm1986_vm6, %v9454_v25, %v3781_v58  ;;  %v3788_v36 = vsel %vm1984_vm5, %v9458_v42, %v3787_v23  ;;  %v9472_v58 = vld [vmem:[#allocation85_spill] sm:$0xff] }
 0x1e9   : > { %v3770_v30 = vsel %vm1990_vm8, %v9455_v16, %v3769_v43  ;;  %v3777_v44 = vsel %vm1990_vm8, %v9456_v17, %v3776_v38  ;;  %v3783_v50 = vsel %vm1988_vm7, %v9457_v12, %v3782_v5  ;;  %v3789_v54 = vsel %vm1986_vm6, %v8035_v59, %v3788_v36  ;;  %v9473_v25 = vld [vmem:[#allocation133_spill] sm:$0xff] }
 0x1ea   : > { %v3771_v56 = vsel %vm1992_vm9, %v9459_v27, %v3770_v30  ;;  %v3778_v20 = vsel %vm1992_vm9, %v9460_v37, %v3777_v44  ;;  %v3784_v62 = vsel %vm1990_vm8, %v8020_v9, %v3783_v50  ;;  %v3790_v11 = vsel %vm1988_vm7, %v8039_v49, %v3789_v54  ;;  %v9464_v9 = vld [vmem:[#allocation80_spill] sm:$0xff]  ;;  %v9474_v16 = vld [vmem:[#allocation145_spill] sm:$0xff] }
 0x1eb   : > { %5753 = vmatprep.mubr.msk.f32.mxu1 %vm481_vm1, %v3771_v56  ;;  %v3785_v34 = vsel %vm1992_vm9, %v9461_v29, %v3784_v62  ;;  %v3794_v61 = vsel %vm1982_vm4, %v7358_v24, %v9462_v31  ;;  %v3801_v22 = vsel %vm1982_vm4, %v9463_v60, %v3800_v13  ;;  %v3791_v59 = vsel %vm1990_vm8, %v9464_v9, %v3790_v11  ;;  %v9467_v24 = vld [vmem:[#allocation118_spill] sm:$0xff]  ;;  %v9475_v27 = vld [vmem:[#allocation5_spill] sm:$0xff]  ;;  %v9477_v62 = vld [vmem:[#allocation36_spill] sm:$0xff] }
 0x1ec   : > { %5754 = vmatmul.mubr.msk.f32.gmra.mrb[6].mxu1 %vm481_vm1, %v3778_v20  ;;  %v3795_v48 = vsel %vm1984_vm5, %v9465_v4, %v3794_v61  ;;  %v3802_v51 = vsel %vm1984_vm5, %v9466_v32, %v3801_v22  ;;  %v1369_v49 = vcombine.high %v8387_v63, %v8387_v63  ;;  %v4263_v23 = vsel %vm1980_vm3, %v3952_v6, %v3948_v55  ;;  %v8544_v61 = vld [vmem:[%s8968_s2 + $0x20] sm:$0xf]  ;;  %v9478_v22 = vld [vmem:[#allocation6_spill] sm:$0xff]  ;;  %v9481_v32 = vld [vmem:[#allocation8_spill] sm:$0xff] }
 0x1ed   : > { %5756 = vmatprep.mubr.msk.f32.mxu1 %vm481_vm1, %v3785_v34  ;;  %v3792_v13 = vsel %vm1992_vm9, %v9467_v24, %v3791_v59  ;;  %v3796_v40 = vsel %vm1986_vm6, %v9468_v3, %v3795_v48  ;;  %v3803_v21 = vsel %vm1986_vm6, %v9469_v39, %v3802_v51  ;;  %v3964_v55 = vrot.slane %v8395_v46, %v6392_v1  ;;  %v9479_v59 = vld [vmem:[#allocation40_spill] sm:$0xff] }
 0x1ee   : > { %v3797_v0 = vsel %vm1988_vm7, %v9470_v26, %v3796_v40  ;;  %v3804_v53 = vsel %vm1988_vm7, %v9471_v18, %v3803_v21  ;;  %v3968_v57 = vrot.slane %v8387_v63, %v6392_v1  ;;  %v3972_v19 = vrot.slane %v1369_v49, %v6392_v1  ;;  %v9482_v40 = vld [vmem:[#allocation9_spill] sm:$0xff]  ;;  %v9483_v26 = vld [vmem:[#allocation139_spill] sm:$0xff] }
 0x1ef   : > { %v3798_v14 = vsel %vm1990_vm8, %v9472_v58, %v3797_v0  ;;  %v3805_v43 = vsel %vm1990_vm8, %v8117_v8, %v3804_v53  ;;  %v3974_v38 = vsel %vm1982_vm4, %v3952_v6, %v3973_v35  ;;  %v4123_v44 = vrot.slane %v8395_v46, %v6325_v28  ;;  %v9484_v53 = vld [vmem:[#allocation11_spill] sm:$0xff]  ;;  %v9485_v58 = vld [vmem:[#allocation141_spill] sm:$0xff] }
 0x1f0   : > { %5757 = vmatmul.mubr.msk.f32.gmra.mrb[0].mxu1 %vm481_vm1, %v3792_v13  ;;  %v3799_v5 = vsel %vm1992_vm9, %v9473_v25, %v3798_v14  ;;  %v3806_v30 = vsel %vm1992_vm9, %v9474_v16, %v3805_v43  ;;  %v3975_v17 = vsel %vm1984_vm5, %v3956_v7, %v3974_v38  ;;  %v4127_v6 = vrot.slane %v8387_v63, %v6325_v28 }
 0x1f1   : > { %5759 = vmatprep.mubr.msk.f32.mxu1 %vm481_vm1, %v3799_v5  ;;  %v3976_v8 = vsel %vm1986_vm6, %v8400_v33, %v3975_v17  ;;  %v4133_v35 = vsel %vm1982_vm4, %v4111_v10, %v4132_v52  ;;  %v4264_v12 = vsel %vm1982_vm4, %v3956_v7, %v4263_v23  ;;  %v4131_v42 = vrot.slane %v1369_v49, %v6325_v28  ;;  %v9476_v52 = vld [vmem:[#allocation7_spill] sm:$0xff] }
 0x1f2   : > { %v3977_v50 = vsel %vm1988_vm7, %v3964_v55, %v3976_v8  ;;  %v4134_v36 = vsel %vm1984_vm5, %v4115_v45, %v4133_v35  ;;  %v4265_v46 = vsel %vm1984_vm5, %v8400_v33, %v4264_v12  ;;  %v4412_v56 = vcombine.high %v9475_v27, %v9475_v27  ;;  %v9487_v35 = vld [vmem:[#allocation12_spill] sm:$0xff] }
 0x1f3   : > { %v3978_v37 = vsel %vm1990_vm8, %v3968_v57, %v3977_v50  ;;  %v4135_v63 = vsel %vm1986_vm6, %v4119_v15, %v4134_v36  ;;  %v4266_v10 = vsel %vm1986_vm6, %v3964_v55, %v4265_v46  ;;  %v4419_v7 = vrot.slane %v9475_v27, %v6318_v2  ;;  %v9488_v50 = vld [vmem:[#allocation143_spill] sm:$0xff] }
 0x1f4   : > { %5760 = vmatmul.mubr.msk.f32.gmra.mrb[2].mxu1 %vm481_vm1, %v3806_v30  ;;  %v8519_v28 = vsel %vm1992_vm9, %v3972_v19, %v3978_v37  ;;  %v4136_v45 = vsel %vm1988_vm7, %v4123_v44, %v4135_v63  ;;  %v4267_v33 = vsel %vm1988_vm7, %v3968_v57, %v4266_v10  ;;  %v4446_v20 = vcombine.high %v9476_v52, %v9476_v52  ;;  %v9486_v30 = vld [vmem:[#allocation10_spill] sm:$0xff] }
 0x1f5   : > { %5764 = vmatprep.mubr.msk.f32.mxu1 %vm481_vm1, %v9477_v62  ;;  %v4137_v15 = vsel %vm1990_vm8, %v4127_v6, %v4136_v45  ;;  %v4268_v54 = vsel %vm1990_vm8, %v3972_v19, %v4267_v33  ;;  %v4453_v29 = vrot.slane %v9476_v52, %v6318_v2  ;;  %v8539_v31 = vrot.slane %v4412_v56, %v6318_v2  ;;  %v9489_v56 = vld [vmem:[#allocation146_spill] sm:$0xff] }
 0x1f6   : > { %v8532_v34 = vsel %vm1992_vm9, %v4131_v42, %v4137_v15  ;;  %v8536_v11 = vsel %vm1992_vm9, %v8369_v41, %v4268_v54  ;;  %v4427_v60 = vcombine.high %v4419_v7, %v4419_v7  ;;  %v8548_v9 = vrot.slane %v9478_v22, %v6318_v2  ;;  %v9480_v41 = vld [vmem:[#allocation37_spill] sm:$0xff] }
 0x1f7   : > { %v8553_v4 = vrot.slane %v4446_v20, %v6318_v2  ;;  %v4461_v48 = vcombine.high %v4453_v29, %v4453_v29  ;;  %v8561_v51 = vrot.slane %v9481_v32, %v6318_v2  ;;  %v4428_v49 = vcombine.high %v8539_v31, %v8539_v31 }
 0x1f8   : > { %5765 = vmatmul.mubr.msk.f32.vlgmr.msra.gmra.mrb[4].mxu1 %vm481_vm1, %v9479_v59  ;;  %v4688_v23 = vrot.slane %v4419_v7, %v6392_v1  ;;  %v4429_v24 = vcombine.high %v9478_v22, %v9478_v22  ;;  %v4692_v13 = vrot.slane %v4427_v60, %v6392_v1  ;;  %v4444_v3 = vcombine.high %v8548_v9, %v8548_v9  ;;  %v9490_v59 = vld [vmem:[#allocation84_spill] sm:$0xff] }
 0x1f9   : > { %5777 = vmatpush3.msk.msra.mxu1 %vm578_vm0, %v8381_v47  ;;  %5767 = vmatprep.mubr.msk.f32.mxu1 %vm481_vm1, %v9480_v41  ;;  %v4463_v47 = vcombine.high %v9481_v32, %v9481_v32  ;;  %v4480_v39 = vcombine.high %v9482_v40, %v9482_v40  ;;  %v8579_v21 = vrot.slane %v9482_v40, %v6318_v2 }
 0x1fa   : > { %5790 = vmatprep.subr.msk.mxu1 %vm578_vm0, %v8544_v61  ;;  %v4704_v0 = vrot.slane %v8548_v9, %v6392_v1  ;;  %v4462_v18 = vcombine.high %v8553_v4, %v8553_v4  ;;  %v4514_v55 = vcombine.high %v9484_v53, %v9484_v53  ;;  %v8591_v57 = vrot.slane %v9484_v53, %v6318_v2 }
 0x1fb   : > { %v4696_v14 = vrot.slane %v8539_v31, %v6392_v1  ;;  %v4720_v43 = vrot.slane %v4453_v29, %v6392_v1  ;;  %v4724_v19 = vrot.slane %v4461_v48, %v6392_v1  ;;  %v4478_v38 = vcombine.high %v8561_v51, %v8561_v51 }
 0x1fc   : > { %5768 = vmatmul.mubr.msk.f32.gmra.mrb[6].mxu1 %vm481_vm1, %v9483_v26  ;;  %v4700_v25 = vrot.slane %v4428_v49, %v6392_v1  ;;  %v4728_v5 = vrot.slane %v8553_v4, %v6392_v1  ;;  %v8605_v16 = vrot.slane %v4463_v47, %v6318_v2  ;;  %v8609_v17 = vrot.slane %v9486_v30, %v6318_v2  ;;  %v4684_v4 = vld [vmem:[%s8970_s4] sm:$0xf] }
 0x1fd   : > { %5770 = vmatprep.mubr.msk.f32.mxu1 %vm481_vm1, %v9485_v58  ;;  %v4941_v44 = vsel %vm1980_vm3, %v4692_v13, %v4688_v23  ;;  %v8613_v8 = vrot.slane %v4480_v39, %v6318_v2  ;;  %v4495_v6 = vcombine.high %v8579_v21, %v8579_v21  ;;  %v8619_v12 = vrot.slane %v9487_v35, %v6318_v2  ;;  %v4411_v49 = vld [vmem:[%s8969_s3] sm:$0xf]  ;;  %v9491_v13 = vld [vmem:[#allocation110_spill] sm:$0xff] }
 0x1fe   : > { %v4732_v42 = vrot.slane %v4462_v18, %v6392_v1  ;;  %v4736_v36 = vrot.slane %v8561_v51, %v6392_v1  ;;  %v8627_v46 = vrot.slane %v4514_v55, %v6318_v2  ;;  %v4529_v27 = vcombine.high %v8591_v57, %v8591_v57  ;;  %5804 = vmatprep.subr.msk.mxu0 %vm578_vm0, %v4684_v4 }
 0x1ff   : > { %v4948_v37 = vsel %vm1980_vm3, %v4724_v19, %v4720_v43  ;;  %v4740_v63 = vrot.slane %v4478_v38, %v6392_v1  ;;  %v4497_v10 = vcombine.high %v9486_v30, %v9486_v30  ;;  %v4531_v7 = vcombine.high %v9487_v35, %v9487_v35  ;;  %5805 = vmatpush3.msk.msra.mxu0 %vm578_vm0, %v4684_v4  ;;  %v9493_v38 = vld [vmem:[#allocation138_spill] sm:$0xff]  ;;  %v9504_v4 = vld [vmem:[#allocation13_spill] sm:$0xff] }
 0x200   : > { %5771 = vmatmul.mubr.msk.f32.gmra.mrb[0].mxu1 %vm481_vm1, %v9488_v50  ;;  %v4752_v45 = vrot.slane %v8579_v21, %v6392_v1  ;;  %v4512_v33 = vcombine.high %v8609_v17, %v8609_v17  ;;  %v4768_v52 = vrot.slane %v8609_v17, %v6392_v1  ;;  %v4784_v20 = vrot.slane %v8591_v57, %v6392_v1  ;;  %v9492_v21 = vld [vmem:[#allocation129_spill] sm:$0xff]  ;;  %v9494_v17 = vld [vmem:[#allocation140_spill] sm:$0xff] }
 0x201   : > { %5773 = vmatprep.mubr.msk.f32.mxu1 %vm481_vm1, %v9489_v56  ;;  %v4496_v62 = vcombine.high %v8613_v8, %v8613_v8  ;;  %v4756_v15 = vrot.slane %v4495_v6, %v6392_v1  ;;  %v4760_v54 = vrot.slane %v8613_v8, %v6392_v1  ;;  %v4546_v29 = vcombine.high %v8619_v12, %v8619_v12 }
 0x202   : > { %v4530_v31 = vcombine.high %v8627_v46, %v8627_v46  ;;  %v4788_v60 = vrot.slane %v4529_v27, %v6392_v1  ;;  %v4792_v22 = vrot.slane %v8627_v46, %v6392_v1  ;;  %v4800_v9 = vrot.slane %v8619_v12, %v6392_v1  ;;  %5818 = vmatprep.subr.msk.mxu0 %vm578_vm0, %v4411_v49 }
 0x203   : > { %v4708_v41 = vrot.slane %v4444_v3, %v6392_v1  ;;  %v4942_v48 = vsel %vm1982_vm4, %v4696_v14, %v4941_v44  ;;  %v4479_v32 = vcombine.high %v8605_v16, %v8605_v16  ;;  %v4744_v23 = vrot.slane %v8605_v16, %v6392_v1 }
 0x204   : > { %5774 = vmatmul.mubr.msk.f32.gmra.mrb[2].mxu1 %vm481_vm1, %v8519_v28  ;;  %v4443_v28 = vrot.slane %v4429_v24, %v6318_v2  ;;  %v4943_v51 = vsel %vm1984_vm5, %v4700_v25, %v4942_v48  ;;  %v4949_v24 = vsel %vm1982_vm4, %v4728_v5, %v4948_v37  ;;  %v4511_v47 = vrot.slane %v4497_v10, %v6318_v2  ;;  %v9495_v37 = vld [vmem:[#allocation142_spill] sm:$0xff] }
 0x205   : > { %5778 = vmatprep.mubr.msk.f32.mxu1 %vm481_vm1, %v9490_v59  ;;  %v4944_v39 = vsel %vm1986_vm6, %v4704_v0, %v4943_v51  ;;  %v4748_v18 = vrot.slane %v4479_v32, %v6392_v1  ;;  %v4950_v53 = vsel %vm1984_vm5, %v4732_v42, %v4949_v24  ;;  %v4764_v14 = vrot.slane %v4496_v62, %v6392_v1  ;;  %v9503_v59 = vld [vmem:[#allocation96_spill] sm:$0xff]  ;;  %v9505_v51 = vld [vmem:[#allocation14_spill] sm:$0xff] }
 0x206   : > { %v4445_v3 = vcombine.high %v4443_v28, %v4443_v28  ;;  %v4712_v40 = vrot.slane %v4443_v28, %v6392_v1  ;;  %v4945_v26 = vsel %vm1988_vm7, %v4708_v41, %v4944_v39  ;;  %v4951_v0 = vsel %vm1986_vm6, %v4736_v36, %v4950_v53 }
 0x207   : > { %v4513_v58 = vcombine.high %v4511_v47, %v4511_v47  ;;  %v4772_v43 = vrot.slane %v4512_v33, %v6392_v1  ;;  %v4776_v19 = vrot.slane %v4511_v47, %v6392_v1  ;;  %v4955_v30 = vsel %vm1980_vm3, %v4756_v15, %v4752_v45 }
 0x208   : > { %5779 = vmatmul.mubr.msk.f32.vlgmr.msra.gmra.mrb[4].mxu1 %vm481_vm1, %v9491_v13  ;;  %v4716_v55 = vrot.slane %v4445_v3, %v6392_v1  ;;  %v4946_v57 = vsel %vm1990_vm8, %v4712_v40, %v4945_v26  ;;  %v4956_v8 = vsel %vm1982_vm4, %v4760_v54, %v4955_v30  ;;  %v4545_v6 = vrot.slane %v4531_v7, %v6318_v2  ;;  %v9496_v7 = vld [vmem:[#allocation144_spill] sm:$0xff]  ;;  %v9507_v40 = vld [vmem:[#allocation17_spill] sm:$0xff] }
 0x209   : > { %5791 = vmatpush3.msk.msra.mxu1 %vm578_vm0, %v8544_v61  ;;  %5781 = vmatprep.mubr.msk.f32.mxu1 %vm481_vm1, %v9492_v21  ;;  %v4952_v61 = vsel %vm1988_vm7, %v4740_v63, %v4951_v0  ;;  %v4780_v16 = vrot.slane %v4513_v58, %v6392_v1  ;;  %v4957_v35 = vsel %vm1984_vm5, %v4764_v14, %v4956_v8  ;;  %v9508_v26 = vld [vmem:[#allocation16_spill] sm:$0xff] }
 0x20a   : > { %v4947_v25 = vsel %vm1992_vm9, %v4716_v55, %v4946_v57  ;;  %v4953_v5 = vsel %vm1990_vm8, %v4744_v23, %v4952_v61  ;;  %v4796_v12 = vrot.slane %v4530_v31, %v6392_v1  ;;  %v4804_v50 = vrot.slane %v4546_v29, %v6392_v1  ;;  %v9497_v29 = vld [vmem:[#allocation39_spill] sm:$0xff]  ;;  %v9498_v31 = vld [vmem:[#allocation38_spill] sm:$0xff] }
 0x20b   : > { %5806 = vmatprep.mubr.msk.f32.mxu0 %vm481_vm1, %v4947_v25  ;;  %v4954_v44 = vsel %vm1992_vm9, %v4748_v18, %v4953_v5  ;;  %v4962_v42 = vsel %vm1980_vm3, %v4788_v60, %v4784_v20  ;;  %v4958_v36 = vsel %vm1986_vm6, %v4768_v52, %v4957_v35  ;;  %v4547_v46 = vcombine.high %v4545_v6, %v4545_v6  ;;  %v9499_v60 = vld [vmem:[#allocation41_spill] sm:$0xff]  ;;  %v9506_v23 = vld [vmem:[#allocation15_spill] sm:$0xff]  ;;  %v9510_v5 = vld [vmem:[#allocation18_spill] sm:$0xff] }
 0x20c   : > { %5782 = vmatmul.mubr.msk.f32.gmra.mrb[6].mxu1 %vm481_vm1, %v9493_v38  ;;  %5807 = vmatmul.mubr.msk.f32.vlgmr.msra.gmra.mrb[40].mxu0 %vm481_vm1, %v4954_v44  ;;  %v4808_v27 = vrot.slane %v4545_v6, %v6392_v1  ;;  %v4963_v56 = vsel %vm1982_vm4, %v4792_v22, %v4962_v42  ;;  %v4959_v63 = vsel %vm1988_vm7, %v4772_v43, %v4958_v36  ;;  %v9500_v22 = vld [vmem:[#allocation34_spill] sm:$0xff]  ;;  %v9509_v55 = vld [vmem:[#allocation19_spill] sm:$0xff] }
 0x20d   : > { %5784 = vmatprep.mubr.msk.f32.mxu1 %vm481_vm1, %v9494_v17  ;;  %5819 = vmatpush3.msk.msra.mxu0 %vm578_vm0, %v4411_v49  ;;  %v4964_v10 = vsel %vm1984_vm5, %v4796_v12, %v4963_v56  ;;  %v4960_v45 = vsel %vm1990_vm8, %v4776_v19, %v4959_v63  ;;  %v4812_v33 = vrot.slane %v4547_v46, %v6392_v1 }
 0x20e   : > { %v4965_v52 = vsel %vm1986_vm6, %v4800_v9, %v4964_v10  ;;  %v4961_v20 = vsel %vm1992_vm9, %v4780_v16, %v4960_v45  ;;  %v9501_v9 = vld [vmem:[#allocation57_spill] sm:$0xff]  ;;  %v4548_v28 = vcombine.high %v9504_v4, %v9504_v4  ;;  %v4555_v48 = vrot.slane %v9504_v4, %v6318_v2 }
 0x20f   : > { %v4966_v62 = vsel %vm1988_vm7, %v4804_v50, %v4965_v52  ;;  %5809 = vmatprep.mubr.msk.f32.mxu0 %vm481_vm1, %v4961_v20  ;;  %v4572_v49 = vrot.slane %v9505_v51, %v6318_v2  ;;  %v4582_v24 = vcombine.high %v9506_v23, %v9506_v23  ;;  %v4589_v47 = vrot.slane %v9506_v23, %v6318_v2  ;;  %v9511_v50 = vld [vmem:[#allocation20_spill] sm:$0xff] }
 0x210   : > { %5785 = vmatmul.mubr.msk.f32.gmra.mrb[0].mxu1 %vm481_vm1, %v9495_v37  ;;  %v4967_v15 = vsel %vm1990_vm8, %v4808_v27, %v4966_v62  ;;  %v4563_v13 = vcombine.high %v4555_v48, %v4555_v48  ;;  %v4565_v3 = vcombine.high %v9505_v51, %v9505_v51  ;;  %v4616_v39 = vcombine.high %v9507_v40, %v9507_v40 }
 0x211   : > { %5787 = vmatprep.mubr.msk.f32.mxu1 %vm481_vm1, %v9496_v7  ;;  %v4968_v54 = vsel %vm1992_vm9, %v4812_v33, %v4967_v15  ;;  %v8777_v21 = vrot.slane %v9507_v40, %v6318_v2  ;;  %v4599_v18 = vcombine.high %v9508_v26, %v9508_v26  ;;  %v4606_v53 = vrot.slane %v9508_v26, %v6318_v2 }
 0x212   : > { %5810 = vmatmul.mubr.msk.f32.gmra.mrb[42].mxu0 %vm481_vm1, %v4968_v54  ;;  %v4650_v57 = vcombine.high %v9509_v55, %v9509_v55  ;;  %v8787_v0 = vrot.slane %v9509_v55, %v6318_v2  ;;  %v4816_v58 = vrot.slane %v4555_v48, %v6392_v1  ;;  %v4580_v61 = vcombine.high %v4572_v49, %v4572_v49 }
 0x213   : > { %v4596_v14 = vrot.slane %v4582_v24, %v6318_v2  ;;  %v4597_v43 = vcombine.high %v4589_v47, %v4589_v47  ;;  %v4832_v38 = vrot.slane %v4572_v49, %v6392_v1  ;;  %v4848_v25 = vrot.slane %v4589_v47, %v6392_v1 }
 0x214   : > { %5788 = vmatmul.mubr.msk.f32.gmra.mrb[2].mxu1 %vm481_vm1, %v8532_v34  ;;  %v9502_v34 = vld [vmem:[#allocation56_spill] sm:$0xff]  ;;  %v8795_v16 = vrot.slane %v9510_v5, %v6318_v2  ;;  %v4820_v30 = vrot.slane %v4563_v13, %v6392_v1  ;;  %v4630_v44 = vrot.slane %v4616_v39, %v6318_v2  ;;  %v4631_v8 = vcombine.high %v8777_v21, %v8777_v21 }
 0x215   : > { %5792 = vmatprep.mubr.msk.f32.mxu1 %vm481_vm1, %v9497_v29  ;;  %v4614_v6 = vcombine.high %v4606_v53, %v4606_v53  ;;  %v8803_v35 = vrot.slane %v4650_v57, %v6318_v2  ;;  %v4665_v12 = vcombine.high %v8787_v0, %v8787_v0  ;;  %v8809_v42 = vrot.slane %v9511_v50, %v6318_v2 }
 0x216   : > { %v4598_v36 = vcombine.high %v4596_v14, %v4596_v14  ;;  %v4852_v46 = vrot.slane %v4597_v43, %v6392_v1  ;;  %v4856_v27 = vrot.slane %v4596_v14, %v6392_v1  ;;  %v4864_v56 = vrot.slane %v4606_v53, %v6392_v1 }
 0x217   : > { %v4880_v37 = vrot.slane %v8777_v21, %v6392_v1  ;;  %v4633_v63 = vcombine.high %v9510_v5, %v9510_v5  ;;  %v4648_v10 = vcombine.high %v8795_v16, %v8795_v16  ;;  %v4667_v7 = vcombine.high %v9511_v50, %v9511_v50 }
 0x218   : > { %5793 = vmatmul.mubr.msk.f32.vlgmr.msra.gmra.mrb[4].mxu1 %vm481_vm1, %v9498_v31  ;;  %v4632_v33 = vcombine.high %v4630_v44, %v4630_v44  ;;  %v4884_v52 = vrot.slane %v4631_v8, %v6392_v1  ;;  %v4896_v20 = vrot.slane %v8795_v16, %v6392_v1  ;;  %v4912_v62 = vrot.slane %v8787_v0, %v6392_v1 }
 0x219   : > { %5795 = vmatprep.mubr.msk.f32.mxu1 %vm481_vm1, %v9499_v60  ;;  %v4888_v54 = vrot.slane %v4630_v44, %v6392_v1  ;;  %v4666_v29 = vcombine.high %v8803_v35, %v8803_v35  ;;  %v4916_v31 = vrot.slane %v4665_v12, %v6392_v1  ;;  %v4682_v60 = vcombine.high %v8809_v42, %v8809_v42 }
 0x21a   : > { %v4860_v48 = vrot.slane %v4598_v36, %v6392_v1  ;;  %v4868_v51 = vrot.slane %v4614_v6, %v6392_v1  ;;  %v4976_v47 = vsel %vm1980_vm3, %v4852_v46, %v4848_v25  ;;  %v4892_v0 = vrot.slane %v4632_v33, %v6392_v1 }
 0x21b   : > { %v4977_v40 = vsel %vm1982_vm4, %v4856_v27, %v4976_v47  ;;  %v4983_v25 = vsel %vm1980_vm3, %v4884_v52, %v4880_v37  ;;  %v4681_v5 = vrot.slane %v4667_v7, %v6318_v2  ;;  %v4924_v44 = vrot.slane %v4666_v29, %v6392_v1 }
 0x21c   : > { %5796 = vmatmul.mubr.msk.f32.gmra.mrb[6].mxu1 %vm481_vm1, %v9500_v22  ;;  %v4579_v22 = vrot.slane %v4565_v3, %v6318_v2  ;;  %v4978_v26 = vsel %vm1984_vm5, %v4860_v48, %v4977_v40  ;;  %v4928_v8 = vrot.slane %v8809_v42, %v6392_v1  ;;  %v4932_v50 = vrot.slane %v4682_v60, %v6392_v1  ;;  %v5470_v60 = vld [vmem:[%s8974_s8] ss:$0 sm:$0xff] }
 0x21d   : > { %5798 = vmatprep.mubr.msk.f32.mxu1 %vm481_vm1, %v9501_v9  ;;  %v4979_v57 = vsel %vm1986_vm6, %v4864_v56, %v4978_v26  ;;  %v4683_v12 = vcombine.high %v4681_v5, %v4681_v5  ;;  %v4990_v36 = vsel %vm1980_vm3, %v4916_v31, %v4912_v62  ;;  %v4936_v27 = vrot.slane %v4681_v5, %v6392_v1 }
 0x21e   : > { %v4581_v49 = vcombine.high %v4579_v22, %v4579_v22  ;;  %v4840_v23 = vrot.slane %v4579_v22, %v6392_v1  ;;  %v4980_v14 = vsel %vm1988_vm7, %v4868_v51, %v4979_v57 }
 0x21f   : > { %v4940_v37 = vrot.slane %v4683_v12, %v6392_v1 }
 0x220   : > { %5799 = vmatmul.mubr.msk.f32.gmra.mrb[0].mxu1 %vm481_vm1, %v9502_v34  ;;  %v4836_v34 = vrot.slane %v4580_v61, %v6392_v1  ;;  %v4844_v39 = vrot.slane %v4581_v49, %v6392_v1 }
 0x221   : > { %5801 = vmatprep.mubr.msk.f32.mxu1 %vm481_vm1, %v9503_v59  ;;  %v4969_v59 = vsel %vm1980_vm3, %v4820_v30, %v4816_v58  ;;  %v4920_v58 = vrot.slane %v8803_v35, %v6392_v1 }
 0x223   : > { %v4991_v56 = vsel %vm1982_vm4, %v4920_v58, %v4990_v36 }
 0x224   : > { %5802 = vmatmul.mubr.msk.f32.gmra.mrb[2].mxu1 %vm481_vm1, %v8536_v11  ;;  %v4562_v11 = vrot.slane %v4548_v28, %v6318_v2  ;;  %v4613_v28 = vrot.slane %v4599_v18, %v6318_v2  ;;  %v4647_v18 = vrot.slane %v4633_v63, %v6318_v2  ;;  %v4992_v63 = vsel %vm1984_vm5, %v4924_v44, %v4991_v56 }
 0x225   : > { %v4993_v33 = vsel %vm1986_vm6, %v4928_v8, %v4992_v63 }
 0x226   : > { %v4564_v19 = vcombine.high %v4562_v11, %v4562_v11  ;;  %v4824_v17 = vrot.slane %v4562_v11, %v6392_v1  ;;  %v4615_v13 = vcombine.high %v4613_v28, %v4613_v28  ;;  %v4872_v3 = vrot.slane %v4613_v28, %v6392_v1 }
 0x227   : > { %v4649_v43 = vcombine.high %v4647_v18, %v4647_v18  ;;  %v4904_v30 = vrot.slane %v4647_v18, %v6392_v1 }
 0x228   : > { %v4828_v9 = vrot.slane %v4564_v19, %v6392_v1  ;;  %v4970_v4 = vsel %vm1982_vm4, %v4824_v17, %v4969_v59  ;;  %v4876_v55 = vrot.slane %v4615_v13, %v6392_v1  ;;  %v4981_v19 = vsel %vm1990_vm8, %v4872_v3, %v4980_v14 }
 0x229   : > { %v4984_v17 = vsel %vm1982_vm4, %v4888_v54, %v4983_v25  ;;  %v4908_v6 = vrot.slane %v4649_v43, %v6392_v1 }
 0x22a   : > { %v4971_v24 = vsel %vm1984_vm5, %v4828_v9, %v4970_v4  ;;  %v4982_v16 = vsel %vm1992_vm9, %v4876_v55, %v4981_v19  ;;  %v4985_v35 = vsel %vm1984_vm5, %v4892_v0, %v4984_v17 }
 0x22b   : > { %v4972_v11 = vsel %vm1986_vm6, %v4832_v38, %v4971_v24  ;;  %v4900_v38 = vrot.slane %v4648_v10, %v6392_v1  ;;  %v4986_v2 = vsel %vm1986_vm6, %v4896_v20, %v4985_v35  ;;  %v4994_v20 = vsel %vm1988_vm7, %v4932_v50, %v4993_v33 }
 0x22c   : > { %v4973_v21 = vsel %vm1988_vm7, %v4836_v34, %v4972_v11  ;;  %v4995_v62 = vsel %vm1990_vm8, %v4936_v27, %v4994_v20 }
 0x22d   : > { %v4974_v53 = vsel %vm1990_vm8, %v4840_v23, %v4973_v21  ;;  %v4987_v46 = vsel %vm1988_vm7, %v4900_v38, %v4986_v2  ;;  %v4996_v54 = vsel %vm1992_vm9, %v4940_v37, %v4995_v62 }
 0x22e   : > { %v4975_v61 = vsel %vm1992_vm9, %v4844_v39, %v4974_v53  ;;  %v4988_v42 = vsel %vm1990_vm8, %v4904_v30, %v4987_v46 }
 0x22f   : > { %5812 = vmatprep.mubr.msk.f32.mxu0 %vm481_vm1, %v4975_v61  ;;  %v4989_v7 = vsel %vm1992_vm9, %v4908_v6, %v4988_v42 }
 0x230   : > { %5813 = vmatmul.mubr.msk.f32.gmra.mrb[44].mxu0 %vm481_vm1, %v4982_v16 }
 0x231   : > { %5815 = vmatprep.mubr.msk.f32.mxu0 %vm481_vm1, %v4989_v7 }
 0x234   : > { %5816 = vmatmul.mubr.msk.f32.gmra.mrb[46].mxu0 %vm481_vm1, %v4996_v54 }
 0x255   : > { %v8758_v41 = vpop.f32.mrb[36].mxu0 }
 0x256   : > { %v8762_v32 = vpop.f32.mrb[37].mxu0 }
 0x263   : > { %v8822_v45 = vpop.f32.mrb[38].mxu0 }
 0x264   : > { %v8829_v15 = vpop.f32.mrb[39].mxu0 }
 0x272   : > { %v5696_v10 = vpop.f32.mrb[32].mxu0 }
 0x273   : > { %v2564_v52 = vpop.f32.mrb[33].mxu0 }
 0x27b   : > { %v5699_v29 = vpop.f32.mrb[34].mxu0 }
 0x27c   : > { %v2574_v1 = vpop.f32.mrb[35].mxu0 }
 0x2eb   : > { %v5794_v31 = vpop.f32.mrb[4].mxu1 }
 0x2ec   : > { %v5834_v22 = vadd.f32 %v5794_v31, %v5696_v10  ;;  %v4341_v9 = vpop.f32.mrb[5].mxu1 }
 0x2ed   : > { %v5835_v34 = vadd.f32 %v4341_v9, %v2564_v52 }
 0x2ee   : > { %v4396_v59 = vadd.f32 %v5834_v22, %v5470_v60 }
 0x2ef   : > { %v4395_v4 = vadd.f32 %v5835_v34, %v5470_v60  ;;  %v5797_v28 = vpop.f32.mrb[6].mxu1 }
 0x2f0   : > { %v5836_v48 = vadd.f32 %v5797_v28, %v5699_v29  ;;  %v4351_v51 = vpop.f32.mrb[7].mxu1  ;;  %v4404_v24 = vmax.f32 %v4396_v59, 0.0 }
 0x2f1   : > { %v4403_v49 = vmax.f32 %v4395_v4, 0.0  ;;  %v5837_v23 = vadd.f32 %v4351_v51, %v2574_v1 }
 0x2f2   : > { %v4398_v47 = vadd.f32 %v5836_v48, %v5470_v60 }
 0x2f3   : > { %v4397_v11 = vadd.f32 %v5837_v23, %v5470_v60  ;;  %v5800_v13 = vpop.f32.mrb[0].mxu1  ;;  %5820 = vmatprep.mubr.msk.f32.mxu0 %vm481_vm1, %v4403_v49 }
 0x2f4   : > { %v5838_v3 = vadd.f32 %v5800_v13, %v8758_v41  ;;  %v4361_v40 = vpop.f32.mrb[1].mxu1  ;;  %5821 = vmatmul.mubr.msk.f32.vlgmr.msra.gmra.mrb[40].mxu0 %vm481_vm1, %v4404_v24  ;;  %v4406_v26 = vmax.f32 %v4398_v47, 0.0 }
 0x2f5   : > { %v4405_v39 = vmax.f32 %v4397_v11, 0.0  ;;  %v5839_v21 = vadd.f32 %v4361_v40, %v8762_v32 }
 0x2f6   : > { %v4400_v18 = vadd.f32 %v5838_v3, %v5470_v60 }
 0x2f7   : > { %v4399_v53 = vadd.f32 %v5839_v21, %v5470_v60  ;;  %v5803_v55 = vpop.f32.mrb[2].mxu1  ;;  %5823 = vmatprep.mubr.msk.f32.mxu0 %vm481_vm1, %v4405_v39 }
 0x2f8   : > { %v5840_v57 = vadd.f32 %v5803_v55, %v8822_v45  ;;  %v4371_v0 = vpop.f32.mrb[3].mxu1  ;;  %5824 = vmatmul.mubr.msk.f32.gmra.mrb[42].mxu0 %vm481_vm1, %v4406_v26  ;;  %v4408_v61 = vmax.f32 %v4400_v18, 0.0 }
 0x2f9   : > { %v4407_v58 = vmax.f32 %v4399_v53, 0.0  ;;  %v5841_v41 = vadd.f32 %v4371_v0, %v8829_v15 }
 0x2fa   : > { %v4402_v14 = vadd.f32 %v5840_v57, %v5470_v60 }
 0x2fb   : > { %v4401_v43 = vadd.f32 %v5841_v41, %v5470_v60  ;;  %5826 = vmatprep.mubr.msk.f32.mxu0 %vm481_vm1, %v4407_v58 }
 0x2fc   : > { %5827 = vmatmul.mubr.msk.f32.gmra.mrb[44].mxu0 %vm481_vm1, %v4408_v61  ;;  %v4410_v19 = vmax.f32 %v4402_v14, 0.0 }
 0x2fd   : > { %v4409_v32 = vmax.f32 %v4401_v43, 0.0 }
 0x2ff   : > { %5829 = vmatprep.mubr.msk.f32.mxu0 %vm481_vm1, %v4409_v32 }
 0x300   : > { %5830 = vmatmul.mubr.msk.f32.gmra.mrb[46].mxu0 %vm481_vm1, %v4410_v19 }
 0x3c7   : > { %v5822_v45 = vpop.f32.mrb[40].mxu0 }
 0x3c8   : > { %5255 = vst.msk [vmem:[%s325_s28 + $0x8] sm:$0xff] %vm5253_vm10, %v5822_v45  ;;  %v5214_v15 = vpop.f32.mrb[41].mxu0 }
 0x3c9   : > { %5254 = vst.msk [vmem:[%s325_s28] sm:$0xff] %vm5253_vm10, %v5214_v15 }
 0x3cb   : > { %v5825_v38 = vpop.f32.mrb[42].mxu0 }
 0x3cc   : > { %5257 = vst.msk [vmem:[%s325_s28 + $0x18] sm:$0xff] %vm5253_vm10, %v5825_v38  ;;  %v5224_v25 = vpop.f32.mrb[43].mxu0 }
 0x3cd   : > { %5256 = vst.msk [vmem:[%s325_s28 + $0x10] sm:$0xff] %vm5253_vm10, %v5224_v25 }
 0x3cf   : > { %v5828_v5 = vpop.f32.mrb[44].mxu0 }
 0x3d0   : > { %5259 = vst.msk [vmem:[%s325_s28 + $0x28] sm:$0xff] %vm5253_vm10, %v5828_v5  ;;  %v5234_v16 = vpop.f32.mrb[45].mxu0 }
 0x3d1   : > { %5258 = vst.msk [vmem:[%s325_s28 + $0x20] sm:$0xff] %vm5253_vm10, %v5234_v16 }
 0x3d3   : > { %v5831_v30 = vpop.f32.mrb[46].mxu0 }
 0x3d4   : > { %5261 = vst.msk [vmem:[%s325_s28 + $0x38] sm:$0xff] %vm5253_vm10, %v5831_v30  ;;  %v5244_v17 = vpop.f32.mrb[47].mxu0 }
 0x3d5   : > { %5260 = vst.msk [vmem:[%s325_s28 + $0x30] sm:$0xff] %vm5253_vm10, %v5244_v17 }
 0x3d6   : > { %5964 = shalt.err (!%p5961_p3)
}
 0x3d7   : > { %s5965_s26 = scalar_lea.hbm %s8919_s21, 1024  ;;  %s5969_s29 = scalar_lea.hbm %s8975_s9, 2048 }
 0x3d8   : > { %p5966_p4 = scmp.ne.s32.totalorder %s8919_s21, %s5965_s26  ;;  %p5970_p9 = scmp.lt.u32.totalorder %s8919_s21, %s8975_s9 }
 0x3d9   : > { %p5971_p10 = scmp.lt.u32.totalorder %s5969_s29, %s5965_s26  ;;  %p5973_p12 = scmp.lt.u32.totalorder %s5965_s26, %s8919_s21 }
 0x3da   : > { %p5967_p7 = pnand %p5966_p4, %p6108_p5 }
 0x3db   : > { %p5972_p11 = por %p5971_p10, %p5970_p9 }
 0x3dc   : > { %p5968_p8 = pneg %p5967_p7 }
 0x3dd   : > { %p5974_p13 = por %p5973_p12, %p5972_p11 }
 0x3df   : > { %p5975_p0 = pnand %p5974_p13, %p5968_p8 }
 0x3e1   : > { %5978 = shalt.err (!%p5975_p0)
}
 0x3e2   : > { %s6018_s22 = smov 128   ;;  %s6019_s23 = smov 8  }
 0x3e3   : > { %5906 = dma.vmem_to_hbm [thread:$0]  (%p6108_p5), %s8921_s14, 1024, %s8919_s21, %s8925_s13, %s6018_s22, %s6018_s22, %s6019_s23  }
 0x3e4 PF: > { %p5912_p1 = scmp.ge.s32.totalorder %s6013_s12, 2  ;;  %s5291_s24 = sand.u32 1, %s6001_s30  }
 0x3e5   : > { %s5292_s25 = scalar_lea.sflag [#allocation3], %s5291_s24 }
 0x3e6   : > { %p5909_p2 = pnand %p5912_p1, %p6112_p6 }
 0x3e8   : > { %5996 = dma.done.wait (!%p5909_p2), %s5292_s25, 1024  }
 0x3e9   : > { %5998 = vsyncadd (!%p5909_p2), %s5292_s25, 4294966272  ;;  %p19_p3 = scmp.ge.s32.totalorder %s6095_s15, 4   ;;  %s9512_s30 = smov %s6005_s10 }
 0x3ea   : > { %s9513_s10 = smov %s6009_s11  ;;  %s9514_s11 = smov %s6106_s18 }
 0x3eb   : > { %s9515_s12 = smov %s6095_s15  ;;  %21 = sbr.rel (!%p19_p3) target bundleno = 3 (0x3), region = 99 }
 0x3f2   :  { %5297 = vsyncpa [#allocation3], 1 }
 0x3f3   :  { %5299 = vsyncpa [#allocation3 + $0x1], 1 }

</bundles_post_ra>
